<compile_context>
chip_gen: v7x
topology: tpu7x:2x2x1
jax: 0.10.0
libtpu: 0.0.40
codegen_flags: <defaults>
</compile_context>

<pallas_src>
import functools
import math

import jax
import jax.numpy as jnp
from jax.experimental import pallas as pl
from jax.experimental.pallas import tpu as pltpu

NUM_CLASSES = 5
ANCHOR_SIZES = (32, 64, 128, 256, 512)
ASPECT_RATIOS = (0.5, 1.0, 2.0)
NUM_ANCHORS_PER_LOC = len(ANCHOR_SIZES) * len(ASPECT_RATIOS)   # 15
PROPOSALS_PER_IMAGE = 8
ROI_OUTPUT_SIZE = 7
ROI_SAMPLING_RATIO = 2
REPRESENTATION_SIZE = 256
BACKBONE_OUT_CHANNELS = 32
BBOX_XFORM_CLIP = math.log(1000.0 / 16.0)

_IMAGENET_MEAN = (0.485, 0.456, 0.406)
_IMAGENET_STD = (0.229, 0.224, 0.225)


def _round_up(x, m):
    return ((x + m - 1) // m) * m


# ----------------------------------------------------------------------------
# Pallas kernel 1: threshold segmentation + ImageNet normalization
# (row-tiled per image, single fused store per block)
# ----------------------------------------------------------------------------
def _segment_kernel(x_ref, o_ref):
    x = x_ref[0]                                          # (3, bh, W), float in [0,1]
    # emulate (x*255).astype(uint8)
    q = jnp.clip(jnp.floor(x * 255.0), 0.0, 255.0)
    gray = 0.299 * q[0] + 0.587 * q[1] + 0.114 * q[2]     # (bh, W)
    seg = jnp.where(gray > 127.0, 1.0, 0.0)               # binary mask in [0,1]
    # scalar compile-time constants; single stacked store (no per-channel stores)
    norm = [(seg - _IMAGENET_MEAN[ci]) * (1.0 / _IMAGENET_STD[ci]) for ci in range(3)]
    o_ref[0] = jnp.stack(norm, axis=0)


def _row_block(h, max_rows=256):
    if h <= max_rows:
        return h
    for bh in range(max_rows, 7, -1):
        if h % bh == 0 and bh % 8 == 0:
            return bh
    return h


def segment_and_normalize(images):
    n, c, h, w = images.shape
    bh = _row_block(h)
    return pl.pallas_call(
        _segment_kernel,
        out_shape=jax.ShapeDtypeStruct((n, c, h, w), jnp.float32),
        grid=(n, h // bh),
        in_specs=[pl.BlockSpec((1, c, bh, w), lambda i, j: (i, 0, j, 0))],
        out_specs=pl.BlockSpec((1, c, bh, w), lambda i, j: (i, 0, j, 0)),
        compiler_params=pltpu.CompilerParams(
            dimension_semantics=("parallel", "parallel")),
    )(images)


# ----------------------------------------------------------------------------
# Pallas kernel 2: tiled matmul + bias (+ optional relu) — bf16 operands,
# f32 accumulate, lane-dense (N padded to 128) outputs.
# ----------------------------------------------------------------------------
def _matmul_bias_kernel(x_ref, w_ref, b_ref, o_ref, *, relu):
    acc = jnp.dot(x_ref[...], w_ref[...], preferred_element_type=jnp.float32)
    acc = acc + b_ref[...]
    if relu:
        acc = jnp.maximum(acc, 0.0)
    o_ref[...] = acc.astype(o_ref.dtype)


def _pick_tm(m):
    if m >= 2048:
        return 512
    if m >= 512:
        return 256      # keep grid >= 2 so both v7x TensorCores get work
    return _round_up(m, 8)


def pallas_linear(x, w, b, relu=False):
    m, k = x.shape
    k2, n = w.shape
    assert k == k2
    kp = _round_up(k, 32)        # sublane / bf16-packing aligned K (zero-padded taps)
    np_ = _round_up(n, 128)      # lane-dense output -> unmasked vector stores
    tm = _pick_tm(m)
    mp = _round_up(m, tm)
    x_p = jnp.pad(x, ((0, mp - m), (0, kp - k))).astype(jnp.bfloat16)
    w_p = jnp.pad(w, ((0, kp - k), (0, np_ - n))).astype(jnp.bfloat16)
    b_p = jnp.pad(b.astype(jnp.float32), (0, np_ - n)).reshape(1, np_)
    out = pl.pallas_call(
        functools.partial(_matmul_bias_kernel, relu=relu),
        out_shape=jax.ShapeDtypeStruct((mp, np_), jnp.float32),
        grid=(mp // tm,),
        in_specs=[
            pl.BlockSpec((tm, kp), lambda i: (i, 0)),
            pl.BlockSpec((kp, np_), lambda i: (0, 0)),
            pl.BlockSpec((1, np_), lambda i: (0, 0)),
        ],
        out_specs=pl.BlockSpec((tm, np_), lambda i: (i, 0)),
        compiler_params=pltpu.CompilerParams(
            dimension_semantics=("parallel",),
            vmem_limit_bytes=32 * 1024 * 1024),
    )(x_p, w_p, b_p)
    return out[:m, :n]


def conv2d_nhwc(x, w, b, stride=1, padding=0, relu=False):
    """Conv2d on NHWC activations with PyTorch (Cout, Cin, kh, kw) weights.
    im2col is built directly in NHWC (no relayout) and fed to the Pallas bf16
    matmul kernel; output stays NHWC."""
    n, h, wd, cin = x.shape
    cout, cin2, kh, kw = w.shape
    assert cin == cin2
    ho = (h + 2 * padding - kh) // stride + 1
    wo = (wd + 2 * padding - kw) // stride + 1
    if kh == 1 and kw == 1 and stride == 1 and padding == 0:
        patches = x.reshape(n * h * wd, cin)
        w_mat = w.reshape(cout, cin).T
    else:
        xp = jnp.pad(x, ((0, 0), (padding, padding), (padding, padding), (0, 0)))
        cols = [xp[:, i:i + stride * ho:stride, j:j + stride * wo:stride, :]
                for i in range(kh) for j in range(kw)]
        # TODO(synk): im2col is still materialized in HBM (bf16, channel-last, no
        # relayout); a fully in-kernel tap accumulation would remove this pass.
        patches = jnp.concatenate(cols, axis=-1).reshape(n * ho * wo, kh * kw * cin)
        w_mat = w.transpose(2, 3, 1, 0).reshape(kh * kw * cin, cout)
    out = pallas_linear(patches, w_mat, b, relu=relu)     # (N*Ho*Wo, Cout)
    return out.reshape(n, ho, wo, cout)


# ----------------------------------------------------------------------------
# Anchor generation / box decoding / ROI align (plain-JAX glue)
# ----------------------------------------------------------------------------
def generate_anchors(feat_h, feat_w, stride):
    scales = jnp.asarray(ANCHOR_SIZES, jnp.float32)
    ratios = jnp.asarray(ASPECT_RATIOS, jnp.float32)
    h_ratios = jnp.sqrt(ratios)
    w_ratios = 1.0 / h_ratios
    ws = (w_ratios[:, None] * scales[None, :]).reshape(-1)
    hs = (h_ratios[:, None] * scales[None, :]).reshape(-1)
    base = jnp.round(jnp.stack([-ws, -hs, ws, hs], axis=1) / 2.0)      # (A, 4)
    shifts_x = jnp.arange(feat_w, dtype=jnp.float32) * stride
    shifts_y = jnp.arange(feat_h, dtype=jnp.float32) * stride
    sy, sx = jnp.meshgrid(shifts_y, shifts_x, indexing="ij")
    shifts = jnp.stack(
        [sx.reshape(-1), sy.reshape(-1), sx.reshape(-1), sy.reshape(-1)], axis=1)
    anchors = (shifts[:, None, :] + base[None, :, :]).reshape(-1, 4)   # (H*W*A, 4)
    return anchors


def decode_boxes(deltas, anchors):
    widths = anchors[:, 2] - anchors[:, 0]
    heights = anchors[:, 3] - anchors[:, 1]
    ctr_x = anchors[:, 0] + 0.5 * widths
    ctr_y = anchors[:, 1] + 0.5 * heights
    dx, dy = deltas[:, 0], deltas[:, 1]
    dw = jnp.minimum(deltas[:, 2], BBOX_XFORM_CLIP)
    dh = jnp.minimum(deltas[:, 3], BBOX_XFORM_CLIP)
    pred_ctr_x = dx * widths + ctr_x
    pred_ctr_y = dy * heights + ctr_y
    pred_w = jnp.exp(dw) * widths
    pred_h = jnp.exp(dh) * heights
    return jnp.stack(
        [pred_ctr_x - 0.5 * pred_w, pred_ctr_y - 0.5 * pred_h,
         pred_ctr_x + 0.5 * pred_w, pred_ctr_y + 0.5 * pred_h], axis=1)


def clip_boxes(boxes, img_h, img_w):
    x1 = jnp.clip(boxes[:, 0], 0.0, float(img_w))
    y1 = jnp.clip(boxes[:, 1], 0.0, float(img_h))
    x2 = jnp.clip(boxes[:, 2], 0.0, float(img_w))
    y2 = jnp.clip(boxes[:, 3], 0.0, float(img_h))
    return jnp.stack([x1, y1, x2, y2], axis=1)


def roi_align_single(feat, rois, output_size, sampling_ratio, spatial_scale):
    # TODO(synk): data-dependent bilinear gather kept in plain JAX; the feature
    # map is tiny, a Pallas/one-hot-matmul version is left for future work.
    hf, wf, c = feat.shape                               # NHWC feature map (per image)
    r = rois.shape[0]
    sr = sampling_ratio
    x1 = rois[:, 0] * spatial_scale
    y1 = rois[:, 1] * spatial_scale
    x2 = rois[:, 2] * spatial_scale
    y2 = rois[:, 3] * spatial_scale
    roi_w = jnp.maximum(x2 - x1, 1.0)
    roi_h = jnp.maximum(y2 - y1, 1.0)
    bin_w = roi_w / output_size
    bin_h = roi_h / output_size
    frac = (jnp.arange(sr, dtype=jnp.float32) + 0.5) / sr
    grid = jnp.arange(output_size, dtype=jnp.float32)
    ys = y1[:, None, None] + (grid[None, :, None] + frac[None, None, :]) * bin_h[:, None, None]
    xs = x1[:, None, None] + (grid[None, :, None] + frac[None, None, :]) * bin_w[:, None, None]
    p = output_size * sr
    ys = ys.reshape(r, p)
    xs = xs.reshape(r, p)

    def bilin_1d(coords, size):
        cc = jnp.clip(coords, 0.0, size - 1.0)
        c0 = jnp.floor(cc)
        c1 = jnp.minimum(c0 + 1.0, size - 1.0)
        w1 = cc - c0
        return c0.astype(jnp.int32), c1.astype(jnp.int32), 1.0 - w1, w1

    y0, y1i, wy0, wy1 = bilin_1d(ys, hf)
    x0, x1i, wx0, wx1 = bilin_1d(xs, wf)

    def gather(yi, xi):
        return feat[yi[:, :, None], xi[:, None, :], :]   # (R, P, P, C)

    val = (wy0[:, :, None, None] * wx0[:, None, :, None] * gather(y0, x0)
           + wy0[:, :, None, None] * wx1[:, None, :, None] * gather(y0, x1i)
           + wy1[:, :, None, None] * wx0[:, None, :, None] * gather(y1i, x0)
           + wy1[:, :, None, None] * wx1[:, None, :, None] * gather(y1i, x1i))
    val = val.reshape(r, output_size, sr, output_size, sr, c).mean(axis=(2, 4))
    return val.transpose(0, 3, 1, 2)                     # (R, C, out, out) — PyTorch flatten order


# ----------------------------------------------------------------------------
# Parameters (deterministic synthetic init)
# ----------------------------------------------------------------------------
def init_params(key):
    def norm(k, shape, scale=0.05):
        return scale * jax.random.normal(k, shape, jnp.float32)

    ks = jax.random.split(key, 9)
    a4 = NUM_ANCHORS_PER_LOC * 4
    flat = BACKBONE_OUT_CHANNELS * ROI_OUTPUT_SIZE * ROI_OUTPUT_SIZE
    return {
        "bb_conv1_w": norm(ks[0], (16, 3, 3, 3)), "bb_conv1_b": jnp.zeros((16,), jnp.float32),
        "bb_conv2_w": norm(ks[1], (BACKBONE_OUT_CHANNELS, 16, 3, 3)),
        "bb_conv2_b": jnp.zeros((BACKBONE_OUT_CHANNELS,), jnp.float32),
        "rpn_conv_w": norm(ks[2], (BACKBONE_OUT_CHANNELS, BACKBONE_OUT_CHANNELS, 3, 3)),
        "rpn_conv_b": jnp.zeros((BACKBONE_OUT_CHANNELS,), jnp.float32),
        "rpn_cls_w": norm(ks[3], (NUM_ANCHORS_PER_LOC, BACKBONE_OUT_CHANNELS, 1, 1)),
        "rpn_cls_b": jnp.zeros((NUM_ANCHORS_PER_LOC,), jnp.float32),
        "rpn_bbox_w": norm(ks[4], (a4, BACKBONE_OUT_CHANNELS, 1, 1)),
        "rpn_bbox_b": jnp.zeros((a4,), jnp.float32),
        "fc1_w": norm(ks[5], (flat, REPRESENTATION_SIZE)),
        "fc1_b": jnp.zeros((REPRESENTATION_SIZE,), jnp.float32),
        "fc2_w": norm(ks[6], (REPRESENTATION_SIZE, REPRESENTATION_SIZE)),
        "fc2_b": jnp.zeros((REPRESENTATION_SIZE,), jnp.float32),
        "cls_w": norm(ks[7], (REPRESENTATION_SIZE, NUM_CLASSES)),
        "cls_b": jnp.zeros((NUM_CLASSES,), jnp.float32),
        "bbox_w": norm(ks[8], (REPRESENTATION_SIZE, NUM_CLASSES * 4)),
        "bbox_b": jnp.zeros((NUM_CLASSES * 4,), jnp.float32),
    }


# ----------------------------------------------------------------------------
# Forward pass
# ----------------------------------------------------------------------------
def segmented_faster_rcnn_forward(params, images):
    n, c, h, w = images.shape

    # 1) preprocess_image (threshold segmentation) + transform normalization
    seg = segment_and_normalize(images)          # NCHW (matches PyTorch preprocess)
    seg = seg.transpose(0, 2, 3, 1)              # single relayout; everything below stays NHWC

    # 2) backbone -> single feature map '0'
    f1 = conv2d_nhwc(seg, params["bb_conv1_w"], params["bb_conv1_b"],
                     stride=2, padding=1, relu=True)
    feat = conv2d_nhwc(f1, params["bb_conv2_w"], params["bb_conv2_b"],
                       stride=2, padding=1, relu=True)
    hf, wf = feat.shape[1], feat.shape[2]

    # 3) RPN head: 3x3 conv, then one FUSED 1x1 matmul for (objectness | box deltas)
    rpn_feat = conv2d_nhwc(feat, params["rpn_conv_w"], params["rpn_conv_b"],
                           stride=1, padding=1, relu=True)
    cin = BACKBONE_OUT_CHANNELS
    w_cls = params["rpn_cls_w"].reshape(NUM_ANCHORS_PER_LOC, cin).T          # (C, 15)
    w_bbox = params["rpn_bbox_w"].reshape(NUM_ANCHORS_PER_LOC * 4, cin).T    # (C, 60)
    w_rpn = jnp.concatenate([w_cls, w_bbox], axis=1)                         # (C, 75)
    b_rpn = jnp.concatenate([params["rpn_cls_b"], params["rpn_bbox_b"]])
    rpn_out = pallas_linear(rpn_feat.reshape(n * hf * wf, cin), w_rpn, b_rpn)
    obj_flat = rpn_out[:, :NUM_ANCHORS_PER_LOC].reshape(n, hf * wf * NUM_ANCHORS_PER_LOC)
    deltas_flat = rpn_out[:, NUM_ANCHORS_PER_LOC:].reshape(
        n, hf * wf * NUM_ANCHORS_PER_LOC, 4)

    # 4) anchors + proposal selection (vmapped over the batch)
    stride = h // hf
    anchors = generate_anchors(hf, wf, stride)

    def select(obj_i, deltas_i):
        boxes = clip_boxes(decode_boxes(deltas_i, anchors), h, w)
        _, idx = jax.lax.top_k(obj_i, PROPOSALS_PER_IMAGE)
        return jnp.take(boxes, idx, axis=0)

    proposals = jax.vmap(select)(obj_flat, deltas_flat)                      # (N, R, 4)
    # TODO(synk): RPN NMS / min-size filtering omitted (no clean Pallas equivalent).

    # 5) MultiScaleRoIAlign (single level '0'), vmapped over batch
    spatial_scale = hf / h
    roi_feats = jax.vmap(lambda f, p: roi_align_single(
        f, p, ROI_OUTPUT_SIZE, ROI_SAMPLING_RATIO, spatial_scale))(feat, proposals)
    roi_feats = roi_feats.reshape(n * PROPOSALS_PER_IMAGE, -1)               # (N*R, C*7*7)

    # 6) TwoMLPHead + FUSED FastRCNNPredictor (cls | bbox in one matmul)
    x = pallas_linear(roi_feats, params["fc1_w"], params["fc1_b"], relu=True)
    x = pallas_linear(x, params["fc2_w"], params["fc2_b"], relu=True)
    w_head = jnp.concatenate([params["cls_w"], params["bbox_w"]], axis=1)    # (256, 25)
    b_head = jnp.concatenate([params["cls_b"], params["bbox_b"]])
    head = pallas_linear(x, w_head, b_head)
    class_logits = head[:, :NUM_CLASSES]
    box_regression = head[:, NUM_CLASSES:]

    # TODO(synk): final postprocess_detections (softmax, score threshold,
    # per-class NMS) omitted; raw head outputs returned instead.
    return {
        "proposals": proposals,                     # (N, R, 4)
        "class_logits": class_logits,               # (N*R, NUM_CLASSES)
        "box_regression": box_regression,           # (N*R, NUM_CLASSES*4)
        "rpn_objectness": obj_flat,                 # (N, H*W*A)
        "rpn_box_deltas": deltas_flat,              # (N, H*W*A, 4)
    }


if __name__ == "__main__":
    key = jax.random.PRNGKey(0)
    k_img, k_par = jax.random.split(key)
    images = jax.random.uniform(k_img, (2, 3, 64, 64), jnp.float32)   # batch=2 RGB 64x64
    params = init_params(k_par)

    out = jax.jit(segmented_faster_rcnn_forward)(params, images)
    jax.block_until_ready(out)

    assert out["proposals"].shape == (2, PROPOSALS_PER_IMAGE, 4)
    assert out["class_logits"].shape == (2 * PROPOSALS_PER_IMAGE, NUM_CLASSES)
    assert out["box_regression"].shape == (2 * PROPOSALS_PER_IMAGE, NUM_CLASSES * 4)
    print("KERNEL_OK")
</pallas_src>

<mosaic_0001>
module attributes {stable_mosaic.version = 11 : i64} {
  func.func @_segment_kernel(%arg0: i32, %arg1: i32, %arg2: memref<1x3x64x64xf32, #tpu.memory_space<vmem>>, %arg3: memref<1x3x64x64xf32, #tpu.memory_space<vmem>>) attributes {dimension_semantics = [#tpu.dimension_semantics<parallel>, #tpu.dimension_semantics<parallel>], iteration_bounds = array<i64: 2, 1>, scalar_prefetch = 0 : i64, scratch_operands = 0 : i64, tpu.core_type = #tpu.core_type<tc>, window_params = [{transform_indices = @transform_0, window_bounds = array<i64: 1, 3, 64, 64>}, {transform_indices = @transform_1, window_bounds = array<i64: 1, 3, 64, 64>}]} {
    %c0 = arith.constant 0 : index
    %c0_0 = arith.constant 0 : index
    %c0_1 = arith.constant 0 : index
    %c0_2 = arith.constant 0 : index
    %0 = vector.load %arg2[%c0, %c0_0, %c0_1, %c0_2] : memref<1x3x64x64xf32, #tpu.memory_space<vmem>>, vector<1x3x64x64xf32>
    %1 = vector.shape_cast %0 : vector<1x3x64x64xf32> to vector<3x64x64xf32>
    %cst = arith.constant 2.550000e+02 : f32
    %2 = vector.broadcast %cst : f32 to vector<3x64x64xf32>
    %3 = arith.mulf %1, %2 : vector<3x64x64xf32>
    %4 = math.floor %3 : vector<3x64x64xf32>
    %cst_3 = arith.constant 0.000000e+00 : f32
    %cst_4 = arith.constant 2.550000e+02 : f32
    %5 = vector.broadcast %cst_3 : f32 to vector<3x64x64xf32>
    %6 = arith.maximumf %5, %4 : vector<3x64x64xf32>
    %7 = vector.broadcast %cst_4 : f32 to vector<3x64x64xf32>
    %8 = arith.minimumf %7, %6 : vector<3x64x64xf32>
    %9 = vector.extract_strided_slice %8 {offsets = [0, 0, 0], sizes = [1, 64, 64], strides = [1, 1, 1]} : vector<3x64x64xf32> to vector<1x64x64xf32>
    %10 = vector.shape_cast %9 : vector<1x64x64xf32> to vector<64x64xf32>
    %cst_5 = arith.constant 2.990000e-01 : f32
    %11 = vector.broadcast %cst_5 : f32 to vector<64x64xf32>
    %12 = arith.mulf %11, %10 : vector<64x64xf32>
    %13 = vector.extract_strided_slice %8 {offsets = [1, 0, 0], sizes = [1, 64, 64], strides = [1, 1, 1]} : vector<3x64x64xf32> to vector<1x64x64xf32>
    %14 = vector.shape_cast %13 : vector<1x64x64xf32> to vector<64x64xf32>
    %cst_6 = arith.constant 5.870000e-01 : f32
    %15 = vector.broadcast %cst_6 : f32 to vector<64x64xf32>
    %16 = arith.mulf %15, %14 : vector<64x64xf32>
    %17 = arith.addf %12, %16 : vector<64x64xf32>
    %18 = vector.extract_strided_slice %8 {offsets = [2, 0, 0], sizes = [1, 64, 64], strides = [1, 1, 1]} : vector<3x64x64xf32> to vector<1x64x64xf32>
    %19 = vector.shape_cast %18 : vector<1x64x64xf32> to vector<64x64xf32>
    %cst_7 = arith.constant 1.140000e-01 : f32
    %20 = vector.broadcast %cst_7 : f32 to vector<64x64xf32>
    %21 = arith.mulf %20, %19 : vector<64x64xf32>
    %22 = arith.addf %17, %21 : vector<64x64xf32>
    %cst_8 = arith.constant 1.270000e+02 : f32
    %23 = vector.broadcast %cst_8 : f32 to vector<64x64xf32>
    %24 = arith.cmpf ogt, %22, %23 : vector<64x64xf32>
    %cst_9 = arith.constant 1.000000e+00 : f32
    %cst_10 = arith.constant 0.000000e+00 : f32
    %25 = vector.broadcast %cst_9 : f32 to vector<64x64xf32>
    %26 = vector.broadcast %cst_10 : f32 to vector<64x64xf32>
    %27 = arith.select %24, %25, %26 : vector<64x64xi1>, vector<64x64xf32>
    %cst_11 = arith.constant 4.850000e-01 : f32
    %28 = vector.broadcast %cst_11 : f32 to vector<64x64xf32>
    %29 = arith.subf %27, %28 : vector<64x64xf32>
    %cst_12 = arith.constant 4.36681223 : f32
    %30 = vector.broadcast %cst_12 : f32 to vector<64x64xf32>
    %31 = arith.mulf %29, %30 : vector<64x64xf32>
    %cst_13 = arith.constant 4.560000e-01 : f32
    %32 = vector.broadcast %cst_13 : f32 to vector<64x64xf32>
    %33 = arith.subf %27, %32 : vector<64x64xf32>
    %cst_14 = arith.constant 4.46428585 : f32
    %34 = vector.broadcast %cst_14 : f32 to vector<64x64xf32>
    %35 = arith.mulf %33, %34 : vector<64x64xf32>
    %cst_15 = arith.constant 4.060000e-01 : f32
    %36 = vector.broadcast %cst_15 : f32 to vector<64x64xf32>
    %37 = arith.subf %27, %36 : vector<64x64xf32>
    %cst_16 = arith.constant 4.44444466 : f32
    %38 = vector.broadcast %cst_16 : f32 to vector<64x64xf32>
    %39 = arith.mulf %37, %38 : vector<64x64xf32>
    %40 = vector.shape_cast %31 : vector<64x64xf32> to vector<1x64x64xf32>
    %41 = vector.shape_cast %35 : vector<64x64xf32> to vector<1x64x64xf32>
    %42 = vector.shape_cast %39 : vector<64x64xf32> to vector<1x64x64xf32>
    %43 = tpu.concatenate %40, %41, %42 in 0 : vector<1x64x64xf32>, vector<1x64x64xf32>, vector<1x64x64xf32> -> vector<3x64x64xf32>
    %c0_17 = arith.constant 0 : index
    %c0_18 = arith.constant 0 : index
    %c0_19 = arith.constant 0 : index
    %c0_20 = arith.constant 0 : index
    %44 = vector.load %arg3[%c0_17, %c0_18, %c0_19, %c0_20] : memref<1x3x64x64xf32, #tpu.memory_space<vmem>>, vector<1x3x64x64xf32>
    %45 = vector.shape_cast %44 : vector<1x3x64x64xf32> to vector<3x64x64xf32>
    %46 = vector.shape_cast %43 : vector<3x64x64xf32> to vector<1x3x64x64xf32>
    tpu.vector_store %arg3[%c0_17, %c0_18, %c0_19, %c0_20], %46 {strides = array<i32>} : memref<1x3x64x64xf32, #tpu.memory_space<vmem>>, vector<1x3x64x64xf32>,
    return
  }
  func.func @transform_0(%arg0: i32, %arg1: i32) -> (i32, i32, i32, i32) {
    %c0_i32 = arith.constant 0 : i32
    %c0_i32_0 = arith.constant 0 : i32
    %c0_i32_1 = arith.constant 0 : i32
    return %arg0, %c0_i32, %arg1, %c0_i32_0 : i32, i32, i32, i32
  }
  func.func @transform_1(%arg0: i32, %arg1: i32) -> (i32, i32, i32, i32) {
    %c0_i32 = arith.constant 0 : i32
    %c0_i32_0 = arith.constant 0 : i32
    %c0_i32_1 = arith.constant 0 : i32
    return %arg0, %c0_i32, %arg1, %c0_i32_0 : i32, i32, i32, i32
  }
}

module attributes {stable_mosaic.version = 11 : i64} {
  func.func @_matmul_bias_kernel(%arg0: i32, %arg1: memref<512x32xbf16, #tpu.memory_space<vmem>>, %arg2: memref<32x128xbf16, #tpu.memory_space<vmem>>, %arg3: memref<1x128xf32, #tpu.memory_space<vmem>>, %arg4: memref<512x128xf32, #tpu.memory_space<vmem>>) attributes {dimension_semantics = [#tpu.dimension_semantics<parallel>], iteration_bounds = array<i64: 4>, scalar_prefetch = 0 : i64, scratch_operands = 0 : i64, tpu.core_type = #tpu.core_type<tc>, window_params = [{transform_indices = @transform_0, window_bounds = array<i64: 512, 32>}, {pipeline_mode = #tpu.pipeline_mode<synchronous>, transform_indices = @transform_1, window_bounds = array<i64: 32, 128>}, {pipeline_mode = #tpu.pipeline_mode<synchronous>, transform_indices = @transform_2, window_bounds = array<i64: 1, 128>}, {transform_indices = @transform_3, window_bounds = array<i64: 512, 128>}]} {
    %c0 = arith.constant 0 : index
    %c0_0 = arith.constant 0 : index
    %0 = vector.load %arg1[%c0, %c0_0] : memref<512x32xbf16, #tpu.memory_space<vmem>>, vector<512x32xbf16>
    %c0_1 = arith.constant 0 : index
    %c0_2 = arith.constant 0 : index
    %1 = vector.load %arg2[%c0_1, %c0_2] : memref<32x128xbf16, #tpu.memory_space<vmem>>, vector<32x128xbf16>
    %cst = arith.constant dense<0.000000e+00> : vector<512x128xf32>
    %2 = tpu.matmul %0, %1, %cst {dimension_numbers = #tpu.dot_dimension_numbers<[1], [0], [0], [1], [0, 0, 1, 1], [], []>} : vector<512x32xbf16>, vector<32x128xbf16>, vector<512x128xf32> -> vector<512x128xf32>
    %c0_3 = arith.constant 0 : index
    %c0_4 = arith.constant 0 : index
    %3 = vector.load %arg3[%c0_3, %c0_4] : memref<1x128xf32, #tpu.memory_space<vmem>>, vector<1x128xf32>
    %4 = vector.broadcast %3 : vector<1x128xf32> to vector<512x128xf32>
    %5 = arith.addf %2, %4 : vector<512x128xf32>
    %cst_5 = arith.constant 0.000000e+00 : f32
    %6 = vector.broadcast %cst_5 : f32 to vector<512x128xf32>
    %7 = arith.maximumf %5, %6 : vector<512x128xf32>
    %c0_6 = arith.constant 0 : index
    %c0_7 = arith.constant 0 : index
    %8 = vector.load %arg4[%c0_6, %c0_7] : memref<512x128xf32, #tpu.memory_space<vmem>>, vector<512x128xf32>
    tpu.vector_store %arg4[%c0_6, %c0_7], %7 {strides = array<i32>} : memref<512x128xf32, #tpu.memory_space<vmem>>, vector<512x128xf32>,
    return
  }
  func.func @transform_0(%arg0: i32) -> (i32, i32) {
    %c0_i32 = arith.constant 0 : i32
    %c0_i32_0 = arith.constant 0 : i32
    return %arg0, %c0_i32 : i32, i32
  }
  func.func @transform_1(%arg0: i32) -> (i32, i32) {
    %c0_i32 = arith.constant 0 : i32
    %c0_i32_0 = arith.constant 0 : i32
    %c0_i32_1 = arith.constant 0 : i32
    return %c0_i32, %c0_i32_0 : i32, i32
  }
  func.func @transform_2(%arg0: i32) -> (i32, i32) {
    %c0_i32 = arith.constant 0 : i32
    %c0_i32_0 = arith.constant 0 : i32
    %c0_i32_1 = arith.constant 0 : i32
    return %c0_i32, %c0_i32_0 : i32, i32
  }
  func.func @transform_3(%arg0: i32) -> (i32, i32) {
    %c0_i32 = arith.constant 0 : i32
    %c0_i32_0 = arith.constant 0 : i32
    return %arg0, %c0_i32 : i32, i32
  }
}

module attributes {stable_mosaic.version = 11 : i64} {
  func.func @_matmul_bias_kernel(%arg0: i32, %arg1: memref<256x160xbf16, #tpu.memory_space<vmem>>, %arg2: memref<160x128xbf16, #tpu.memory_space<vmem>>, %arg3: memref<1x128xf32, #tpu.memory_space<vmem>>, %arg4: memref<256x128xf32, #tpu.memory_space<vmem>>) attributes {dimension_semantics = [#tpu.dimension_semantics<parallel>], iteration_bounds = array<i64: 2>, scalar_prefetch = 0 : i64, scratch_operands = 0 : i64, tpu.core_type = #tpu.core_type<tc>, window_params = [{transform_indices = @transform_0, window_bounds = array<i64: 256, 160>}, {pipeline_mode = #tpu.pipeline_mode<synchronous>, transform_indices = @transform_1, window_bounds = array<i64: 160, 128>}, {pipeline_mode = #tpu.pipeline_mode<synchronous>, transform_indices = @transform_2, window_bounds = array<i64: 1, 128>}, {transform_indices = @transform_3, window_bounds = array<i64: 256, 128>}]} {
    %c0 = arith.constant 0 : index
    %c0_0 = arith.constant 0 : index
    %0 = vector.load %arg1[%c0, %c0_0] : memref<256x160xbf16, #tpu.memory_space<vmem>>, vector<256x160xbf16>
    %c0_1 = arith.constant 0 : index
    %c0_2 = arith.constant 0 : index
    %1 = vector.load %arg2[%c0_1, %c0_2] : memref<160x128xbf16, #tpu.memory_space<vmem>>, vector<160x128xbf16>
    %cst = arith.constant dense<0.000000e+00> : vector<256x128xf32>
    %2 = tpu.matmul %0, %1, %cst {dimension_numbers = #tpu.dot_dimension_numbers<[1], [0], [0], [1], [0, 0, 1, 1], [], []>} : vector<256x160xbf16>, vector<160x128xbf16>, vector<256x128xf32> -> vector<256x128xf32>
    %c0_3 = arith.constant 0 : index
    %c0_4 = arith.constant 0 : index
    %3 = vector.load %arg3[%c0_3, %c0_4] : memref<1x128xf32, #tpu.memory_space<vmem>>, vector<1x128xf32>
    %4 = vector.broadcast %3 : vector<1x128xf32> to vector<256x128xf32>
    %5 = arith.addf %2, %4 : vector<256x128xf32>
    %cst_5 = arith.constant 0.000000e+00 : f32
    %6 = vector.broadcast %cst_5 : f32 to vector<256x128xf32>
    %7 = arith.maximumf %5, %6 : vector<256x128xf32>
    %c0_6 = arith.constant 0 : index
    %c0_7 = arith.constant 0 : index
    %8 = vector.load %arg4[%c0_6, %c0_7] : memref<256x128xf32, #tpu.memory_space<vmem>>, vector<256x128xf32>
    tpu.vector_store %arg4[%c0_6, %c0_7], %7 {strides = array<i32>} : memref<256x128xf32, #tpu.memory_space<vmem>>, vector<256x128xf32>,
    return
  }
  func.func @transform_0(%arg0: i32) -> (i32, i32) {
    %c0_i32 = arith.constant 0 : i32
    %c0_i32_0 = arith.constant 0 : i32
    return %arg0, %c0_i32 : i32, i32
  }
  func.func @transform_1(%arg0: i32) -> (i32, i32) {
    %c0_i32 = arith.constant 0 : i32
    %c0_i32_0 = arith.constant 0 : i32
    %c0_i32_1 = arith.constant 0 : i32
    return %c0_i32, %c0_i32_0 : i32, i32
  }
  func.func @transform_2(%arg0: i32) -> (i32, i32) {
    %c0_i32 = arith.constant 0 : i32
    %c0_i32_0 = arith.constant 0 : i32
    %c0_i32_1 = arith.constant 0 : i32
    return %c0_i32, %c0_i32_0 : i32, i32
  }
  func.func @transform_3(%arg0: i32) -> (i32, i32) {
    %c0_i32 = arith.constant 0 : i32
    %c0_i32_0 = arith.constant 0 : i32
    return %arg0, %c0_i32 : i32, i32
  }
}

module attributes {stable_mosaic.version = 11 : i64} {
  func.func @_matmul_bias_kernel(%arg0: i32, %arg1: memref<256x288xbf16, #tpu.memory_space<vmem>>, %arg2: memref<288x128xbf16, #tpu.memory_space<vmem>>, %arg3: memref<1x128xf32, #tpu.memory_space<vmem>>, %arg4: memref<256x128xf32, #tpu.memory_space<vmem>>) attributes {dimension_semantics = [#tpu.dimension_semantics<parallel>], iteration_bounds = array<i64: 2>, scalar_prefetch = 0 : i64, scratch_operands = 0 : i64, tpu.core_type = #tpu.core_type<tc>, window_params = [{transform_indices = @transform_0, window_bounds = array<i64: 256, 288>}, {pipeline_mode = #tpu.pipeline_mode<synchronous>, transform_indices = @transform_1, window_bounds = array<i64: 288, 128>}, {pipeline_mode = #tpu.pipeline_mode<synchronous>, transform_indices = @transform_2, window_bounds = array<i64: 1, 128>}, {transform_indices = @transform_3, window_bounds = array<i64: 256, 128>}]} {
    %c0 = arith.constant 0 : index
    %c0_0 = arith.constant 0 : index
    %0 = vector.load %arg1[%c0, %c0_0] : memref<256x288xbf16, #tpu.memory_space<vmem>>, vector<256x288xbf16>
    %c0_1 = arith.constant 0 : index
    %c0_2 = arith.constant 0 : index
    %1 = vector.load %arg2[%c0_1, %c0_2] : memref<288x128xbf16, #tpu.memory_space<vmem>>, vector<288x128xbf16>
    %cst = arith.constant dense<0.000000e+00> : vector<256x128xf32>
    %2 = tpu.matmul %0, %1, %cst {dimension_numbers = #tpu.dot_dimension_numbers<[1], [0], [0], [1], [0, 0, 1, 1], [], []>} : vector<256x288xbf16>, vector<288x128xbf16>, vector<256x128xf32> -> vector<256x128xf32>
    %c0_3 = arith.constant 0 : index
    %c0_4 = arith.constant 0 : index
    %3 = vector.load %arg3[%c0_3, %c0_4] : memref<1x128xf32, #tpu.memory_space<vmem>>, vector<1x128xf32>
    %4 = vector.broadcast %3 : vector<1x128xf32> to vector<256x128xf32>
    %5 = arith.addf %2, %4 : vector<256x128xf32>
    %cst_5 = arith.constant 0.000000e+00 : f32
    %6 = vector.broadcast %cst_5 : f32 to vector<256x128xf32>
    %7 = arith.maximumf %5, %6 : vector<256x128xf32>
    %c0_6 = arith.constant 0 : index
    %c0_7 = arith.constant 0 : index
    %8 = vector.load %arg4[%c0_6, %c0_7] : memref<256x128xf32, #tpu.memory_space<vmem>>, vector<256x128xf32>
    tpu.vector_store %arg4[%c0_6, %c0_7], %7 {strides = array<i32>} : memref<256x128xf32, #tpu.memory_space<vmem>>, vector<256x128xf32>,
    return
  }
  func.func @transform_0(%arg0: i32) -> (i32, i32) {
    %c0_i32 = arith.constant 0 : i32
    %c0_i32_0 = arith.constant 0 : i32
    return %arg0, %c0_i32 : i32, i32
  }
  func.func @transform_1(%arg0: i32) -> (i32, i32) {
    %c0_i32 = arith.constant 0 : i32
    %c0_i32_0 = arith.constant 0 : i32
    %c0_i32_1 = arith.constant 0 : i32
    return %c0_i32, %c0_i32_0 : i32, i32
  }
  func.func @transform_2(%arg0: i32) -> (i32, i32) {
    %c0_i32 = arith.constant 0 : i32
    %c0_i32_0 = arith.constant 0 : i32
    %c0_i32_1 = arith.constant 0 : i32
    return %c0_i32, %c0_i32_0 : i32, i32
  }
  func.func @transform_3(%arg0: i32) -> (i32, i32) {
    %c0_i32 = arith.constant 0 : i32
    %c0_i32_0 = arith.constant 0 : i32
    return %arg0, %c0_i32 : i32, i32
  }
}

module attributes {stable_mosaic.version = 11 : i64} {
  func.func @_matmul_bias_kernel(%arg0: i32, %arg1: memref<256x32xbf16, #tpu.memory_space<vmem>>, %arg2: memref<32x128xbf16, #tpu.memory_space<vmem>>, %arg3: memref<1x128xf32, #tpu.memory_space<vmem>>, %arg4: memref<256x128xf32, #tpu.memory_space<vmem>>) attributes {dimension_semantics = [#tpu.dimension_semantics<parallel>], iteration_bounds = array<i64: 2>, scalar_prefetch = 0 : i64, scratch_operands = 0 : i64, tpu.core_type = #tpu.core_type<tc>, window_params = [{transform_indices = @transform_0, window_bounds = array<i64: 256, 32>}, {pipeline_mode = #tpu.pipeline_mode<synchronous>, transform_indices = @transform_1, window_bounds = array<i64: 32, 128>}, {pipeline_mode = #tpu.pipeline_mode<synchronous>, transform_indices = @transform_2, window_bounds = array<i64: 1, 128>}, {transform_indices = @transform_3, window_bounds = array<i64: 256, 128>}]} {
    %c0 = arith.constant 0 : index
    %c0_0 = arith.constant 0 : index
    %0 = vector.load %arg1[%c0, %c0_0] : memref<256x32xbf16, #tpu.memory_space<vmem>>, vector<256x32xbf16>
    %c0_1 = arith.constant 0 : index
    %c0_2 = arith.constant 0 : index
    %1 = vector.load %arg2[%c0_1, %c0_2] : memref<32x128xbf16, #tpu.memory_space<vmem>>, vector<32x128xbf16>
    %cst = arith.constant dense<0.000000e+00> : vector<256x128xf32>
    %2 = tpu.matmul %0, %1, %cst {dimension_numbers = #tpu.dot_dimension_numbers<[1], [0], [0], [1], [0, 0, 1, 1], [], []>} : vector<256x32xbf16>, vector<32x128xbf16>, vector<256x128xf32> -> vector<256x128xf32>
    %c0_3 = arith.constant 0 : index
    %c0_4 = arith.constant 0 : index
    %3 = vector.load %arg3[%c0_3, %c0_4] : memref<1x128xf32, #tpu.memory_space<vmem>>, vector<1x128xf32>
    %4 = vector.broadcast %3 : vector<1x128xf32> to vector<256x128xf32>
    %5 = arith.addf %2, %4 : vector<256x128xf32>
    %c0_5 = arith.constant 0 : index
    %c0_6 = arith.constant 0 : index
    %6 = vector.load %arg4[%c0_5, %c0_6] : memref<256x128xf32, #tpu.memory_space<vmem>>, vector<256x128xf32>
    tpu.vector_store %arg4[%c0_5, %c0_6], %5 {strides = array<i32>} : memref<256x128xf32, #tpu.memory_space<vmem>>, vector<256x128xf32>,
    return
  }
  func.func @transform_0(%arg0: i32) -> (i32, i32) {
    %c0_i32 = arith.constant 0 : i32
    %c0_i32_0 = arith.constant 0 : i32
    return %arg0, %c0_i32 : i32, i32
  }
  func.func @transform_1(%arg0: i32) -> (i32, i32) {
    %c0_i32 = arith.constant 0 : i32
    %c0_i32_0 = arith.constant 0 : i32
    %c0_i32_1 = arith.constant 0 : i32
    return %c0_i32, %c0_i32_0 : i32, i32
  }
  func.func @transform_2(%arg0: i32) -> (i32, i32) {
    %c0_i32 = arith.constant 0 : i32
    %c0_i32_0 = arith.constant 0 : i32
    %c0_i32_1 = arith.constant 0 : i32
    return %c0_i32, %c0_i32_0 : i32, i32
  }
  func.func @transform_3(%arg0: i32) -> (i32, i32) {
    %c0_i32 = arith.constant 0 : i32
    %c0_i32_0 = arith.constant 0 : i32
    return %arg0, %c0_i32 : i32, i32
  }
}

module attributes {stable_mosaic.version = 11 : i64} {
  func.func @_matmul_bias_kernel(%arg0: i32, %arg1: memref<16x1568xbf16, #tpu.memory_space<vmem>>, %arg2: memref<1568x256xbf16, #tpu.memory_space<vmem>>, %arg3: memref<1x256xf32, #tpu.memory_space<vmem>>, %arg4: memref<16x256xf32, #tpu.memory_space<vmem>>) attributes {dimension_semantics = [#tpu.dimension_semantics<parallel>], iteration_bounds = array<i64: 1>, scalar_prefetch = 0 : i64, scratch_operands = 0 : i64, tpu.core_type = #tpu.core_type<tc>, window_params = [{transform_indices = @transform_0, window_bounds = array<i64: 16, 1568>}, {pipeline_mode = #tpu.pipeline_mode<synchronous>, transform_indices = @transform_1, window_bounds = array<i64: 1568, 256>}, {pipeline_mode = #tpu.pipeline_mode<synchronous>, transform_indices = @transform_2, window_bounds = array<i64: 1, 256>}, {transform_indices = @transform_3, window_bounds = array<i64: 16, 256>}]} {
    %c0 = arith.constant 0 : index
    %c0_0 = arith.constant 0 : index
    %0 = vector.load %arg1[%c0, %c0_0] : memref<16x1568xbf16, #tpu.memory_space<vmem>>, vector<16x1568xbf16>
    %c0_1 = arith.constant 0 : index
    %c0_2 = arith.constant 0 : index
    %1 = vector.load %arg2[%c0_1, %c0_2] : memref<1568x256xbf16, #tpu.memory_space<vmem>>, vector<1568x256xbf16>
    %cst = arith.constant dense<0.000000e+00> : vector<16x256xf32>
    %2 = tpu.matmul %0, %1, %cst {dimension_numbers = #tpu.dot_dimension_numbers<[1], [0], [0], [1], [0, 0, 1, 1], [], []>} : vector<16x1568xbf16>, vector<1568x256xbf16>, vector<16x256xf32> -> vector<16x256xf32>
    %c0_3 = arith.constant 0 : index
    %c0_4 = arith.constant 0 : index
    %3 = vector.load %arg3[%c0_3, %c0_4] : memref<1x256xf32, #tpu.memory_space<vmem>>, vector<1x256xf32>
    %4 = vector.broadcast %3 : vector<1x256xf32> to vector<16x256xf32>
    %5 = arith.addf %2, %4 : vector<16x256xf32>
    %cst_5 = arith.constant 0.000000e+00 : f32
    %6 = vector.broadcast %cst_5 : f32 to vector<16x256xf32>
    %7 = arith.maximumf %5, %6 : vector<16x256xf32>
    %c0_6 = arith.constant 0 : index
    %c0_7 = arith.constant 0 : index
    %8 = vector.load %arg4[%c0_6, %c0_7] : memref<16x256xf32, #tpu.memory_space<vmem>>, vector<16x256xf32>
    tpu.vector_store %arg4[%c0_6, %c0_7], %7 {strides = array<i32>} : memref<16x256xf32, #tpu.memory_space<vmem>>, vector<16x256xf32>,
    return
  }
  func.func @transform_0(%arg0: i32) -> (i32, i32) {
    %c0_i32 = arith.constant 0 : i32
    %c0_i32_0 = arith.constant 0 : i32
    return %arg0, %c0_i32 : i32, i32
  }
  func.func @transform_1(%arg0: i32) -> (i32, i32) {
    %c0_i32 = arith.constant 0 : i32
    %c0_i32_0 = arith.constant 0 : i32
    %c0_i32_1 = arith.constant 0 : i32
    return %c0_i32, %c0_i32_0 : i32, i32
  }
  func.func @transform_2(%arg0: i32) -> (i32, i32) {
    %c0_i32 = arith.constant 0 : i32
    %c0_i32_0 = arith.constant 0 : i32
    %c0_i32_1 = arith.constant 0 : i32
    return %c0_i32, %c0_i32_0 : i32, i32
  }
  func.func @transform_3(%arg0: i32) -> (i32, i32) {
    %c0_i32 = arith.constant 0 : i32
    %c0_i32_0 = arith.constant 0 : i32
    return %arg0, %c0_i32 : i32, i32
  }
}

module attributes {stable_mosaic.version = 11 : i64} {
  func.func @_matmul_bias_kernel(%arg0: i32, %arg1: memref<16x256xbf16, #tpu.memory_space<vmem>>, %arg2: memref<256x256xbf16, #tpu.memory_space<vmem>>, %arg3: memref<1x256xf32, #tpu.memory_space<vmem>>, %arg4: memref<16x256xf32, #tpu.memory_space<vmem>>) attributes {dimension_semantics = [#tpu.dimension_semantics<parallel>], iteration_bounds = array<i64: 1>, scalar_prefetch = 0 : i64, scratch_operands = 0 : i64, tpu.core_type = #tpu.core_type<tc>, window_params = [{transform_indices = @transform_0, window_bounds = array<i64: 16, 256>}, {pipeline_mode = #tpu.pipeline_mode<synchronous>, transform_indices = @transform_1, window_bounds = array<i64: 256, 256>}, {pipeline_mode = #tpu.pipeline_mode<synchronous>, transform_indices = @transform_2, window_bounds = array<i64: 1, 256>}, {transform_indices = @transform_3, window_bounds = array<i64: 16, 256>}]} {
    %c0 = arith.constant 0 : index
    %c0_0 = arith.constant 0 : index
    %0 = vector.load %arg1[%c0, %c0_0] : memref<16x256xbf16, #tpu.memory_space<vmem>>, vector<16x256xbf16>
    %c0_1 = arith.constant 0 : index
    %c0_2 = arith.constant 0 : index
    %1 = vector.load %arg2[%c0_1, %c0_2] : memref<256x256xbf16, #tpu.memory_space<vmem>>, vector<256x256xbf16>
    %cst = arith.constant dense<0.000000e+00> : vector<16x256xf32>
    %2 = tpu.matmul %0, %1, %cst {dimension_numbers = #tpu.dot_dimension_numbers<[1], [0], [0], [1], [0, 0, 1, 1], [], []>} : vector<16x256xbf16>, vector<256x256xbf16>, vector<16x256xf32> -> vector<16x256xf32>
    %c0_3 = arith.constant 0 : index
    %c0_4 = arith.constant 0 : index
    %3 = vector.load %arg3[%c0_3, %c0_4] : memref<1x256xf32, #tpu.memory_space<vmem>>, vector<1x256xf32>
    %4 = vector.broadcast %3 : vector<1x256xf32> to vector<16x256xf32>
    %5 = arith.addf %2, %4 : vector<16x256xf32>
    %cst_5 = arith.constant 0.000000e+00 : f32
    %6 = vector.broadcast %cst_5 : f32 to vector<16x256xf32>
    %7 = arith.maximumf %5, %6 : vector<16x256xf32>
    %c0_6 = arith.constant 0 : index
    %c0_7 = arith.constant 0 : index
    %8 = vector.load %arg4[%c0_6, %c0_7] : memref<16x256xf32, #tpu.memory_space<vmem>>, vector<16x256xf32>
    tpu.vector_store %arg4[%c0_6, %c0_7], %7 {strides = array<i32>} : memref<16x256xf32, #tpu.memory_space<vmem>>, vector<16x256xf32>,
    return
  }
  func.func @transform_0(%arg0: i32) -> (i32, i32) {
    %c0_i32 = arith.constant 0 : i32
    %c0_i32_0 = arith.constant 0 : i32
    return %arg0, %c0_i32 : i32, i32
  }
  func.func @transform_1(%arg0: i32) -> (i32, i32) {
    %c0_i32 = arith.constant 0 : i32
    %c0_i32_0 = arith.constant 0 : i32
    %c0_i32_1 = arith.constant 0 : i32
    return %c0_i32, %c0_i32_0 : i32, i32
  }
  func.func @transform_2(%arg0: i32) -> (i32, i32) {
    %c0_i32 = arith.constant 0 : i32
    %c0_i32_0 = arith.constant 0 : i32
    %c0_i32_1 = arith.constant 0 : i32
    return %c0_i32, %c0_i32_0 : i32, i32
  }
  func.func @transform_3(%arg0: i32) -> (i32, i32) {
    %c0_i32 = arith.constant 0 : i32
    %c0_i32_0 = arith.constant 0 : i32
    return %arg0, %c0_i32 : i32, i32
  }
}

module attributes {stable_mosaic.version = 11 : i64} {
  func.func @_matmul_bias_kernel(%arg0: i32, %arg1: memref<16x256xbf16, #tpu.memory_space<vmem>>, %arg2: memref<256x128xbf16, #tpu.memory_space<vmem>>, %arg3: memref<1x128xf32, #tpu.memory_space<vmem>>, %arg4: memref<16x128xf32, #tpu.memory_space<vmem>>) attributes {dimension_semantics = [#tpu.dimension_semantics<parallel>], iteration_bounds = array<i64: 1>, scalar_prefetch = 0 : i64, scratch_operands = 0 : i64, tpu.core_type = #tpu.core_type<tc>, window_params = [{transform_indices = @transform_0, window_bounds = array<i64: 16, 256>}, {pipeline_mode = #tpu.pipeline_mode<synchronous>, transform_indices = @transform_1, window_bounds = array<i64: 256, 128>}, {pipeline_mode = #tpu.pipeline_mode<synchronous>, transform_indices = @transform_2, window_bounds = array<i64: 1, 128>}, {transform_indices = @transform_3, window_bounds = array<i64: 16, 128>}]} {
    %c0 = arith.constant 0 : index
    %c0_0 = arith.constant 0 : index
    %0 = vector.load %arg1[%c0, %c0_0] : memref<16x256xbf16, #tpu.memory_space<vmem>>, vector<16x256xbf16>
    %c0_1 = arith.constant 0 : index
    %c0_2 = arith.constant 0 : index
    %1 = vector.load %arg2[%c0_1, %c0_2] : memref<256x128xbf16, #tpu.memory_space<vmem>>, vector<256x128xbf16>
    %cst = arith.constant dense<0.000000e+00> : vector<16x128xf32>
    %2 = tpu.matmul %0, %1, %cst {dimension_numbers = #tpu.dot_dimension_numbers<[1], [0], [0], [1], [0, 0, 1, 1], [], []>} : vector<16x256xbf16>, vector<256x128xbf16>, vector<16x128xf32> -> vector<16x128xf32>
    %c0_3 = arith.constant 0 : index
    %c0_4 = arith.constant 0 : index
    %3 = vector.load %arg3[%c0_3, %c0_4] : memref<1x128xf32, #tpu.memory_space<vmem>>, vector<1x128xf32>
    %4 = vector.broadcast %3 : vector<1x128xf32> to vector<16x128xf32>
    %5 = arith.addf %2, %4 : vector<16x128xf32>
    %c0_5 = arith.constant 0 : index
    %c0_6 = arith.constant 0 : index
    %6 = vector.load %arg4[%c0_5, %c0_6] : memref<16x128xf32, #tpu.memory_space<vmem>>, vector<16x128xf32>
    tpu.vector_store %arg4[%c0_5, %c0_6], %5 {strides = array<i32>} : memref<16x128xf32, #tpu.memory_space<vmem>>, vector<16x128xf32>,
    return
  }
  func.func @transform_0(%arg0: i32) -> (i32, i32) {
    %c0_i32 = arith.constant 0 : i32
    %c0_i32_0 = arith.constant 0 : i32
    return %arg0, %c0_i32 : i32, i32
  }
  func.func @transform_1(%arg0: i32) -> (i32, i32) {
    %c0_i32 = arith.constant 0 : i32
    %c0_i32_0 = arith.constant 0 : i32
    %c0_i32_1 = arith.constant 0 : i32
    return %c0_i32, %c0_i32_0 : i32, i32
  }
  func.func @transform_2(%arg0: i32) -> (i32, i32) {
    %c0_i32 = arith.constant 0 : i32
    %c0_i32_0 = arith.constant 0 : i32
    %c0_i32_1 = arith.constant 0 : i32
    return %c0_i32, %c0_i32_0 : i32, i32
  }
  func.func @transform_3(%arg0: i32) -> (i32, i32) {
    %c0_i32 = arith.constant 0 : i32
    %c0_i32_0 = arith.constant 0 : i32
    return %arg0, %c0_i32 : i32, i32
  }
}

</mosaic_0001>

<bundles_post_ra>
// kernel: segmented_faster_rcnn_forward.8
= control target key start
LH: loop header
LB: loop body
LE: loop exit
PB: predicated region body
PF: predicated region fallthrough
CT: control target
= control target key end

     0   :  { %6 = vsyncpa [#allocation3], 0  ;;  %s932_s0 = inlined_call_operand.hbm [shape: f32[2,3,64,64], index: 0, kind: input, shape index: {}]   ;;  %s933_s1 = inlined_call_operand.vmem [shape: f32[2,3,64,64], index: 1, kind: output, shape index: {}]  }
   0x1   :  { %8 = vsyncpa [#allocation3 + $0x1], 0  ;;  %s700_s6 = smov 0   ;;  %s702_s7 = smov 0  }
   0x2   :  { %s704_s8 = smov 0   ;;  %s706_s9 = smov 0  }
   0x3   :  { %s708_s10 = smov 0   ;;  %s710_s11 = smov 0  }
   0x4 LB: > { %s509_s12 = sadd.s32 4294967295, %s684_s11   ;;  %s26_s13 = sadd.s32 1, %s680_s10  ;;  %s684_s11 = sphi %s710_s11, %s14_s11   ;;  %s680_s10 = sphi %s708_s10, %s940_s10   ;;  %s676_s9 = sphi %s706_s9, %s939_s9   ;;  %s672_s8 = sphi %s704_s8, %s938_s8   ;;  %s668_s7 = sphi %s702_s7, %s937_s7   ;;  %s664_s6 = sphi %s700_s6, %s936_s6  }
   0x5   : > { %p28_p0 = scmp.ge.s32.totalorder %s26_s13, 2  ;;  %s35_s14 = sadd.s32 1, %s672_s8 }
   0x6   : > { %p42_p1 = scmp.ne.s32.totalorder %s672_s8, %s668_s7  ;;  %p43_p2 = scmp.eq.s32.totalorder %s684_s11, 0 }
   0x7   : > { %s942_s13 = smov (%p28_p0, %s26_s13), 0  ;;  %p48_p4 = scmp.ne.s32.totalorder %s668_s7, %s664_s6 }
   0x8   : > { %p44_p3 = por %p43_p2, %p42_p1  ;;  %s30_s15 = ssub.s32 %s680_s10, %s942_s13 }
   0x9   : > { %p49_p5 = scmp.eq.s32.totalorder %s509_s12, 0  ;;  %p33_p6 = scmp.eq.s32.totalorder %s30_s15, 0 }
   0xa   : > { %p552_p8 = scmp.lt.s32.totalorder %s684_s11, 2  ;;  %s100_s18 = sand.u32 1, %s672_s8  }
   0xb   : > { %p739_p7 = por %p49_p5, %p48_p4  ;;  %s543_s19 = smul.u32 3072, %s680_s10 }
   0xc   : > { %s745_s17 = scalar_select %p33_p6, %s672_s8, %s35_s14  }
   0xd   : > { %s542_s20 = smul.u32 192, %s100_s18  ;;  %s752_s23 = scalar_lea.hbm %s932_s0, %s543_s19 }
   0xe   : > { %p754_p9 = pnand %p552_p8, %p44_p3  ;;  %s760_s27 = scalar_lea.sflag [#allocation3], %s100_s18 }
   0xf   : > { %s104_s25 = scalar_lea.vmem [#allocation2], %s542_s20  ;;  %s604_s28 = scalar_lea.hbm %s752_s23, 3072 }
  0x10   : > { %s113_s26 = sshll.u32 %s104_s25, 4  ;;  %p605_p10 = scmp.ne.s32.totalorder %s752_s23, %s604_s28  ;;  %s758_s26 = int_to_ptr.vmem [resolvable:$true] %s113_s26 }
  0x11   : > { %p606_p11 = pneg %p754_p9  ;;  %s609_s2 = scalar_lea.hbm %s932_s0, 6144 }
  0x12   : > { %p610_p0 = scmp.lt.u32.totalorder %s752_s23, %s932_s0  ;;  %p611_p1 = scmp.lt.u32.totalorder %s609_s2, %s604_s28 }
  0x13   : > { %p607_p12 = pnand %p606_p11, %p605_p10  ;;  %p613_p3 = scmp.lt.u32.totalorder %s604_s28, %s752_s23 }
  0x14   : > { %p612_p2 = por %p611_p1, %p610_p0 }
  0x15   : > { %p608_p13 = pneg %p607_p12 }
  0x16   : > { %p614_p4 = por %p613_p3, %p612_p2 }
  0x18   : > { %p615_p5 = pnand %p614_p4, %p608_p13 }
  0x1a   : > { %618 = shalt.err (!%p615_p5)
}
  0x1b   : > { %s619_s5 = scalar_lea.vmem %s758_s26, 3072  ;;  %s686_s6 = smov [#allocation2]  }
  0x1c   : > { %p620_p6 = scmp.ne.s32.totalorder %s758_s26, %s619_s5  ;;  %s624_s12 = sshll.u32 %s686_s6, 4  ;;  %s625_s12 = int_to_ptr.vmem [resolvable:$false] %s624_s12 }
  0x1d   : > { %s626_s14 = scalar_lea.vmem %s625_s12, 6144  ;;  %p627_p12 = scmp.lt.s32.totalorder %s758_s26, %s625_s12 }
  0x1e   : > { %p622_p8 = pnand %p620_p6, %p606_p11  ;;  %p628_p0 = scmp.lt.s32.totalorder %s626_s14, %s619_s5 }
  0x20   : > { %p623_p10 = pneg %p622_p8  ;;  %p629_p1 = por %p628_p0, %p627_p12 }
  0x22   : > { %p630_p2 = pnand %p629_p1, %p623_p10 }
  0x24   : > { %633 = shalt.err (!%p630_p2)
}
  0x25   : > { %s687_s15 = smov 128   ;;  %s688_s18 = smov 8  }
  0x26   : > { %551 = dma.hbm_to_vmem [thread:$0]  (!%p754_p9), %s752_s23, 3072, %s758_s26, %s760_s27, %s687_s15, %s687_s15, %s688_s18  }
  0x27   : > { %p514_p11 = scmp.ge.s32.totalorder %s684_s11, 1  ;;  %p121_p13 = scmp.lt.s32.totalorder %s684_s11, 3 }
  0x29   : > { %p122_p3 = pnand %p514_p11, %p121_p13 }
  0x2a   : > { %s127_s19 = sand.u32 (!%p122_p3), 1, %s668_s7  }
  0x2b   : > { %125 = sbr.rel (%p122_p3) target bundleno = 112 (0x70), region = 24  ;;  %s128_s21 = scalar_lea.sflag (!%p122_p3), [#allocation3], %s127_s19 }
  0x2c   : > { %s544_s20 = smul.u32 (!%p122_p3), 192, %s127_s19 }
  0x2e   : > { %s791_s22 = scalar_lea.vmem (!%p122_p3), [#allocation2], %s544_s20 }
  0x32   : > { %659 = dma.done.wait (%p739_p7), %s128_s21, 3072  }
  0x33   : > { %661 = vsyncadd (%p739_p7), %s128_s21, 4294964224  ;;  %v165_v0 = vld [vmem:[%s791_s22] sm:$0xff]  ;;  %v166_v6 = vld [vmem:[%s791_s22 + $0x8] sm:$0xff]  ;;  %p156_p7 = scmp.lt.s32.totalorder %s676_s9, 1  ;;  %vm389_vm0 = vcmask 523264  }
  0x34   : > { %v173_v1 = vld [vmem:[%s791_s22 + $0x40] sm:$0xff]  ;;  %v189_v3 = vmul.f32 255.0, %v165_v0  ;;  %v174_v7 = vld [vmem:[%s791_s22 + $0x48] sm:$0xff]  ;;  %v190_v9 = vmul.f32 255.0, %v166_v6  ;;  %v167_v12 = vld [vmem:[%s791_s22 + $0x10] sm:$0xff] }
  0x35   : > { %v181_v2 = vld [vmem:[%s791_s22 + $0x80] sm:$0xff]  ;;  %v197_v4 = vmul.f32 255.0, %v173_v1  ;;  %v182_v8 = vld [vmem:[%s791_s22 + $0x88] sm:$0xff]  ;;  %v198_v10 = vmul.f32 255.0, %v174_v7  ;;  %v175_v13 = vld [vmem:[%s791_s22 + $0x50] sm:$0xff]  ;;  %v191_v18 = vmul.f32 255.0, %v167_v12 }
  0x36   : > { %v205_v5 = vmul.f32 255.0, %v181_v2  ;;  %v206_v11 = vmul.f32 255.0, %v182_v8  ;;  %v183_v14 = vld [vmem:[%s791_s22 + $0x90] sm:$0xff]  ;;  %v213_v15 = vfloor.f32 %v189_v3  ;;  %v214_v19 = vfloor.f32 %v190_v9  ;;  %s944_s9 = smov (!%p156_p7, %s676_s9), 1  ;;  %v168_v39 = vld [vmem:[%s791_s22 + $0x18] sm:$0xff]  ;;  %v169_v56 = vld [vmem:[%s791_s22 + $0x20] sm:$0xff] }
  0x37   : > { %v221_v16 = vfloor.f32 %v197_v4  ;;  %v222_v20 = vfloor.f32 %v198_v10  ;;  %v199_v22 = vmul.f32 255.0, %v175_v13  ;;  %v207_v26 = vmul.f32 255.0, %v183_v14  ;;  %v176_v40 = vld [vmem:[%s791_s22 + $0x58] sm:$0xff]  ;;  %s545_s16 = smul.u32 192, %s944_s9  ;;  %v177_v1 = vld [vmem:[%s791_s22 + $0x60] sm:$0xff] }
  0x38   : > { %v229_v17 = vfloor.f32 %v205_v5  ;;  %v230_v21 = vfloor.f32 %v206_v11  ;;  %v237_v23 = vmax.f32 %v213_v15, 0.0  ;;  %v238_v27 = vmax.f32 %v214_v19, 0.0  ;;  %v184_v41 = vld [vmem:[%s791_s22 + $0x98] sm:$0xff]  ;;  %v185_v9 = vld [vmem:[%s791_s22 + $0xa0] sm:$0xff] }
  0x39   : > { %v245_v24 = vmax.f32 %v221_v16, 0.0  ;;  %v246_v28 = vmax.f32 %v222_v20, 0.0  ;;  %v215_v30 = vfloor.f32 %v191_v18  ;;  %v223_v34 = vfloor.f32 %v199_v22  ;;  %s829_s24 = scalar_lea.vmem %s933_s1, %s545_s16  ;;  %v170_v22 = vld [vmem:[%s791_s22 + $0x28] sm:$0xff] }
  0x3a   : > { %v253_v25 = vmax.f32 %v229_v17, 0.0  ;;  %v254_v29 = vmax.f32 %v230_v21, 0.0  ;;  %v261_v31 = vmin.f32 %v237_v23, 255.0  ;;  %v262_v35 = vmin.f32 %v238_v27, 255.0 }
  0x3b   : > { %v269_v32 = vmin.f32 %v245_v24, 255.0  ;;  %v270_v36 = vmin.f32 %v246_v28, 255.0  ;;  %v231_v38 = vfloor.f32 %v207_v26  ;;  %v239_v49 = vmax.f32 %v215_v30, 0.0  ;;  %v178_v30 = vld [vmem:[%s791_s22 + $0x68] sm:$0xff] }
  0x3c   : > { %v277_v33 = vmin.f32 %v253_v25, 255.0  ;;  %v278_v37 = vmin.f32 %v254_v29, 255.0  ;;  %v285_v42 = vmul.f32 0.299, %v261_v31  ;;  %v286_v45 = vmul.f32 0.299, %v262_v35 }
  0x3d   : > { %v293_v43 = vmul.f32 0.587, %v269_v32  ;;  %v294_v46 = vmul.f32 0.587, %v270_v36  ;;  %v247_v50 = vmax.f32 %v223_v34, 0.0  ;;  %v255_v51 = vmax.f32 %v231_v38, 0.0 }
  0x3e   : > { %v309_v44 = vmul.f32 0.114, %v277_v33  ;;  %v310_v47 = vmul.f32 0.114, %v278_v37  ;;  %v192_v53 = vmul.f32 255.0, %v168_v39  ;;  %v200_v54 = vmul.f32 255.0, %v176_v40 }
  0x3f   : > { %v301_v48 = vadd.f32 %v293_v43, %v285_v42  ;;  %v302_v52 = vadd.f32 %v294_v46, %v286_v45  ;;  %v208_v55 = vmul.f32 255.0, %v184_v41  ;;  %v263_v58 = vmin.f32 %v239_v49, 255.0  ;;  %v186_v31 = vld [vmem:[%s791_s22 + $0xa8] sm:$0xff] }
  0x40   : > { %v271_v59 = vmin.f32 %v247_v50, 255.0  ;;  %v279_v60 = vmin.f32 %v255_v51, 255.0  ;;  %v216_v62 = vfloor.f32 %v192_v53  ;;  %v224_v63 = vfloor.f32 %v200_v54  ;;  %v179_v53 = vld [vmem:[%s791_s22 + $0x70] sm:$0xff] }
  0x41   : > { %v317_v57 = vadd.f32 %v309_v44, %v301_v48  ;;  %v318_v61 = vadd.f32 %v310_v47, %v302_v52  ;;  %v232_v0 = vfloor.f32 %v208_v55  ;;  %v287_v2 = vmul.f32 0.299, %v263_v58  ;;  %v171_v44 = vld [vmem:[%s791_s22 + $0x30] sm:$0xff] }
  0x42   : > { %v295_v3 = vmul.f32 0.587, %v271_v59  ;;  %v193_v4 = vmul.f32 255.0, %v169_v56  ;;  %v689_v5 = vmov 0.0   ;;  %v311_v7 = vmul.f32 0.114, %v279_v60 }
  0x43   : > { %vm325_vm1 = vcmp.gt.f32.partialorder %v317_v57, 127.0  ;;  %vm326_vm2 = vcmp.gt.f32.partialorder %v318_v61, 127.0  ;;  %v240_v8 = vmax.f32 %v216_v62, 0.0  ;;  %v248_v13 = vmax.f32 %v224_v63, 0.0  ;;  %v187_v54 = vld [vmem:[%s791_s22 + $0xb0] sm:$0xff] }
  0x44   : > { %v819_v6 = vsel %vm325_vm1, 1.0, %v689_v5  ;;  %v824_v11 = vsel %vm326_vm2, 1.0, %v689_v5  ;;  %v303_v12 = vadd.f32 %v295_v3, %v287_v2  ;;  %v256_v15 = vmax.f32 %v232_v0, 0.0  ;;  %v172_v2 = vld [vmem:[%s791_s22 + $0x38] sm:$0xff] }
  0x45   : > { %v516_v10 = vadd.f32 -0.485, %v819_v6  ;;  %v517_v14 = vadd.f32 -0.485, %v824_v11  ;;  %v264_v16 = vmin.f32 %v240_v8, 255.0  ;;  %v201_v17 = vmul.f32 255.0, %v177_v1 }
  0x46   : > { %v319_v19 = vadd.f32 %v311_v7, %v303_v12  ;;  %v272_v20 = vmin.f32 %v248_v13, 255.0  ;;  %v209_v21 = vmul.f32 255.0, %v185_v9  ;;  %v280_v24 = vmin.f32 %v256_v15, 255.0  ;;  %v180_v9 = vld [vmem:[%s791_s22 + $0x78] sm:$0xff] }
  0x47   : > { %v349_v18 = vmul.f32 4.366812, %v516_v10  ;;  %v350_v23 = vmul.f32 4.366812, %v517_v14  ;;  %v288_v25 = vmul.f32 0.299, %v264_v16  ;;  %v217_v26 = vfloor.f32 %v193_v4 }
  0x48   : > { %vm327_vm3 = vcmp.gt.f32.partialorder %v319_v19, 127.0  ;;  %v296_v27 = vmul.f32 0.587, %v272_v20  ;;  %v225_v28 = vfloor.f32 %v201_v17  ;;  %v233_v29 = vfloor.f32 %v209_v21  ;;  %v188_v15 = vld [vmem:[%s791_s22 + $0xb8] sm:$0xff] }
  0x49   : > { %390 = vst.msk [vmem:[%s829_s24] sm:$0xff] %vm389_vm0, %v349_v18  ;;  %391 = vst.msk [vmem:[%s829_s24 + $0x8] sm:$0xff] %vm389_vm0, %v350_v23  ;;  %v840_v32 = vsel %vm327_vm3, 1.0, %v689_v5  ;;  %v312_v33 = vmul.f32 0.114, %v280_v24  ;;  %v241_v34 = vmax.f32 %v217_v26, 0.0 }
  0x4a   : > { %v194_v35 = vmul.f32 255.0, %v170_v22  ;;  %v518_v36 = vadd.f32 -0.485, %v840_v32  ;;  %v304_v37 = vadd.f32 %v296_v27, %v288_v25  ;;  %v249_v38 = vmax.f32 %v225_v28, 0.0 }
  0x4b   : > { %v257_v39 = vmax.f32 %v233_v29, 0.0  ;;  %v265_v40 = vmin.f32 %v241_v34, 255.0  ;;  %v202_v41 = vmul.f32 255.0, %v178_v30  ;;  %v210_v42 = vmul.f32 255.0, %v186_v31 }
  0x4c   : > { %v218_v43 = vfloor.f32 %v194_v35  ;;  %v351_v45 = vmul.f32 4.366812, %v518_v36  ;;  %v320_v46 = vadd.f32 %v312_v33, %v304_v37  ;;  %v273_v47 = vmin.f32 %v249_v38, 255.0 }
  0x4d   : > { %v281_v48 = vmin.f32 %v257_v39, 255.0  ;;  %v289_v49 = vmul.f32 0.299, %v265_v40  ;;  %v226_v50 = vfloor.f32 %v202_v41  ;;  %v234_v51 = vfloor.f32 %v210_v42 }
  0x4e   : > { %v242_v52 = vmax.f32 %v218_v43, 0.0  ;;  %392 = vst.msk [vmem:[%s829_s24 + $0x10] sm:$0xff] %vm389_vm0, %v351_v45  ;;  %vm328_vm4 = vcmp.gt.f32.partialorder %v320_v46, 127.0  ;;  %v297_v55 = vmul.f32 0.587, %v273_v47  ;;  %v195_v57 = vmul.f32 255.0, %v171_v44 }
  0x4f   : > { %v313_v56 = vmul.f32 0.114, %v281_v48  ;;  %v849_v58 = vsel %vm328_vm4, 1.0, %v689_v5  ;;  %v250_v59 = vmax.f32 %v226_v50, 0.0  ;;  %v258_v60 = vmax.f32 %v234_v51, 0.0 }
  0x50   : > { %v266_v61 = vmin.f32 %v242_v52, 255.0  ;;  %v519_v62 = vadd.f32 -0.485, %v849_v58  ;;  %v305_v63 = vadd.f32 %v297_v55, %v289_v49  ;;  %v203_v0 = vmul.f32 255.0, %v179_v53 }
  0x51   : > { %v211_v1 = vmul.f32 255.0, %v187_v54  ;;  %v274_v3 = vmin.f32 %v250_v59, 255.0  ;;  %v282_v4 = vmin.f32 %v258_v60, 255.0  ;;  %v219_v8 = vfloor.f32 %v195_v57 }
  0x52   : > { %v290_v7 = vmul.f32 0.299, %v266_v61  ;;  %v352_v10 = vmul.f32 4.366812, %v519_v62  ;;  %v321_v12 = vadd.f32 %v313_v56, %v305_v63  ;;  %v227_v13 = vfloor.f32 %v203_v0 }
  0x53   : > { %v235_v14 = vfloor.f32 %v211_v1  ;;  %v298_v16 = vmul.f32 0.587, %v274_v3  ;;  %v314_v17 = vmul.f32 0.114, %v282_v4  ;;  %v243_v18 = vmax.f32 %v219_v8, 0.0 }
  0x54   : > { %v196_v19 = vmul.f32 255.0, %v172_v2  ;;  %393 = vst.msk [vmem:[%s829_s24 + $0x18] sm:$0xff] %vm389_vm0, %v352_v10  ;;  %vm329_vm5 = vcmp.gt.f32.partialorder %v321_v12, 127.0  ;;  %v251_v20 = vmax.f32 %v227_v13, 0.0  ;;  %v204_v22 = vmul.f32 255.0, %v180_v9 }
  0x55   : > { %v259_v21 = vmax.f32 %v235_v14, 0.0  ;;  %v858_v23 = vsel %vm329_vm5, 1.0, %v689_v5  ;;  %v306_v24 = vadd.f32 %v298_v16, %v290_v7  ;;  %v267_v25 = vmin.f32 %v243_v18, 255.0 }
  0x56   : > { %v212_v26 = vmul.f32 255.0, %v188_v15  ;;  %v520_v27 = vadd.f32 -0.485, %v858_v23  ;;  %v275_v28 = vmin.f32 %v251_v20, 255.0  ;;  %v220_v30 = vfloor.f32 %v196_v19 }
  0x57   : > { %v283_v29 = vmin.f32 %v259_v21, 255.0  ;;  %v322_v31 = vadd.f32 %v314_v17, %v306_v24  ;;  %v291_v33 = vmul.f32 0.299, %v267_v25  ;;  %v228_v34 = vfloor.f32 %v204_v22 }
  0x58   : > { %v236_v35 = vfloor.f32 %v212_v26  ;;  %v353_v36 = vmul.f32 4.366812, %v520_v27  ;;  %v299_v37 = vmul.f32 0.587, %v275_v28  ;;  %v244_v39 = vmax.f32 %v220_v30, 0.0 }
  0x59   : > { %v315_v38 = vmul.f32 0.114, %v283_v29  ;;  %vm330_vm6 = vcmp.gt.f32.partialorder %v322_v31, 127.0  ;;  %v252_v40 = vmax.f32 %v228_v34, 0.0  ;;  %v524_v44 = vadd.f32 -0.456, %v819_v6 }
  0x5a   : > { %v260_v41 = vmax.f32 %v236_v35, 0.0  ;;  %394 = vst.msk [vmem:[%s829_s24 + $0x20] sm:$0xff] %vm389_vm0, %v353_v36  ;;  %v338_v42 = vsel %vm330_vm6, 1.0, %v689_v5  ;;  %v307_v43 = vadd.f32 %v299_v37, %v291_v33  ;;  %v525_v45 = vadd.f32 -0.456, %v824_v11 }
  0x5b   : > { %v521_v46 = vadd.f32 -0.485, %v338_v42  ;;  %v268_v47 = vmin.f32 %v244_v39, 255.0  ;;  %v276_v48 = vmin.f32 %v252_v40, 255.0  ;;  %v365_v51 = vmul.f32 4.464286, %v524_v44 }
  0x5c   : > { %v284_v49 = vmin.f32 %v260_v41, 255.0  ;;  %v323_v50 = vadd.f32 %v315_v38, %v307_v43  ;;  %v366_v52 = vmul.f32 4.464286, %v525_v45  ;;  %v526_v53 = vadd.f32 -0.456, %v840_v32 }
  0x5d   : > { %v354_v54 = vmul.f32 4.366812, %v521_v46  ;;  %v292_v55 = vmul.f32 0.299, %v268_v47  ;;  %v300_v56 = vmul.f32 0.587, %v276_v48 }
  0x5e   : > { %vm331_vm7 = vcmp.gt.f32.partialorder %v323_v50, 127.0  ;;  %v316_v57 = vmul.f32 0.114, %v284_v49  ;;  %398 = vst.msk [vmem:[%s829_s24 + $0x40] sm:$0xff] %vm389_vm0, %v365_v51  ;;  %399 = vst.msk [vmem:[%s829_s24 + $0x48] sm:$0xff] %vm389_vm0, %v366_v52 }
  0x5f   : > { %v367_v59 = vmul.f32 4.464286, %v526_v53  ;;  %395 = vst.msk [vmem:[%s829_s24 + $0x28] sm:$0xff] %vm389_vm0, %v354_v54  ;;  %v339_v60 = vsel %vm331_vm7, 1.0, %v689_v5  ;;  %v308_v61 = vadd.f32 %v300_v56, %v292_v55  ;;  %v527_v62 = vadd.f32 -0.456, %v849_v58 }
  0x60   : > { %v528_v63 = vadd.f32 -0.456, %v858_v23  ;;  %v522_v0 = vadd.f32 -0.485, %v339_v60  ;;  %v529_v1 = vadd.f32 -0.456, %v338_v42 }
  0x61   : > { %400 = vst.msk [vmem:[%s829_s24 + $0x50] sm:$0xff] %vm389_vm0, %v367_v59  ;;  %v530_v2 = vadd.f32 -0.456, %v339_v60  ;;  %v324_v3 = vadd.f32 %v316_v57, %v308_v61  ;;  %v368_v4 = vmul.f32 4.464286, %v527_v62 }
  0x62   : > { %v369_v7 = vmul.f32 4.464286, %v528_v63  ;;  %v532_v8 = vadd.f32 -0.406, %v819_v6  ;;  %v355_v9 = vmul.f32 4.366812, %v522_v0 }
  0x63   : > { %v370_v10 = vmul.f32 4.464286, %v529_v1  ;;  %v371_v12 = vmul.f32 4.464286, %v530_v2  ;;  %vm332_vm8 = vcmp.gt.f32.partialorder %v324_v3, 127.0  ;;  %401 = vst.msk [vmem:[%s829_s24 + $0x58] sm:$0xff] %vm389_vm0, %v368_v4 }
  0x64   : > { %402 = vst.msk [vmem:[%s829_s24 + $0x60] sm:$0xff] %vm389_vm0, %v369_v7  ;;  %v381_v13 = vmul.f32 4.4444447, %v532_v8  ;;  %v533_v14 = vadd.f32 -0.406, %v824_v11  ;;  %396 = vst.msk [vmem:[%s829_s24 + $0x30] sm:$0xff] %vm389_vm0, %v355_v9 }
  0x65   : > { %v340_v15 = vsel %vm332_vm8, 1.0, %v689_v5  ;;  %403 = vst.msk [vmem:[%s829_s24 + $0x68] sm:$0xff] %vm389_vm0, %v370_v10  ;;  %404 = vst.msk [vmem:[%s829_s24 + $0x70] sm:$0xff] %vm389_vm0, %v371_v12  ;;  %v534_v6 = vadd.f32 -0.406, %v840_v32 }
  0x66   : > { %v535_v16 = vadd.f32 -0.406, %v849_v58  ;;  %v523_v17 = vadd.f32 -0.485, %v340_v15  ;;  %v531_v18 = vadd.f32 -0.456, %v340_v15 }
  0x67   : > { %406 = vst.msk [vmem:[%s829_s24 + $0x80] sm:$0xff] %vm389_vm0, %v381_v13  ;;  %v382_v11 = vmul.f32 4.4444447, %v533_v14  ;;  %v383_v19 = vmul.f32 4.4444447, %v534_v6 }
  0x68   : > { %v384_v5 = vmul.f32 4.4444447, %v535_v16  ;;  %v536_v20 = vadd.f32 -0.406, %v858_v23  ;;  %v356_v21 = vmul.f32 4.366812, %v523_v17 }
  0x69   : > { %v372_v22 = vmul.f32 4.464286, %v531_v18  ;;  %407 = vst.msk [vmem:[%s829_s24 + $0x88] sm:$0xff] %vm389_vm0, %v382_v11  ;;  %v537_v32 = vadd.f32 -0.406, %v338_v42  ;;  %408 = vst.msk [vmem:[%s829_s24 + $0x90] sm:$0xff] %vm389_vm0, %v383_v19 }
  0x6a   : > { %409 = vst.msk [vmem:[%s829_s24 + $0x98] sm:$0xff] %vm389_vm0, %v384_v5  ;;  %v385_v58 = vmul.f32 4.4444447, %v536_v20  ;;  %v538_v24 = vadd.f32 -0.406, %v339_v60  ;;  %397 = vst.msk [vmem:[%s829_s24 + $0x38] sm:$0xff] %vm389_vm0, %v356_v21 }
  0x6b   : > { %v539_v25 = vadd.f32 -0.406, %v340_v15  ;;  %405 = vst.msk [vmem:[%s829_s24 + $0x78] sm:$0xff] %vm389_vm0, %v372_v22  ;;  %v386_v23 = vmul.f32 4.4444447, %v537_v32 }
  0x6c   : > { %410 = vst.msk [vmem:[%s829_s24 + $0xa0] sm:$0xff] %vm389_vm0, %v385_v58  ;;  %v387_v26 = vmul.f32 4.4444447, %v538_v24 }
  0x6d   : > { %v388_v27 = vmul.f32 4.4444447, %v539_v25  ;;  %411 = vst.msk [vmem:[%s829_s24 + $0xa8] sm:$0xff] %vm389_vm0, %v386_v23 }
  0x6e   : > { %412 = vst.msk [vmem:[%s829_s24 + $0xb0] sm:$0xff] %vm389_vm0, %v387_v26 }
  0x6f   : > { %413 = vst.msk [vmem:[%s829_s24 + $0xb8] sm:$0xff] %vm389_vm0, %v388_v27 }
  0x70 PF: > { %s14_s11 = sadd.s32 1, %s684_s11   ;;  %s936_s6 = smov %s668_s7 }
  0x71   : > { %p11_p9 = scmp.ge.s32.totalorder %s14_s11, 4   ;;  %s937_s7 = smov %s672_s8 }
  0x72   : > { %s938_s8 = smov %s745_s17  ;;  %s939_s9 = smov %s680_s10 }
  0x73   : > { %s940_s10 = smov %s942_s13  ;;  %13 = sbr.rel (!%p11_p9) target bundleno = 4 (0x4), region = 64 }
  0x7a   :  { %444 = vsyncpa [#allocation3], 1 }
  0x7b   :  { %446 = vsyncpa [#allocation3 + $0x1], 1 }

// kernel: segmented_faster_rcnn_forward.9
= control target key start
LH: loop header
LB: loop body
LE: loop exit
PB: predicated region body
PF: predicated region fallthrough
CT: control target
= control target key end

     0   :  { %s1246_s12 = smov 0   ;;  %s1474_s0 = inlined_call_operand.vmem [shape: bf16[2048,32], index: 0, kind: input, shape index: {}]   ;;  %s1475_s1 = inlined_call_operand.vmem [shape: bf16[32,128], index: 1, kind: input, shape index: {}]   ;;  %s1476_s2 = inlined_call_operand.vmem [shape: f32[1,128], index: 2, kind: input, shape index: {}]   ;;  %s1477_s3 = inlined_call_operand.vmem [shape: f32[2048,128], index: 3, kind: output, shape index: {}]  }
   0x1 LB: > { %s992_s13 = sadd.s32 4294967295, %s1224_s12   ;;  %p996_p0 = scmp.ge.s32.totalorder %s1224_s12, 1  ;;  %s1224_s12 = sphi %s1246_s12, %s13_s12  }
   0x2   : > { %p138_p1 = scmp.lt.s32.totalorder %s1224_s12, 5 }
   0x4   : > { %p139_p2 = pnand %p996_p0, %p138_p1 }
   0x5   : > { %v1184_v0 = vld [vmem:[%s1475_s1] sm:$0xff] (!%p139_p2)   ;;  %s997_s16 = sshll.u32 (!%p139_p2), %s992_s13, 6  ;;  %v1185_v1 = vld [vmem:[%s1475_s1 + $0x8] sm:$0xff] (!%p139_p2)   ;;  %vm422_vm0 = vcmask (!%p139_p2), 261120  }
   0x6   : > { %142 = sbr.rel (%p139_p2) target bundleno = 295 (0x127), region = 32  ;;  %p163_p3 = scmp.lt.s32.totalorder (!%p139_p2), %s997_s16, 255  ;;  %1104 = vmatprep.subr.bf16.mxu0 (!%p139_p2), %v1184_v0  ;;  %1172 = vmatprep.subr.bf16.mxu1 (!%p139_p2), %v1184_v0  ;;  %v1335_v34 = vld [vmem:[%s1476_s2] ss:$0 sm:$0xff] (!%p139_p2) }
   0x7   : > { %1105 = vmatpush3.bf16.msra.mxu0 (!%p139_p2), %v1184_v0  ;;  %1174 = vmatpush3.bf16.msra.mxu1 (!%p139_p2), %v1184_v0 }
   0x8   : > { %1106 = vmatprep.subr.bf16.mxu0 (!%p139_p2), %v1185_v1  ;;  %1173 = vmatprep.subr.bf16.mxu1 (!%p139_p2), %v1185_v1 }
   0xb   : > { %1107 = vmatpush3.bf16.msra.mxu0 (!%p139_p2), %v1185_v1  ;;  %1175 = vmatpush3.bf16.msra.mxu1 (!%p139_p2), %v1185_v1 }
   0xd   : > { %s1479_s16 = smov (!%p163_p3, %s997_s16), 255 }
   0xe   : > { %s998_s19 = sshll.u32 %s1479_s16, 2  ;;  %s1000_s25 = sshll.u32 %s1479_s16, 3 }
   0xf   : > { %s1266_s22 = scalar_lea.vmem %s1474_s0, %s998_s19  ;;  %s1342_s28 = scalar_lea.vmem %s1477_s3, %s1000_s25 }
  0x10   : > { %v1186_v2 = vld [vmem:[%s1266_s22] sm:$0xff]   ;;  %v1188_v4 = vld [vmem:[%s1266_s22 + $0x8] sm:$0xff]   ;;  %v1190_v6 = vld [vmem:[%s1266_s22 + $0x10] sm:$0xff]  }
  0x11   : > { %v1187_v3 = vld [vmem:[%s1266_s22 + $0x80] sm:$0xff]   ;;  %1108 = vmatprep.mubr.msk.bf16.mxu0 %vm422_vm0, %v1186_v2  ;;  %v1189_v5 = vld [vmem:[%s1266_s22 + $0x88] sm:$0xff]   ;;  %v1191_v7 = vld [vmem:[%s1266_s22 + $0x90] sm:$0xff]  }
  0x12   : > { %1140 = vmatprep.mubr.msk.bf16.mxu1 %vm422_vm0, %v1187_v3  ;;  %1109 = vmatmul.mubr.msk.bf16.vlgmr.msra.gmra.mrb[0].mxu0 %vm422_vm0, %v1188_v4  ;;  %v1192_v8 = vld [vmem:[%s1266_s22 + $0x18] sm:$0xff]   ;;  %v1194_v10 = vld [vmem:[%s1266_s22 + $0x20] sm:$0xff]   ;;  %v1196_v12 = vld [vmem:[%s1266_s22 + $0x28] sm:$0xff]  }
  0x13   : > { %1141 = vmatmul.mubr.msk.bf16.vlgmr.msra.gmra.mrb[0].mxu1 %vm422_vm0, %v1189_v5  ;;  %1112 = vmatprep.mubr.msk.bf16.mxu0 %vm422_vm0, %v1190_v6  ;;  %v1193_v9 = vld [vmem:[%s1266_s22 + $0x98] sm:$0xff]   ;;  %v1195_v11 = vld [vmem:[%s1266_s22 + $0xa0] sm:$0xff]   ;;  %v1197_v13 = vld [vmem:[%s1266_s22 + $0xa8] sm:$0xff]  }
  0x14   : > { %1144 = vmatprep.mubr.msk.bf16.mxu1 %vm422_vm0, %v1191_v7  ;;  %v1198_v14 = vld [vmem:[%s1266_s22 + $0x30] sm:$0xff]   ;;  %v1200_v16 = vld [vmem:[%s1266_s22 + $0x38] sm:$0xff]   ;;  %v1202_v18 = vld [vmem:[%s1266_s22 + $0x40] sm:$0xff]  }
  0x15   : > { %v1199_v15 = vld [vmem:[%s1266_s22 + $0xb0] sm:$0xff]   ;;  %v1201_v17 = vld [vmem:[%s1266_s22 + $0xb8] sm:$0xff]   ;;  %v1203_v19 = vld [vmem:[%s1266_s22 + $0xc0] sm:$0xff]  }
  0x16   : > { %v1204_v20 = vld [vmem:[%s1266_s22 + $0x48] sm:$0xff]   ;;  %v1206_v22 = vld [vmem:[%s1266_s22 + $0x50] sm:$0xff]   ;;  %v1208_v24 = vld [vmem:[%s1266_s22 + $0x58] sm:$0xff]  }
  0x17   : > { %v1205_v21 = vld [vmem:[%s1266_s22 + $0xc8] sm:$0xff]   ;;  %v1207_v23 = vld [vmem:[%s1266_s22 + $0xd0] sm:$0xff]   ;;  %v1209_v25 = vld [vmem:[%s1266_s22 + $0xd8] sm:$0xff]  }
  0x18   : > { %v1210_v26 = vld [vmem:[%s1266_s22 + $0x60] sm:$0xff]   ;;  %v1212_v28 = vld [vmem:[%s1266_s22 + $0x68] sm:$0xff]   ;;  %v1214_v30 = vld [vmem:[%s1266_s22 + $0x70] sm:$0xff]  }
  0x19   : > { %v1211_v27 = vld [vmem:[%s1266_s22 + $0xe0] sm:$0xff]   ;;  %v1213_v29 = vld [vmem:[%s1266_s22 + $0xe8] sm:$0xff]   ;;  %v1215_v31 = vld [vmem:[%s1266_s22 + $0xf0] sm:$0xff]  }
  0x1a   : > { %1113 = vmatmul.mubr.msk.bf16.gmra.mrb[4].mxu0 %vm422_vm0, %v1192_v8  ;;  %v1216_v32 = vld [vmem:[%s1266_s22 + $0x78] sm:$0xff]  }
  0x1b   : > { %1145 = vmatmul.mubr.msk.bf16.gmra.mrb[4].mxu1 %vm422_vm0, %v1193_v9  ;;  %1116 = vmatprep.mubr.msk.bf16.mxu0 %vm422_vm0, %v1194_v10  ;;  %v1217_v33 = vld [vmem:[%s1266_s22 + $0xf8] sm:$0xff]  }
  0x1c   : > { %1148 = vmatprep.mubr.msk.bf16.mxu1 %vm422_vm0, %v1195_v11 }
  0x22   : > { %1117 = vmatmul.mubr.msk.bf16.gmra.mrb[8].mxu0 %vm422_vm0, %v1196_v12 }
  0x23   : > { %1149 = vmatmul.mubr.msk.bf16.gmra.mrb[8].mxu1 %vm422_vm0, %v1197_v13  ;;  %1120 = vmatprep.mubr.msk.bf16.mxu0 %vm422_vm0, %v1198_v14 }
  0x24   : > { %1152 = vmatprep.mubr.msk.bf16.mxu1 %vm422_vm0, %v1199_v15 }
  0x2a   : > { %1121 = vmatmul.mubr.msk.bf16.gmra.mrb[12].mxu0 %vm422_vm0, %v1200_v16 }
  0x2b   : > { %1153 = vmatmul.mubr.msk.bf16.gmra.mrb[12].mxu1 %vm422_vm0, %v1201_v17  ;;  %1124 = vmatprep.mubr.msk.bf16.mxu0 %vm422_vm0, %v1202_v18 }
  0x2c   : > { %1156 = vmatprep.mubr.msk.bf16.mxu1 %vm422_vm0, %v1203_v19 }
  0x32   : > { %1125 = vmatmul.mubr.msk.bf16.gmra.mrb[16].mxu0 %vm422_vm0, %v1204_v20 }
  0x33   : > { %1157 = vmatmul.mubr.msk.bf16.gmra.mrb[16].mxu1 %vm422_vm0, %v1205_v21  ;;  %1128 = vmatprep.mubr.msk.bf16.mxu0 %vm422_vm0, %v1206_v22 }
  0x34   : > { %1160 = vmatprep.mubr.msk.bf16.mxu1 %vm422_vm0, %v1207_v23 }
  0x3a   : > { %1129 = vmatmul.mubr.msk.bf16.gmra.mrb[20].mxu0 %vm422_vm0, %v1208_v24 }
  0x3b   : > { %1161 = vmatmul.mubr.msk.bf16.gmra.mrb[20].mxu1 %vm422_vm0, %v1209_v25  ;;  %1132 = vmatprep.mubr.msk.bf16.mxu0 %vm422_vm0, %v1210_v26 }
  0x3c   : > { %1164 = vmatprep.mubr.msk.bf16.mxu1 %vm422_vm0, %v1211_v27 }
  0x42   : > { %1133 = vmatmul.mubr.msk.bf16.gmra.mrb[24].mxu0 %vm422_vm0, %v1212_v28 }
  0x43   : > { %1165 = vmatmul.mubr.msk.bf16.gmra.mrb[24].mxu1 %vm422_vm0, %v1213_v29  ;;  %1136 = vmatprep.mubr.msk.bf16.mxu0 %vm422_vm0, %v1214_v30 }
  0x44   : > { %1168 = vmatprep.mubr.msk.bf16.mxu1 %vm422_vm0, %v1215_v31 }
  0x4a   : > { %1137 = vmatmul.mubr.msk.bf16.gmra.mrb[28].mxu0 %vm422_vm0, %v1216_v32 }
  0x4b   : > { %1169 = vmatmul.mubr.msk.bf16.gmra.mrb[28].mxu1 %vm422_vm0, %v1217_v33 }
  0xe5   : > { %v1110_v35 = vpop.f32.mrb[0].mxu0 }
  0xe6   : > { %v562_v36 = vadd.f32 %v1110_v35, %v1335_v34  ;;  %v1142_v37 = vpop.f32.mrb[0].mxu1  ;;  %v553_v38 = vpop.f32.mrb[1].mxu0 }
  0xe7   : > { %v690_v39 = vadd.f32 %v1142_v37, %v1335_v34  ;;  %v554_v40 = vadd.f32 %v1335_v34, %v553_v38  ;;  %v681_v41 = vpop.f32.mrb[1].mxu1  ;;  %v1111_v42 = vpop.f32.mrb[2].mxu0 }
  0xe8   : > { %v810_v43 = vmax.f32 %v562_v36, 0.0  ;;  %v682_v44 = vadd.f32 %v1335_v34, %v681_v41  ;;  %v565_v45 = vadd.f32 %v1111_v42, %v1335_v34  ;;  %v1143_v46 = vpop.f32.mrb[2].mxu1  ;;  %v556_v47 = vpop.f32.mrb[3].mxu0 }
  0xe9   : > { %v842_v48 = vmax.f32 %v690_v39, 0.0  ;;  %v808_v49 = vmax.f32 %v554_v40, 0.0  ;;  %v693_v50 = vadd.f32 %v1143_v46, %v1335_v34  ;;  %v557_v51 = vadd.f32 %v1335_v34, %v556_v47  ;;  %v684_v52 = vpop.f32.mrb[3].mxu1 }
  0xea   : > { %874 = vst [vmem:[%s1342_s28 + $0x10] sm:$0xff] %v810_v43  ;;  %v840_v53 = vmax.f32 %v682_v44, 0.0  ;;  %v811_v54 = vmax.f32 %v565_v45, 0.0  ;;  %v685_v55 = vadd.f32 %v1335_v34, %v684_v52 }
  0xeb   : > { %906 = vst [vmem:[%s1342_s28 + $0x110] sm:$0xff] %v842_v48  ;;  %872 = vst [vmem:[%s1342_s28] sm:$0xff] %v808_v49  ;;  %v843_v56 = vmax.f32 %v693_v50, 0.0  ;;  %v809_v57 = vmax.f32 %v557_v51, 0.0 }
  0xec   : > { %904 = vst [vmem:[%s1342_s28 + $0x100] sm:$0xff] %v840_v53  ;;  %875 = vst [vmem:[%s1342_s28 + $0x18] sm:$0xff] %v811_v54  ;;  %v841_v58 = vmax.f32 %v685_v55, 0.0 }
  0xed   : > { %907 = vst [vmem:[%s1342_s28 + $0x118] sm:$0xff] %v843_v56  ;;  %873 = vst [vmem:[%s1342_s28 + $0x8] sm:$0xff] %v809_v57  ;;  %v1114_v59 = vpop.f32.mrb[4].mxu0 }
  0xee   : > { %905 = vst [vmem:[%s1342_s28 + $0x108] sm:$0xff] %v841_v58  ;;  %v578_v60 = vadd.f32 %v1114_v59, %v1335_v34  ;;  %v1146_v61 = vpop.f32.mrb[4].mxu1  ;;  %v569_v62 = vpop.f32.mrb[5].mxu0 }
  0xef   : > { %v706_v63 = vadd.f32 %v1146_v61, %v1335_v34  ;;  %v570_v0 = vadd.f32 %v1335_v34, %v569_v62  ;;  %v697_v1 = vpop.f32.mrb[5].mxu1  ;;  %v1115_v2 = vpop.f32.mrb[6].mxu0 }
  0xf0   : > { %v814_v3 = vmax.f32 %v578_v60, 0.0  ;;  %v698_v4 = vadd.f32 %v1335_v34, %v697_v1  ;;  %v581_v5 = vadd.f32 %v1115_v2, %v1335_v34  ;;  %v1147_v6 = vpop.f32.mrb[6].mxu1  ;;  %v572_v7 = vpop.f32.mrb[7].mxu0 }
  0xf1   : > { %v846_v8 = vmax.f32 %v706_v63, 0.0  ;;  %v812_v9 = vmax.f32 %v570_v0, 0.0  ;;  %v709_v10 = vadd.f32 %v1147_v6, %v1335_v34  ;;  %v573_v11 = vadd.f32 %v1335_v34, %v572_v7  ;;  %v700_v12 = vpop.f32.mrb[7].mxu1 }
  0xf2   : > { %878 = vst [vmem:[%s1342_s28 + $0x30] sm:$0xff] %v814_v3  ;;  %v844_v13 = vmax.f32 %v698_v4, 0.0  ;;  %v815_v14 = vmax.f32 %v581_v5, 0.0  ;;  %v701_v15 = vadd.f32 %v1335_v34, %v700_v12 }
  0xf3   : > { %910 = vst [vmem:[%s1342_s28 + $0x130] sm:$0xff] %v846_v8  ;;  %876 = vst [vmem:[%s1342_s28 + $0x20] sm:$0xff] %v812_v9  ;;  %v847_v16 = vmax.f32 %v709_v10, 0.0  ;;  %v813_v17 = vmax.f32 %v573_v11, 0.0 }
  0xf4   : > { %908 = vst [vmem:[%s1342_s28 + $0x120] sm:$0xff] %v844_v13  ;;  %879 = vst [vmem:[%s1342_s28 + $0x38] sm:$0xff] %v815_v14  ;;  %v845_v18 = vmax.f32 %v701_v15, 0.0 }
  0xf5   : > { %911 = vst [vmem:[%s1342_s28 + $0x138] sm:$0xff] %v847_v16  ;;  %877 = vst [vmem:[%s1342_s28 + $0x28] sm:$0xff] %v813_v17  ;;  %v1118_v19 = vpop.f32.mrb[8].mxu0 }
  0xf6   : > { %909 = vst [vmem:[%s1342_s28 + $0x128] sm:$0xff] %v845_v18  ;;  %v594_v20 = vadd.f32 %v1118_v19, %v1335_v34  ;;  %v1150_v21 = vpop.f32.mrb[8].mxu1  ;;  %v585_v22 = vpop.f32.mrb[9].mxu0 }
  0xf7   : > { %v722_v23 = vadd.f32 %v1150_v21, %v1335_v34  ;;  %v586_v24 = vadd.f32 %v1335_v34, %v585_v22  ;;  %v713_v25 = vpop.f32.mrb[9].mxu1  ;;  %v1119_v26 = vpop.f32.mrb[10].mxu0 }
  0xf8   : > { %v818_v27 = vmax.f32 %v594_v20, 0.0  ;;  %v714_v28 = vadd.f32 %v1335_v34, %v713_v25  ;;  %v597_v29 = vadd.f32 %v1119_v26, %v1335_v34  ;;  %v1151_v30 = vpop.f32.mrb[10].mxu1  ;;  %v588_v31 = vpop.f32.mrb[11].mxu0 }
  0xf9   : > { %v850_v32 = vmax.f32 %v722_v23, 0.0  ;;  %v816_v33 = vmax.f32 %v586_v24, 0.0  ;;  %v725_v35 = vadd.f32 %v1151_v30, %v1335_v34  ;;  %v589_v36 = vadd.f32 %v1335_v34, %v588_v31  ;;  %v716_v37 = vpop.f32.mrb[11].mxu1 }
  0xfa   : > { %882 = vst [vmem:[%s1342_s28 + $0x50] sm:$0xff] %v818_v27  ;;  %v848_v38 = vmax.f32 %v714_v28, 0.0  ;;  %v819_v39 = vmax.f32 %v597_v29, 0.0  ;;  %v717_v40 = vadd.f32 %v1335_v34, %v716_v37 }
  0xfb   : > { %914 = vst [vmem:[%s1342_s28 + $0x150] sm:$0xff] %v850_v32  ;;  %880 = vst [vmem:[%s1342_s28 + $0x40] sm:$0xff] %v816_v33  ;;  %v851_v41 = vmax.f32 %v725_v35, 0.0  ;;  %v817_v42 = vmax.f32 %v589_v36, 0.0 }
  0xfc   : > { %912 = vst [vmem:[%s1342_s28 + $0x140] sm:$0xff] %v848_v38  ;;  %883 = vst [vmem:[%s1342_s28 + $0x58] sm:$0xff] %v819_v39  ;;  %v849_v43 = vmax.f32 %v717_v40, 0.0 }
  0xfd   : > { %915 = vst [vmem:[%s1342_s28 + $0x158] sm:$0xff] %v851_v41  ;;  %881 = vst [vmem:[%s1342_s28 + $0x48] sm:$0xff] %v817_v42  ;;  %v1122_v44 = vpop.f32.mrb[12].mxu0 }
  0xfe   : > { %913 = vst [vmem:[%s1342_s28 + $0x148] sm:$0xff] %v849_v43  ;;  %v610_v45 = vadd.f32 %v1122_v44, %v1335_v34  ;;  %v1154_v46 = vpop.f32.mrb[12].mxu1  ;;  %v601_v47 = vpop.f32.mrb[13].mxu0 }
  0xff   : > { %v738_v48 = vadd.f32 %v1154_v46, %v1335_v34  ;;  %v602_v49 = vadd.f32 %v1335_v34, %v601_v47  ;;  %v729_v50 = vpop.f32.mrb[13].mxu1  ;;  %v1123_v51 = vpop.f32.mrb[14].mxu0 }
 0x100   : > { %v822_v52 = vmax.f32 %v610_v45, 0.0  ;;  %v730_v53 = vadd.f32 %v1335_v34, %v729_v50  ;;  %v613_v54 = vadd.f32 %v1123_v51, %v1335_v34  ;;  %v1155_v55 = vpop.f32.mrb[14].mxu1  ;;  %v604_v56 = vpop.f32.mrb[15].mxu0 }
 0x101   : > { %v854_v57 = vmax.f32 %v738_v48, 0.0  ;;  %v820_v58 = vmax.f32 %v602_v49, 0.0  ;;  %v741_v59 = vadd.f32 %v1155_v55, %v1335_v34  ;;  %v605_v60 = vadd.f32 %v1335_v34, %v604_v56  ;;  %v732_v61 = vpop.f32.mrb[15].mxu1 }
 0x102   : > { %886 = vst [vmem:[%s1342_s28 + $0x70] sm:$0xff] %v822_v52  ;;  %v852_v62 = vmax.f32 %v730_v53, 0.0  ;;  %v823_v63 = vmax.f32 %v613_v54, 0.0  ;;  %v733_v0 = vadd.f32 %v1335_v34, %v732_v61 }
 0x103   : > { %918 = vst [vmem:[%s1342_s28 + $0x170] sm:$0xff] %v854_v57  ;;  %884 = vst [vmem:[%s1342_s28 + $0x60] sm:$0xff] %v820_v58  ;;  %v855_v1 = vmax.f32 %v741_v59, 0.0  ;;  %v821_v2 = vmax.f32 %v605_v60, 0.0 }
 0x104   : > { %916 = vst [vmem:[%s1342_s28 + $0x160] sm:$0xff] %v852_v62  ;;  %887 = vst [vmem:[%s1342_s28 + $0x78] sm:$0xff] %v823_v63  ;;  %v853_v3 = vmax.f32 %v733_v0, 0.0 }
 0x105   : > { %919 = vst [vmem:[%s1342_s28 + $0x178] sm:$0xff] %v855_v1  ;;  %885 = vst [vmem:[%s1342_s28 + $0x68] sm:$0xff] %v821_v2  ;;  %v1126_v4 = vpop.f32.mrb[16].mxu0 }
 0x106   : > { %917 = vst [vmem:[%s1342_s28 + $0x168] sm:$0xff] %v853_v3  ;;  %v626_v5 = vadd.f32 %v1126_v4, %v1335_v34  ;;  %v1158_v6 = vpop.f32.mrb[16].mxu1  ;;  %v617_v7 = vpop.f32.mrb[17].mxu0 }
 0x107   : > { %v754_v8 = vadd.f32 %v1158_v6, %v1335_v34  ;;  %v618_v9 = vadd.f32 %v1335_v34, %v617_v7  ;;  %v745_v10 = vpop.f32.mrb[17].mxu1  ;;  %v1127_v11 = vpop.f32.mrb[18].mxu0 }
 0x108   : > { %v826_v12 = vmax.f32 %v626_v5, 0.0  ;;  %v746_v13 = vadd.f32 %v1335_v34, %v745_v10  ;;  %v629_v14 = vadd.f32 %v1127_v11, %v1335_v34  ;;  %v1159_v15 = vpop.f32.mrb[18].mxu1  ;;  %v620_v16 = vpop.f32.mrb[19].mxu0 }
 0x109   : > { %v858_v17 = vmax.f32 %v754_v8, 0.0  ;;  %v824_v18 = vmax.f32 %v618_v9, 0.0  ;;  %v757_v19 = vadd.f32 %v1159_v15, %v1335_v34  ;;  %v621_v20 = vadd.f32 %v1335_v34, %v620_v16  ;;  %v748_v21 = vpop.f32.mrb[19].mxu1 }
 0x10a   : > { %890 = vst [vmem:[%s1342_s28 + $0x90] sm:$0xff] %v826_v12  ;;  %v856_v22 = vmax.f32 %v746_v13, 0.0  ;;  %v827_v23 = vmax.f32 %v629_v14, 0.0  ;;  %v749_v24 = vadd.f32 %v1335_v34, %v748_v21 }
 0x10b   : > { %922 = vst [vmem:[%s1342_s28 + $0x190] sm:$0xff] %v858_v17  ;;  %888 = vst [vmem:[%s1342_s28 + $0x80] sm:$0xff] %v824_v18  ;;  %v859_v25 = vmax.f32 %v757_v19, 0.0  ;;  %v825_v26 = vmax.f32 %v621_v20, 0.0 }
 0x10c   : > { %920 = vst [vmem:[%s1342_s28 + $0x180] sm:$0xff] %v856_v22  ;;  %891 = vst [vmem:[%s1342_s28 + $0x98] sm:$0xff] %v827_v23  ;;  %v857_v27 = vmax.f32 %v749_v24, 0.0 }
 0x10d   : > { %923 = vst [vmem:[%s1342_s28 + $0x198] sm:$0xff] %v859_v25  ;;  %889 = vst [vmem:[%s1342_s28 + $0x88] sm:$0xff] %v825_v26  ;;  %v1130_v28 = vpop.f32.mrb[20].mxu0 }
 0x10e   : > { %921 = vst [vmem:[%s1342_s28 + $0x188] sm:$0xff] %v857_v27  ;;  %v642_v29 = vadd.f32 %v1130_v28, %v1335_v34  ;;  %v1162_v30 = vpop.f32.mrb[20].mxu1  ;;  %v633_v31 = vpop.f32.mrb[21].mxu0 }
 0x10f   : > { %v770_v32 = vadd.f32 %v1162_v30, %v1335_v34  ;;  %v634_v33 = vadd.f32 %v1335_v34, %v633_v31  ;;  %v761_v35 = vpop.f32.mrb[21].mxu1  ;;  %v1131_v36 = vpop.f32.mrb[22].mxu0 }
 0x110   : > { %v830_v37 = vmax.f32 %v642_v29, 0.0  ;;  %v762_v38 = vadd.f32 %v1335_v34, %v761_v35  ;;  %v645_v39 = vadd.f32 %v1131_v36, %v1335_v34  ;;  %v1163_v40 = vpop.f32.mrb[22].mxu1  ;;  %v636_v41 = vpop.f32.mrb[23].mxu0 }
 0x111   : > { %v862_v42 = vmax.f32 %v770_v32, 0.0  ;;  %v828_v43 = vmax.f32 %v634_v33, 0.0  ;;  %v773_v44 = vadd.f32 %v1163_v40, %v1335_v34  ;;  %v637_v45 = vadd.f32 %v1335_v34, %v636_v41  ;;  %v764_v46 = vpop.f32.mrb[23].mxu1 }
 0x112   : > { %894 = vst [vmem:[%s1342_s28 + $0xb0] sm:$0xff] %v830_v37  ;;  %v860_v47 = vmax.f32 %v762_v38, 0.0  ;;  %v831_v48 = vmax.f32 %v645_v39, 0.0  ;;  %v765_v49 = vadd.f32 %v1335_v34, %v764_v46 }
 0x113   : > { %926 = vst [vmem:[%s1342_s28 + $0x1b0] sm:$0xff] %v862_v42  ;;  %892 = vst [vmem:[%s1342_s28 + $0xa0] sm:$0xff] %v828_v43  ;;  %v863_v50 = vmax.f32 %v773_v44, 0.0  ;;  %v829_v51 = vmax.f32 %v637_v45, 0.0 }
 0x114   : > { %924 = vst [vmem:[%s1342_s28 + $0x1a0] sm:$0xff] %v860_v47  ;;  %895 = vst [vmem:[%s1342_s28 + $0xb8] sm:$0xff] %v831_v48  ;;  %v861_v52 = vmax.f32 %v765_v49, 0.0 }
 0x115   : > { %927 = vst [vmem:[%s1342_s28 + $0x1b8] sm:$0xff] %v863_v50  ;;  %893 = vst [vmem:[%s1342_s28 + $0xa8] sm:$0xff] %v829_v51  ;;  %v1134_v53 = vpop.f32.mrb[24].mxu0 }
 0x116   : > { %925 = vst [vmem:[%s1342_s28 + $0x1a8] sm:$0xff] %v861_v52  ;;  %v658_v54 = vadd.f32 %v1134_v53, %v1335_v34  ;;  %v1166_v55 = vpop.f32.mrb[24].mxu1  ;;  %v649_v56 = vpop.f32.mrb[25].mxu0 }
 0x117   : > { %v786_v57 = vadd.f32 %v1166_v55, %v1335_v34  ;;  %v650_v58 = vadd.f32 %v1335_v34, %v649_v56  ;;  %v777_v59 = vpop.f32.mrb[25].mxu1  ;;  %v1135_v60 = vpop.f32.mrb[26].mxu0 }
 0x118   : > { %v834_v61 = vmax.f32 %v658_v54, 0.0  ;;  %v778_v62 = vadd.f32 %v1335_v34, %v777_v59  ;;  %v661_v63 = vadd.f32 %v1135_v60, %v1335_v34  ;;  %v1167_v0 = vpop.f32.mrb[26].mxu1  ;;  %v652_v1 = vpop.f32.mrb[27].mxu0 }
 0x119   : > { %v866_v2 = vmax.f32 %v786_v57, 0.0  ;;  %v832_v3 = vmax.f32 %v650_v58, 0.0  ;;  %v789_v4 = vadd.f32 %v1167_v0, %v1335_v34  ;;  %v653_v5 = vadd.f32 %v1335_v34, %v652_v1  ;;  %v780_v6 = vpop.f32.mrb[27].mxu1 }
 0x11a   : > { %898 = vst [vmem:[%s1342_s28 + $0xd0] sm:$0xff] %v834_v61  ;;  %v864_v7 = vmax.f32 %v778_v62, 0.0  ;;  %v835_v8 = vmax.f32 %v661_v63, 0.0  ;;  %v781_v9 = vadd.f32 %v1335_v34, %v780_v6 }
 0x11b   : > { %930 = vst [vmem:[%s1342_s28 + $0x1d0] sm:$0xff] %v866_v2  ;;  %896 = vst [vmem:[%s1342_s28 + $0xc0] sm:$0xff] %v832_v3  ;;  %v867_v10 = vmax.f32 %v789_v4, 0.0  ;;  %v833_v11 = vmax.f32 %v653_v5, 0.0 }
 0x11c   : > { %928 = vst [vmem:[%s1342_s28 + $0x1c0] sm:$0xff] %v864_v7  ;;  %899 = vst [vmem:[%s1342_s28 + $0xd8] sm:$0xff] %v835_v8  ;;  %v865_v12 = vmax.f32 %v781_v9, 0.0 }
 0x11d   : > { %931 = vst [vmem:[%s1342_s28 + $0x1d8] sm:$0xff] %v867_v10  ;;  %897 = vst [vmem:[%s1342_s28 + $0xc8] sm:$0xff] %v833_v11  ;;  %v1138_v13 = vpop.f32.mrb[28].mxu0 }
 0x11e   : > { %929 = vst [vmem:[%s1342_s28 + $0x1c8] sm:$0xff] %v865_v12  ;;  %v674_v14 = vadd.f32 %v1138_v13, %v1335_v34  ;;  %v1170_v15 = vpop.f32.mrb[28].mxu1  ;;  %v665_v16 = vpop.f32.mrb[29].mxu0 }
 0x11f   : > { %v802_v17 = vadd.f32 %v1170_v15, %v1335_v34  ;;  %v666_v18 = vadd.f32 %v1335_v34, %v665_v16  ;;  %v793_v19 = vpop.f32.mrb[29].mxu1  ;;  %v1139_v20 = vpop.f32.mrb[30].mxu0 }
 0x120   : > { %v838_v21 = vmax.f32 %v674_v14, 0.0  ;;  %v794_v22 = vadd.f32 %v1335_v34, %v793_v19  ;;  %v677_v23 = vadd.f32 %v1139_v20, %v1335_v34  ;;  %v1171_v24 = vpop.f32.mrb[30].mxu1  ;;  %v668_v25 = vpop.f32.mrb[31].mxu0 }
 0x121   : > { %v870_v26 = vmax.f32 %v802_v17, 0.0  ;;  %v836_v27 = vmax.f32 %v666_v18, 0.0  ;;  %v805_v28 = vadd.f32 %v1171_v24, %v1335_v34  ;;  %v669_v29 = vadd.f32 %v1335_v34, %v668_v25  ;;  %v796_v30 = vpop.f32.mrb[31].mxu1 }
 0x122   : > { %902 = vst [vmem:[%s1342_s28 + $0xf0] sm:$0xff] %v838_v21  ;;  %v868_v31 = vmax.f32 %v794_v22, 0.0  ;;  %v839_v32 = vmax.f32 %v677_v23, 0.0  ;;  %v797_v33 = vadd.f32 %v1335_v34, %v796_v30 }
 0x123   : > { %934 = vst [vmem:[%s1342_s28 + $0x1f0] sm:$0xff] %v870_v26  ;;  %900 = vst [vmem:[%s1342_s28 + $0xe0] sm:$0xff] %v836_v27  ;;  %v871_v35 = vmax.f32 %v805_v28, 0.0  ;;  %v837_v36 = vmax.f32 %v669_v29, 0.0 }
 0x124   : > { %932 = vst [vmem:[%s1342_s28 + $0x1e0] sm:$0xff] %v868_v31  ;;  %903 = vst [vmem:[%s1342_s28 + $0xf8] sm:$0xff] %v839_v32  ;;  %v869_v37 = vmax.f32 %v797_v33, 0.0 }
 0x125   : > { %935 = vst [vmem:[%s1342_s28 + $0x1f8] sm:$0xff] %v871_v35  ;;  %901 = vst [vmem:[%s1342_s28 + $0xe8] sm:$0xff] %v837_v36 }
 0x126   : > { %933 = vst [vmem:[%s1342_s28 + $0x1e8] sm:$0xff] %v869_v37 }
 0x127 PF: > { %s13_s12 = sadd.s32 1, %s1224_s12  }
 0x128   : > { %p10_p4 = scmp.ge.s32.totalorder %s13_s12, 6  }
 0x12a   :  { %12 = sbr.rel (!%p10_p4) target bundleno = 1 (0x1), region = 62 }

// kernel: segmented_faster_rcnn_forward.10
= control target key start
LH: loop header
LB: loop body
LE: loop exit
PB: predicated region body
PF: predicated region fallthrough
CT: control target
= control target key end

     0   :  { %s959_s12 = smov 0   ;;  %s1134_s0 = inlined_call_operand.vmem [shape: bf16[512,160], index: 0, kind: input, shape index: {}]   ;;  %s1135_s1 = inlined_call_operand.vmem [shape: bf16[160,128], index: 1, kind: input, shape index: {}]   ;;  %s1136_s2 = inlined_call_operand.vmem [shape: f32[1,128], index: 2, kind: input, shape index: {}]   ;;  %s1137_s3 = inlined_call_operand.vmem [shape: f32[512,128], index: 3, kind: output, shape index: {}]  }
   0x1 LB: > { %s771_s13 = sadd.s32 4294967295, %s936_s12   ;;  %p775_p0 = scmp.ge.s32.totalorder %s936_s12, 1  ;;  %s936_s12 = sphi %s959_s12, %s13_s12  }
   0x2   : > { %p139_p1 = scmp.lt.s32.totalorder %s936_s12, 3 }
   0x4   : > { %p140_p2 = pnand %p775_p0, %p139_p1 }
   0x5   : > { %v872_v0 = vld [vmem:[%s1135_s1] sm:$0xff] (!%p140_p2)   ;;  %v938_v1 = vmov (!%p140_p2), 0   ;;  %s776_s16 = sshll.u32 (!%p140_p2), %s771_s13, 5  ;;  %v873_v2 = vld [vmem:[%s1135_s1 + $0x8] sm:$0xff] (!%p140_p2)   ;;  %v874_v3 = vld [vmem:[%s1135_s1 + $0x10] sm:$0xff] (!%p140_p2)   ;;  %vm441_vm0 = vcmask (!%p140_p2), 261120  }
   0x6   : > { %143 = sbr.rel (%p140_p2) target bundleno = 321 (0x141), region = 32  ;;  %490 = vmatprep.subr.bf16.mxu0 (!%p140_p2), %v938_v1  ;;  %843 = vmatprep.subr.bf16.mxu1 (!%p140_p2), %v938_v1  ;;  %p165_p3 = scmp.lt.s32.totalorder (!%p140_p2), %s776_s16, 63  ;;  %v875_v4 = vld [vmem:[%s1135_s1 + $0x18] sm:$0xff] (!%p140_p2)   ;;  %v876_v7 = vld [vmem:[%s1135_s1 + $0x20] sm:$0xff] (!%p140_p2)   ;;  %v877_v8 = vld [vmem:[%s1135_s1 + $0x28] sm:$0xff] (!%p140_p2)  }
   0x7   : > { %491 = vmatpush1.bf16.msra.mxu0 (!%p140_p2), %v872_v0  ;;  %853 = vmatpush1.bf16.msra.mxu1 (!%p140_p2), %v872_v0  ;;  %v878_v9 = vld [vmem:[%s1135_s1 + $0x30] sm:$0xff] (!%p140_p2)   ;;  %v879_v10 = vld [vmem:[%s1135_s1 + $0x38] sm:$0xff] (!%p140_p2)   ;;  %v880_v11 = vld [vmem:[%s1135_s1 + $0x40] sm:$0xff] (!%p140_p2)  }
   0x8   : > { %492 = vmatprep.subr.bf16.mxu0 (!%p140_p2), %v938_v1  ;;  %844 = vmatprep.subr.bf16.mxu1 (!%p140_p2), %v938_v1  ;;  %v881_v12 = vld [vmem:[%s1135_s1 + $0x48] sm:$0xff] (!%p140_p2)   ;;  %v1058_v43 = vld [vmem:[%s1136_s2] ss:$0 sm:$0xff] (!%p140_p2) }
   0xb   : > { %493 = vmatpush1.bf16.msra.mxu0 (!%p140_p2), %v873_v2  ;;  %854 = vmatpush1.bf16.msra.mxu1 (!%p140_p2), %v873_v2 }
   0xc   : > { %494 = vmatprep.subr.bf16.mxu0 (!%p140_p2), %v938_v1  ;;  %845 = vmatprep.subr.bf16.mxu1 (!%p140_p2), %v938_v1 }
   0xd   : > { %s1139_s16 = smov (!%p165_p3, %s776_s16), 63 }
   0xe   : > { %s842_s21 = sshll.u32 %s1139_s16, 3 }
   0xf   : > { %s984_s24 = scalar_lea.vmem %s1134_s0, %s842_s21  ;;  %495 = vmatpush1.bf16.msra.mxu0 %v874_v3  ;;  %855 = vmatpush1.bf16.msra.mxu1 %v874_v3  ;;  %s1067_s18 = scalar_lea.vmem %s1137_s3, %s842_s21 }
  0x10   : > { %496 = vmatprep.subr.bf16.mxu0 %v938_v1  ;;  %846 = vmatprep.subr.bf16.mxu1 %v938_v1  ;;  %v884_v5 = vld [vmem:[%s984_s24 + $0x4] ss:$8 sps:$4 sm:$0xff]   ;;  %v882_v13 = vld [vmem:[%s984_s24] ss:$8 sps:$4 sm:$0xff]   ;;  %v888_v15 = vld [vmem:[%s984_s24 + $0x14] ss:$8 sps:$4 sm:$0xff]  }
  0x11   : > { %v887_v6 = vld [vmem:[%s984_s24 + $0x84] ss:$8 sps:$4 sm:$0xff]   ;;  %824 = vmatprep.mubr.msk.bf16.mxu0 %vm441_vm0, %v884_v5  ;;  %v885_v14 = vld [vmem:[%s984_s24 + $0x80] ss:$8 sps:$4 sm:$0xff]   ;;  %v890_v16 = vld [vmem:[%s984_s24 + $0x94] ss:$8 sps:$4 sm:$0xff]  }
  0x12   : > { %832 = vmatprep.mubr.msk.bf16.mxu1 %vm441_vm0, %v887_v6  ;;  %v892_v17 = vld [vmem:[%s984_s24 + $0x10] ss:$8 sps:$4 sm:$0xff]   ;;  %v894_v19 = vld [vmem:[%s984_s24 + $0x24] ss:$8 sps:$4 sm:$0xff]   ;;  %v898_v21 = vld [vmem:[%s984_s24 + $0x20] ss:$8 sps:$4 sm:$0xff]  }
  0x13   : > { %497 = vmatpush1.bf16.msra.mxu0 %v875_v4  ;;  %856 = vmatpush1.bf16.msra.mxu1 %v875_v4  ;;  %v893_v18 = vld [vmem:[%s984_s24 + $0x90] ss:$8 sps:$4 sm:$0xff]   ;;  %v896_v20 = vld [vmem:[%s984_s24 + $0xa4] ss:$8 sps:$4 sm:$0xff]   ;;  %v899_v22 = vld [vmem:[%s984_s24 + $0xa0] ss:$8 sps:$4 sm:$0xff]  }
  0x14   : > { %498 = vmatprep.subr.bf16.mxu0 %v938_v1  ;;  %847 = vmatprep.subr.bf16.mxu1 %v938_v1  ;;  %v900_v23 = vld [vmem:[%s984_s24 + $0x34] ss:$8 sps:$4 sm:$0xff]   ;;  %v904_v25 = vld [vmem:[%s984_s24 + $0x30] ss:$8 sps:$4 sm:$0xff]   ;;  %v906_v27 = vld [vmem:[%s984_s24 + $0x44] ss:$8 sps:$4 sm:$0xff]  }
  0x15   : > { %v902_v24 = vld [vmem:[%s984_s24 + $0xb4] ss:$8 sps:$4 sm:$0xff]   ;;  %v905_v26 = vld [vmem:[%s984_s24 + $0xb0] ss:$8 sps:$4 sm:$0xff]   ;;  %v908_v28 = vld [vmem:[%s984_s24 + $0xc4] ss:$8 sps:$4 sm:$0xff]  }
  0x16   : > { %v910_v29 = vld [vmem:[%s984_s24 + $0x40] ss:$8 sps:$4 sm:$0xff]   ;;  %v912_v31 = vld [vmem:[%s984_s24 + $0x54] ss:$8 sps:$4 sm:$0xff]   ;;  %v916_v33 = vld [vmem:[%s984_s24 + $0x50] ss:$8 sps:$4 sm:$0xff]  }
  0x17   : > { %499 = vmatpush1.bf16.msra.mxu0 %v876_v7  ;;  %857 = vmatpush1.bf16.msra.mxu1 %v876_v7  ;;  %v911_v30 = vld [vmem:[%s984_s24 + $0xc0] ss:$8 sps:$4 sm:$0xff]   ;;  %v914_v32 = vld [vmem:[%s984_s24 + $0xd4] ss:$8 sps:$4 sm:$0xff]   ;;  %v917_v34 = vld [vmem:[%s984_s24 + $0xd0] ss:$8 sps:$4 sm:$0xff]  }
  0x18   : > { %500 = vmatprep.subr.bf16.mxu0 %v938_v1  ;;  %848 = vmatprep.subr.bf16.mxu1 %v938_v1  ;;  %v918_v35 = vld [vmem:[%s984_s24 + $0x64] ss:$8 sps:$4 sm:$0xff]   ;;  %v922_v37 = vld [vmem:[%s984_s24 + $0x60] ss:$8 sps:$4 sm:$0xff]   ;;  %v924_v39 = vld [vmem:[%s984_s24 + $0x74] ss:$8 sps:$4 sm:$0xff]  }
  0x19   : > { %v920_v36 = vld [vmem:[%s984_s24 + $0xe4] ss:$8 sps:$4 sm:$0xff]   ;;  %v923_v38 = vld [vmem:[%s984_s24 + $0xe0] ss:$8 sps:$4 sm:$0xff]   ;;  %v926_v40 = vld [vmem:[%s984_s24 + $0xf4] ss:$8 sps:$4 sm:$0xff]  }
  0x1a   : > { %v928_v41 = vld [vmem:[%s984_s24 + $0x70] ss:$8 sps:$4 sm:$0xff]  }
  0x1b   : > { %501 = vmatpush1.bf16.msra.mxu0 %v877_v8  ;;  %858 = vmatpush1.bf16.msra.mxu1 %v877_v8  ;;  %v929_v42 = vld [vmem:[%s984_s24 + $0xf0] ss:$8 sps:$4 sm:$0xff]  }
  0x1c   : > { %502 = vmatprep.subr.bf16.mxu0 %v938_v1  ;;  %849 = vmatprep.subr.bf16.mxu1 %v938_v1 }
  0x1f   : > { %503 = vmatpush1.bf16.msra.mxu0 %v878_v9  ;;  %859 = vmatpush1.bf16.msra.mxu1 %v878_v9 }
  0x20   : > { %504 = vmatprep.subr.bf16.mxu0 %v938_v1  ;;  %850 = vmatprep.subr.bf16.mxu1 %v938_v1 }
  0x23   : > { %505 = vmatpush1.bf16.msra.mxu0 %v879_v10  ;;  %860 = vmatpush1.bf16.msra.mxu1 %v879_v10 }
  0x24   : > { %506 = vmatprep.subr.bf16.mxu0 %v938_v1  ;;  %851 = vmatprep.subr.bf16.mxu1 %v938_v1 }
  0x27   : > { %507 = vmatpush1.bf16.msra.mxu0 %v880_v11  ;;  %861 = vmatpush1.bf16.msra.mxu1 %v880_v11 }
  0x28   : > { %508 = vmatprep.subr.bf16.mxu0 %v938_v1  ;;  %852 = vmatprep.subr.bf16.mxu1 %v938_v1 }
  0x2b   : > { %509 = vmatpush1.bf16.msra.mxu0 %v881_v12  ;;  %862 = vmatpush1.bf16.msra.mxu1 %v881_v12 }
  0x2e   : > { %523 = vmatmul.mubr.bf16.vlgmr.msra.gmra.mrb[0].mxu0 %v882_v13  ;;  %587 = vmatmul.mubr.bf16.vlgmr.msra.gmra.mrb[0].mxu1 %v885_v14 }
  0x2f   : > { %825 = vmatprep.mubr.msk.bf16.mxu0 %vm441_vm0, %v888_v15  ;;  %833 = vmatprep.mubr.msk.bf16.mxu1 %vm441_vm0, %v890_v16 }
  0x36   : > { %531 = vmatmul.mubr.bf16.gmra.mrb[4].mxu0 %v892_v17  ;;  %595 = vmatmul.mubr.bf16.gmra.mrb[4].mxu1 %v893_v18 }
  0x37   : > { %826 = vmatprep.mubr.msk.bf16.mxu0 %vm441_vm0, %v894_v19  ;;  %834 = vmatprep.mubr.msk.bf16.mxu1 %vm441_vm0, %v896_v20 }
  0x3e   : > { %539 = vmatmul.mubr.bf16.gmra.mrb[8].mxu0 %v898_v21  ;;  %603 = vmatmul.mubr.bf16.gmra.mrb[8].mxu1 %v899_v22 }
  0x3f   : > { %827 = vmatprep.mubr.msk.bf16.mxu0 %vm441_vm0, %v900_v23  ;;  %835 = vmatprep.mubr.msk.bf16.mxu1 %vm441_vm0, %v902_v24 }
  0x46   : > { %547 = vmatmul.mubr.bf16.gmra.mrb[12].mxu0 %v904_v25  ;;  %611 = vmatmul.mubr.bf16.gmra.mrb[12].mxu1 %v905_v26 }
  0x47   : > { %828 = vmatprep.mubr.msk.bf16.mxu0 %vm441_vm0, %v906_v27  ;;  %836 = vmatprep.mubr.msk.bf16.mxu1 %vm441_vm0, %v908_v28 }
  0x4e   : > { %555 = vmatmul.mubr.bf16.gmra.mrb[16].mxu0 %v910_v29  ;;  %619 = vmatmul.mubr.bf16.gmra.mrb[16].mxu1 %v911_v30 }
  0x4f   : > { %829 = vmatprep.mubr.msk.bf16.mxu0 %vm441_vm0, %v912_v31  ;;  %837 = vmatprep.mubr.msk.bf16.mxu1 %vm441_vm0, %v914_v32 }
  0x56   : > { %563 = vmatmul.mubr.bf16.gmra.mrb[20].mxu0 %v916_v33  ;;  %627 = vmatmul.mubr.bf16.gmra.mrb[20].mxu1 %v917_v34 }
  0x57   : > { %830 = vmatprep.mubr.msk.bf16.mxu0 %vm441_vm0, %v918_v35  ;;  %838 = vmatprep.mubr.msk.bf16.mxu1 %vm441_vm0, %v920_v36 }
  0x5e   : > { %571 = vmatmul.mubr.bf16.gmra.mrb[24].mxu0 %v922_v37  ;;  %635 = vmatmul.mubr.bf16.gmra.mrb[24].mxu1 %v923_v38 }
  0x5f   : > { %831 = vmatprep.mubr.msk.bf16.mxu0 %vm441_vm0, %v924_v39  ;;  %839 = vmatprep.mubr.msk.bf16.mxu1 %vm441_vm0, %v926_v40 }
  0x66   : > { %579 = vmatmul.mubr.bf16.gmra.mrb[28].mxu0 %v928_v41  ;;  %643 = vmatmul.mubr.bf16.gmra.mrb[28].mxu1 %v929_v42 }
 0x101   : > { %v524_v44 = vpop.f32.mrb[0].mxu0  ;;  %v588_v45 = vpop.f32.mrb[0].mxu1 }
 0x102   : > { %v525_v46 = vadd.f32 %v1058_v43, %v524_v44  ;;  %v589_v47 = vadd.f32 %v1058_v43, %v588_v45  ;;  %v526_v48 = vpop.f32.mrb[1].mxu0  ;;  %v590_v49 = vpop.f32.mrb[1].mxu1 }
 0x103   : > { %v527_v50 = vpop.f32.mrb[2].mxu0  ;;  %v591_v51 = vpop.f32.mrb[2].mxu1 }
 0x104   : > { %v651_v52 = vmax.f32 %v525_v46, 0.0  ;;  %v667_v53 = vmax.f32 %v589_v47, 0.0  ;;  %v528_v54 = vadd.f32 %v1058_v43, %v527_v50  ;;  %v592_v55 = vadd.f32 %v1058_v43, %v591_v51  ;;  %v529_v56 = vpop.f32.mrb[3].mxu0  ;;  %v593_v57 = vpop.f32.mrb[3].mxu1 }
 0x106   : > { %683 = vst [vmem:[%s1067_s18] sm:$0xff] %v651_v52  ;;  %699 = vst [vmem:[%s1067_s18 + $0x80] sm:$0xff] %v667_v53  ;;  %v652_v58 = vmax.f32 %v528_v54, 0.0  ;;  %v668_v59 = vmax.f32 %v592_v55, 0.0 }
 0x108   : > { %684 = vst [vmem:[%s1067_s18 + $0x8] sm:$0xff] %v652_v58  ;;  %700 = vst [vmem:[%s1067_s18 + $0x88] sm:$0xff] %v668_v59 }
 0x109   : > { %v532_v60 = vpop.f32.mrb[4].mxu0  ;;  %v596_v61 = vpop.f32.mrb[4].mxu1 }
 0x10a   : > { %v533_v62 = vadd.f32 %v1058_v43, %v532_v60  ;;  %v597_v63 = vadd.f32 %v1058_v43, %v596_v61  ;;  %v534_v0 = vpop.f32.mrb[5].mxu0  ;;  %v598_v1 = vpop.f32.mrb[5].mxu1 }
 0x10b   : > { %v535_v2 = vpop.f32.mrb[6].mxu0  ;;  %v599_v3 = vpop.f32.mrb[6].mxu1 }
 0x10c   : > { %v653_v4 = vmax.f32 %v533_v62, 0.0  ;;  %v669_v5 = vmax.f32 %v597_v63, 0.0  ;;  %v536_v6 = vadd.f32 %v1058_v43, %v535_v2  ;;  %v600_v7 = vadd.f32 %v1058_v43, %v599_v3  ;;  %v537_v8 = vpop.f32.mrb[7].mxu0  ;;  %v601_v9 = vpop.f32.mrb[7].mxu1 }
 0x10e   : > { %685 = vst [vmem:[%s1067_s18 + $0x10] sm:$0xff] %v653_v4  ;;  %701 = vst [vmem:[%s1067_s18 + $0x90] sm:$0xff] %v669_v5  ;;  %v654_v10 = vmax.f32 %v536_v6, 0.0  ;;  %v670_v11 = vmax.f32 %v600_v7, 0.0 }
 0x110   : > { %686 = vst [vmem:[%s1067_s18 + $0x18] sm:$0xff] %v654_v10  ;;  %702 = vst [vmem:[%s1067_s18 + $0x98] sm:$0xff] %v670_v11 }
 0x111   : > { %v540_v12 = vpop.f32.mrb[8].mxu0  ;;  %v604_v13 = vpop.f32.mrb[8].mxu1 }
 0x112   : > { %v541_v14 = vadd.f32 %v1058_v43, %v540_v12  ;;  %v605_v15 = vadd.f32 %v1058_v43, %v604_v13  ;;  %v542_v16 = vpop.f32.mrb[9].mxu0  ;;  %v606_v17 = vpop.f32.mrb[9].mxu1 }
 0x113   : > { %v543_v18 = vpop.f32.mrb[10].mxu0  ;;  %v607_v19 = vpop.f32.mrb[10].mxu1 }
 0x114   : > { %v655_v20 = vmax.f32 %v541_v14, 0.0  ;;  %v671_v21 = vmax.f32 %v605_v15, 0.0  ;;  %v544_v22 = vadd.f32 %v1058_v43, %v543_v18  ;;  %v608_v23 = vadd.f32 %v1058_v43, %v607_v19  ;;  %v545_v24 = vpop.f32.mrb[11].mxu0  ;;  %v609_v25 = vpop.f32.mrb[11].mxu1 }
 0x116   : > { %687 = vst [vmem:[%s1067_s18 + $0x20] sm:$0xff] %v655_v20  ;;  %703 = vst [vmem:[%s1067_s18 + $0xa0] sm:$0xff] %v671_v21  ;;  %v656_v26 = vmax.f32 %v544_v22, 0.0  ;;  %v672_v27 = vmax.f32 %v608_v23, 0.0 }
 0x118   : > { %688 = vst [vmem:[%s1067_s18 + $0x28] sm:$0xff] %v656_v26  ;;  %704 = vst [vmem:[%s1067_s18 + $0xa8] sm:$0xff] %v672_v27 }
 0x119   : > { %v548_v28 = vpop.f32.mrb[12].mxu0  ;;  %v612_v29 = vpop.f32.mrb[12].mxu1 }
 0x11a   : > { %v549_v30 = vadd.f32 %v1058_v43, %v548_v28  ;;  %v613_v31 = vadd.f32 %v1058_v43, %v612_v29  ;;  %v550_v32 = vpop.f32.mrb[13].mxu0  ;;  %v614_v33 = vpop.f32.mrb[13].mxu1 }
 0x11b   : > { %v551_v34 = vpop.f32.mrb[14].mxu0  ;;  %v615_v35 = vpop.f32.mrb[14].mxu1 }
 0x11c   : > { %v657_v36 = vmax.f32 %v549_v30, 0.0  ;;  %v673_v37 = vmax.f32 %v613_v31, 0.0  ;;  %v552_v38 = vadd.f32 %v1058_v43, %v551_v34  ;;  %v616_v39 = vadd.f32 %v1058_v43, %v615_v35  ;;  %v553_v40 = vpop.f32.mrb[15].mxu0  ;;  %v617_v41 = vpop.f32.mrb[15].mxu1 }
 0x11e   : > { %689 = vst [vmem:[%s1067_s18 + $0x30] sm:$0xff] %v657_v36  ;;  %705 = vst [vmem:[%s1067_s18 + $0xb0] sm:$0xff] %v673_v37  ;;  %v658_v42 = vmax.f32 %v552_v38, 0.0  ;;  %v674_v44 = vmax.f32 %v616_v39, 0.0 }
 0x120   : > { %690 = vst [vmem:[%s1067_s18 + $0x38] sm:$0xff] %v658_v42  ;;  %706 = vst [vmem:[%s1067_s18 + $0xb8] sm:$0xff] %v674_v44 }
 0x121   : > { %v556_v45 = vpop.f32.mrb[16].mxu0  ;;  %v620_v46 = vpop.f32.mrb[16].mxu1 }
 0x122   : > { %v557_v47 = vadd.f32 %v1058_v43, %v556_v45  ;;  %v621_v48 = vadd.f32 %v1058_v43, %v620_v46  ;;  %v558_v49 = vpop.f32.mrb[17].mxu0  ;;  %v622_v50 = vpop.f32.mrb[17].mxu1 }
 0x123   : > { %v559_v51 = vpop.f32.mrb[18].mxu0  ;;  %v623_v52 = vpop.f32.mrb[18].mxu1 }
 0x124   : > { %v659_v53 = vmax.f32 %v557_v47, 0.0  ;;  %v675_v54 = vmax.f32 %v621_v48, 0.0  ;;  %v560_v55 = vadd.f32 %v1058_v43, %v559_v51  ;;  %v624_v56 = vadd.f32 %v1058_v43, %v623_v52  ;;  %v561_v57 = vpop.f32.mrb[19].mxu0  ;;  %v625_v58 = vpop.f32.mrb[19].mxu1 }
 0x126   : > { %691 = vst [vmem:[%s1067_s18 + $0x40] sm:$0xff] %v659_v53  ;;  %707 = vst [vmem:[%s1067_s18 + $0xc0] sm:$0xff] %v675_v54  ;;  %v660_v59 = vmax.f32 %v560_v55, 0.0  ;;  %v676_v60 = vmax.f32 %v624_v56, 0.0 }
 0x128   : > { %692 = vst [vmem:[%s1067_s18 + $0x48] sm:$0xff] %v660_v59  ;;  %708 = vst [vmem:[%s1067_s18 + $0xc8] sm:$0xff] %v676_v60 }
 0x129   : > { %v564_v61 = vpop.f32.mrb[20].mxu0  ;;  %v628_v62 = vpop.f32.mrb[20].mxu1 }
 0x12a   : > { %v565_v63 = vadd.f32 %v1058_v43, %v564_v61  ;;  %v629_v0 = vadd.f32 %v1058_v43, %v628_v62  ;;  %v566_v1 = vpop.f32.mrb[21].mxu0  ;;  %v630_v2 = vpop.f32.mrb[21].mxu1 }
 0x12b   : > { %v567_v3 = vpop.f32.mrb[22].mxu0  ;;  %v631_v4 = vpop.f32.mrb[22].mxu1 }
 0x12c   : > { %v661_v5 = vmax.f32 %v565_v63, 0.0  ;;  %v677_v6 = vmax.f32 %v629_v0, 0.0  ;;  %v568_v7 = vadd.f32 %v1058_v43, %v567_v3  ;;  %v632_v8 = vadd.f32 %v1058_v43, %v631_v4  ;;  %v569_v9 = vpop.f32.mrb[23].mxu0  ;;  %v633_v10 = vpop.f32.mrb[23].mxu1 }
 0x12e   : > { %693 = vst [vmem:[%s1067_s18 + $0x50] sm:$0xff] %v661_v5  ;;  %709 = vst [vmem:[%s1067_s18 + $0xd0] sm:$0xff] %v677_v6  ;;  %v662_v11 = vmax.f32 %v568_v7, 0.0  ;;  %v678_v12 = vmax.f32 %v632_v8, 0.0 }
 0x130   : > { %694 = vst [vmem:[%s1067_s18 + $0x58] sm:$0xff] %v662_v11  ;;  %710 = vst [vmem:[%s1067_s18 + $0xd8] sm:$0xff] %v678_v12 }
 0x131   : > { %v572_v13 = vpop.f32.mrb[24].mxu0  ;;  %v636_v14 = vpop.f32.mrb[24].mxu1 }
 0x132   : > { %v573_v15 = vadd.f32 %v1058_v43, %v572_v13  ;;  %v637_v16 = vadd.f32 %v1058_v43, %v636_v14  ;;  %v574_v17 = vpop.f32.mrb[25].mxu0  ;;  %v638_v18 = vpop.f32.mrb[25].mxu1 }
 0x133   : > { %v575_v19 = vpop.f32.mrb[26].mxu0  ;;  %v639_v20 = vpop.f32.mrb[26].mxu1 }
 0x134   : > { %v663_v21 = vmax.f32 %v573_v15, 0.0  ;;  %v679_v22 = vmax.f32 %v637_v16, 0.0  ;;  %v576_v23 = vadd.f32 %v1058_v43, %v575_v19  ;;  %v640_v24 = vadd.f32 %v1058_v43, %v639_v20  ;;  %v577_v25 = vpop.f32.mrb[27].mxu0  ;;  %v641_v26 = vpop.f32.mrb[27].mxu1 }
 0x136   : > { %695 = vst [vmem:[%s1067_s18 + $0x60] sm:$0xff] %v663_v21  ;;  %711 = vst [vmem:[%s1067_s18 + $0xe0] sm:$0xff] %v679_v22  ;;  %v664_v27 = vmax.f32 %v576_v23, 0.0  ;;  %v680_v28 = vmax.f32 %v640_v24, 0.0 }
 0x138   : > { %696 = vst [vmem:[%s1067_s18 + $0x68] sm:$0xff] %v664_v27  ;;  %712 = vst [vmem:[%s1067_s18 + $0xe8] sm:$0xff] %v680_v28 }
 0x139   : > { %v580_v29 = vpop.f32.mrb[28].mxu0  ;;  %v644_v30 = vpop.f32.mrb[28].mxu1 }
 0x13a   : > { %v581_v31 = vadd.f32 %v1058_v43, %v580_v29  ;;  %v645_v32 = vadd.f32 %v1058_v43, %v644_v30  ;;  %v582_v33 = vpop.f32.mrb[29].mxu0  ;;  %v646_v34 = vpop.f32.mrb[29].mxu1 }
 0x13b   : > { %v583_v35 = vpop.f32.mrb[30].mxu0  ;;  %v647_v36 = vpop.f32.mrb[30].mxu1 }
 0x13c   : > { %v665_v37 = vmax.f32 %v581_v31, 0.0  ;;  %v681_v38 = vmax.f32 %v645_v32, 0.0  ;;  %v584_v39 = vadd.f32 %v1058_v43, %v583_v35  ;;  %v648_v40 = vadd.f32 %v1058_v43, %v647_v36  ;;  %v585_v41 = vpop.f32.mrb[31].mxu0  ;;  %v649_v42 = vpop.f32.mrb[31].mxu1 }
 0x13e   : > { %697 = vst [vmem:[%s1067_s18 + $0x70] sm:$0xff] %v665_v37  ;;  %713 = vst [vmem:[%s1067_s18 + $0xf0] sm:$0xff] %v681_v38  ;;  %v666_v44 = vmax.f32 %v584_v39, 0.0  ;;  %v682_v45 = vmax.f32 %v648_v40, 0.0 }
 0x140   : > { %698 = vst [vmem:[%s1067_s18 + $0x78] sm:$0xff] %v666_v44  ;;  %714 = vst [vmem:[%s1067_s18 + $0xf8] sm:$0xff] %v682_v45 }
 0x141 PF: > { %s13_s12 = sadd.s32 1, %s936_s12  }
 0x142   : > { %p10_p4 = scmp.ge.s32.totalorder %s13_s12, 4  }
 0x144   :  { %12 = sbr.rel (!%p10_p4) target bundleno = 1 (0x1), region = 62 }

// kernel: segmented_faster_rcnn_forward.11
= control target key start
LH: loop header
LB: loop body
LE: loop exit
PB: predicated region body
PF: predicated region fallthrough
CT: control target
= control target key end

     0   :  { %s1519_s12 = smov 0   ;;  %s1761_s0 = inlined_call_operand.vmem [shape: bf16[512,288], index: 0, kind: input, shape index: {}]   ;;  %s1762_s1 = inlined_call_operand.vmem [shape: bf16[288,128], index: 1, kind: input, shape index: {}]   ;;  %s1763_s2 = inlined_call_operand.vmem [shape: f32[1,128], index: 2, kind: input, shape index: {}]   ;;  %s1764_s3 = inlined_call_operand.vmem [shape: f32[512,128], index: 3, kind: output, shape index: {}]  }
   0x1 LB: > { %s1124_s13 = sadd.s32 4294967295, %s1497_s12   ;;  %p1128_p0 = scmp.ge.s32.totalorder %s1497_s12, 1  ;;  %s1497_s12 = sphi %s1519_s12, %s13_s12  }
   0x2   : > { %p139_p1 = scmp.lt.s32.totalorder %s1497_s12, 3 }
   0x4   : > { %p140_p2 = pnand %p1128_p0, %p139_p1 }
   0x5   : > { %v1409_v0 = vld [vmem:[%s1762_s1 + $0x40] sm:$0xff] (!%p140_p2)   ;;  %s1129_s16 = sshll.u32 (!%p140_p2), %s1124_s13, 5  ;;  %v1411_v2 = vld [vmem:[%s1762_s1 + $0x48] sm:$0xff] (!%p140_p2)   ;;  %v1413_v4 = vld [vmem:[%s1762_s1 + $0x50] sm:$0xff] (!%p140_p2)   ;;  %vm633_vm0 = vcmask (!%p140_p2), 261120  }
   0x6   : > { %143 = sbr.rel (%p140_p2) target bundleno = 350 (0x15e), region = 32  ;;  %v1410_v1 = vld [vmem:[%s1762_s1] sm:$0xff] (!%p140_p2)   ;;  %1218 = vmatprep.subr.bf16.mxu0 (!%p140_p2), %v1409_v0  ;;  %1384 = vmatprep.subr.bf16.mxu1 (!%p140_p2), %v1409_v0  ;;  %p165_p3 = scmp.lt.s32.totalorder (!%p140_p2), %s1129_s16, 63  ;;  %v1412_v3 = vld [vmem:[%s1762_s1 + $0x8] sm:$0xff] (!%p140_p2)   ;;  %v1414_v5 = vld [vmem:[%s1762_s1 + $0x10] sm:$0xff] (!%p140_p2)  }
   0x7   : > { %1219 = vmatpush3.bf16.msra.mxu0 (!%p140_p2), %v1410_v1  ;;  %1392 = vmatpush3.bf16.msra.mxu1 (!%p140_p2), %v1410_v1  ;;  %v1415_v6 = vld [vmem:[%s1762_s1 + $0x58] sm:$0xff] (!%p140_p2)   ;;  %v1417_v8 = vld [vmem:[%s1762_s1 + $0x60] sm:$0xff] (!%p140_p2)   ;;  %v1419_v10 = vld [vmem:[%s1762_s1 + $0x68] sm:$0xff] (!%p140_p2)  }
   0x8   : > { %1220 = vmatprep.subr.bf16.mxu0 (!%p140_p2), %v1411_v2  ;;  %1385 = vmatprep.subr.bf16.mxu1 (!%p140_p2), %v1411_v2  ;;  %v1416_v7 = vld [vmem:[%s1762_s1 + $0x18] sm:$0xff] (!%p140_p2)   ;;  %v1418_v9 = vld [vmem:[%s1762_s1 + $0x20] sm:$0xff] (!%p140_p2)   ;;  %v1420_v13 = vld [vmem:[%s1762_s1 + $0x28] sm:$0xff] (!%p140_p2)  }
   0x9   : > { %v1421_v14 = vld [vmem:[%s1762_s1 + $0x70] sm:$0xff] (!%p140_p2)   ;;  %v1423_v16 = vld [vmem:[%s1762_s1 + $0x78] sm:$0xff] (!%p140_p2)   ;;  %v1431_v18 = vld [vmem:[%s1762_s1 + $0x80] sm:$0xff] (!%p140_p2)  }
   0xa   : > { %v1422_v15 = vld [vmem:[%s1762_s1 + $0x30] sm:$0xff] (!%p140_p2)   ;;  %v1424_v17 = vld [vmem:[%s1762_s1 + $0x38] sm:$0xff] (!%p140_p2)   ;;  %v1444_v23 = vld [vmem:[%s1762_s1 + $0x88] sm:$0xff] (!%p140_p2)  }
   0xb   : > { %1221 = vmatpush3.bf16.msra.mxu0 (!%p140_p2), %v1412_v3  ;;  %1393 = vmatpush3.bf16.msra.mxu1 (!%p140_p2), %v1412_v3 }
   0xc   : > { %1222 = vmatprep.subr.bf16.mxu0 (!%p140_p2), %v1413_v4  ;;  %1386 = vmatprep.subr.bf16.mxu1 (!%p140_p2), %v1413_v4 }
   0xd   : > { %s1766_s16 = smov (!%p165_p3, %s1129_s16), 63 }
   0xe   : > { %s1400_s29 = smul.u32 12, %s1766_s16  ;;  %s1132_s5 = sshll.u32 %s1766_s16, 3 }
   0xf   : > { %1223 = vmatpush3.bf16.msra.mxu0 %v1414_v5  ;;  %1394 = vmatpush3.bf16.msra.mxu1 %v1414_v5  ;;  %s1681_s8 = scalar_lea.vmem %s1764_s3, %s1132_s5 }
  0x10   : > { %1224 = vmatprep.subr.bf16.mxu0 %v1415_v6  ;;  %1387 = vmatprep.subr.bf16.mxu1 %v1415_v6  ;;  %s1560_s9 = scalar_lea.vmem %s1761_s0, %s1400_s29 }
  0x11   : > { %v1427_v11 = vld [vmem:[%s1560_s9 + $0x4] ss:$12 sps:$4 sm:$0xff]   ;;  %v1425_v19 = vld [vmem:[%s1560_s9] ss:$12 sps:$4 sm:$0xff]   ;;  %v1432_v21 = vld [vmem:[%s1560_s9 + $0x1c] ss:$12 sps:$4 sm:$0xff]  }
  0x12   : > { %v1430_v12 = vld [vmem:[%s1560_s9 + $0x124] ss:$12 sps:$4 sm:$0xff]   ;;  %714 = vmatprep.mubr.bf16.mxu0 %v1427_v11  ;;  %v1428_v20 = vld [vmem:[%s1560_s9 + $0x120] ss:$12 sps:$4 sm:$0xff]   ;;  %v1434_v22 = vld [vmem:[%s1560_s9 + $0x13c] ss:$12 sps:$4 sm:$0xff]  }
  0x13   : > { %1225 = vmatpush3.bf16.msra.mxu0 %v1416_v7  ;;  %1395 = vmatpush3.bf16.msra.mxu1 %v1416_v7  ;;  %v1436_v24 = vld [vmem:[%s1560_s9 + $0x18] ss:$12 sps:$4 sm:$0xff]   ;;  %v1438_v26 = vld [vmem:[%s1560_s9 + $0x34] ss:$12 sps:$4 sm:$0xff]   ;;  %v1442_v28 = vld [vmem:[%s1560_s9 + $0x30] ss:$12 sps:$4 sm:$0xff]  }
  0x14   : > { %1226 = vmatprep.subr.bf16.mxu0 %v1417_v8  ;;  %1388 = vmatprep.subr.bf16.mxu1 %v1417_v8  ;;  %v1437_v25 = vld [vmem:[%s1560_s9 + $0x138] ss:$12 sps:$4 sm:$0xff]   ;;  %v1440_v27 = vld [vmem:[%s1560_s9 + $0x154] ss:$12 sps:$4 sm:$0xff]   ;;  %v1443_v29 = vld [vmem:[%s1560_s9 + $0x150] ss:$12 sps:$4 sm:$0xff]  }
  0x15   : > { %810 = vmatprep.mubr.bf16.mxu1 %v1430_v12  ;;  %v1445_v30 = vld [vmem:[%s1560_s9 + $0x4c] ss:$12 sps:$4 sm:$0xff]   ;;  %v1449_v32 = vld [vmem:[%s1560_s9 + $0x48] ss:$12 sps:$4 sm:$0xff]   ;;  %v1451_v34 = vld [vmem:[%s1560_s9 + $0x64] ss:$12 sps:$4 sm:$0xff]  }
  0x16   : > { %v1447_v31 = vld [vmem:[%s1560_s9 + $0x16c] ss:$12 sps:$4 sm:$0xff]   ;;  %v1450_v33 = vld [vmem:[%s1560_s9 + $0x168] ss:$12 sps:$4 sm:$0xff]   ;;  %v1460_v41 = vld [vmem:[%s1560_s9 + $0x50] ss:$12 sps:$4 sm:$0xff]  }
  0x17   : > { %1227 = vmatpush3.bf16.msra.mxu0 %v1418_v9  ;;  %1396 = vmatpush3.bf16.msra.mxu1 %v1418_v9  ;;  %v1453_v35 = vld [vmem:[%s1560_s9 + $0x8] ss:$12 sps:$4 sm:$0xff]   ;;  %v1454_v36 = vld [vmem:[%s1560_s9 + $0x60] ss:$12 sps:$4 sm:$0xff]   ;;  %v1458_v39 = vld [vmem:[%s1560_s9 + $0x38] ss:$12 sps:$4 sm:$0xff]  }
  0x18   : > { %1228 = vmatprep.subr.bf16.mxu0 %v1419_v10  ;;  %1389 = vmatprep.subr.bf16.mxu1 %v1419_v10  ;;  %v1455_v37 = vld [vmem:[%s1560_s9 + $0x20] ss:$12 sps:$4 sm:$0xff]   ;;  %v1456_v38 = vld [vmem:[%s1560_s9 + $0x7c] ss:$12 sps:$4 sm:$0xff]   ;;  %v1459_v40 = vld [vmem:[%s1560_s9 + $0x78] ss:$12 sps:$4 sm:$0xff]  }
  0x19   : > { %v1461_v42 = vld [vmem:[%s1560_s9 + $0x94] ss:$12 sps:$4 sm:$0xff]   ;;  %v1464_v44 = vld [vmem:[%s1560_s9 + $0x90] ss:$12 sps:$4 sm:$0xff]   ;;  %v1466_v46 = vld [vmem:[%s1560_s9 + $0xac] ss:$12 sps:$4 sm:$0xff]  }
  0x1a   : > { %v1463_v43 = vld [vmem:[%s1560_s9 + $0x68] ss:$12 sps:$4 sm:$0xff]   ;;  %v1465_v45 = vld [vmem:[%s1560_s9 + $0x80] ss:$12 sps:$4 sm:$0xff]   ;;  %v1468_v47 = vld [vmem:[%s1560_s9 + $0x98] ss:$12 sps:$4 sm:$0xff]  }
  0x1b   : > { %1229 = vmatpush3.bf16.msra.mxu0 %v1420_v13  ;;  %1397 = vmatpush3.bf16.msra.mxu1 %v1420_v13  ;;  %v1469_v48 = vld [vmem:[%s1560_s9 + $0xa8] ss:$12 sps:$4 sm:$0xff]   ;;  %v1470_v49 = vld [vmem:[%s1560_s9 + $0xb0] ss:$12 sps:$4 sm:$0xff]   ;;  %v1474_v52 = vld [vmem:[%s1560_s9 + $0xc0] ss:$12 sps:$4 sm:$0xff]  }
  0x1c   : > { %1230 = vmatprep.subr.bf16.mxu0 %v1421_v14  ;;  %1390 = vmatprep.subr.bf16.mxu1 %v1421_v14  ;;  %v1471_v50 = vld [vmem:[%s1560_s9 + $0xc4] ss:$12 sps:$4 sm:$0xff]   ;;  %v1473_v51 = vld [vmem:[%s1560_s9 + $0xc8] ss:$12 sps:$4 sm:$0xff]   ;;  %v1475_v53 = vld [vmem:[%s1560_s9 + $0xe0] ss:$12 sps:$4 sm:$0xff]  }
  0x1d   : > { %v1476_v54 = vld [vmem:[%s1560_s9 + $0xdc] ss:$12 sps:$4 sm:$0xff]   ;;  %v1478_v55 = vld [vmem:[%s1560_s9 + $0xf8] ss:$12 sps:$4 sm:$0xff]   ;;  %v1481_v58 = vld [vmem:[%s1560_s9 + $0xf4] ss:$12 sps:$4 sm:$0xff]  }
  0x1e   : > { %v1479_v56 = vld [vmem:[%s1560_s9 + $0xd8] ss:$12 sps:$4 sm:$0xff]   ;;  %v1480_v57 = vld [vmem:[%s1560_s9 + $0x110] ss:$12 sps:$4 sm:$0xff]   ;;  %v1483_v59 = vld [vmem:[%s1560_s9 + $0x128] ss:$12 sps:$4 sm:$0xff]  }
  0x1f   : > { %1231 = vmatpush3.bf16.msra.mxu0 %v1422_v15  ;;  %1398 = vmatpush3.bf16.msra.mxu1 %v1422_v15  ;;  %v1484_v60 = vld [vmem:[%s1560_s9 + $0xf0] ss:$12 sps:$4 sm:$0xff]   ;;  %v1485_v61 = vld [vmem:[%s1560_s9 + $0x140] ss:$12 sps:$4 sm:$0xff]   ;;  %v1488_v63 = vld [vmem:[%s1560_s9 + $0x158] ss:$12 sps:$4 sm:$0xff]  }
  0x20   : > { %1232 = vmatprep.subr.bf16.mxu0 %v1423_v16  ;;  %1391 = vmatprep.subr.bf16.mxu1 %v1423_v16  ;;  %v1486_v62 = vld [vmem:[%s1560_s9 + $0x10c] ss:$12 sps:$4 sm:$0xff]   ;;  %v1489_v0 = vld [vmem:[%s1560_s9 + $0x108] ss:$12 sps:$4 sm:$0xff]   ;;  %v1490_v1 = vld [vmem:[%s1560_s9 + $0x170] ss:$12 sps:$4 sm:$0xff]  }
  0x23   : > { %1233 = vmatpush3.bf16.msra.mxu0 %v1424_v17  ;;  %1399 = vmatpush3.bf16.msra.mxu1 %v1424_v17 }
  0x24   : > { %1348 = vmatprep.subr.bf16.mxu1 %v1431_v18 }
  0x26   : > { %715 = vmatmul.mubr.bf16.vlgmr.msra.gmra.mrb[0].mxu0 %v1425_v19  ;;  %811 = vmatmul.mubr.bf16.vlgmr.msra.gmra.mrb[0].mxu1 %v1428_v20 }
  0x27   : > { %1349 = vmatpush3.bf16.msra.mxu1 %v1431_v18  ;;  %722 = vmatprep.mubr.bf16.mxu0 %v1432_v21 }
  0x28   : > { %818 = vmatprep.mubr.bf16.mxu1 %v1434_v22  ;;  %1350 = vmatprep.subr.bf16.mxu1 %v1444_v23 }
  0x2b   : > { %1351 = vmatpush3.bf16.msra.mxu1 %v1444_v23 }
  0x2e   : > { %723 = vmatmul.mubr.bf16.gmra.mrb[4].mxu0 %v1436_v24  ;;  %819 = vmatmul.mubr.bf16.gmra.mrb[4].mxu1 %v1437_v25 }
  0x2f   : > { %730 = vmatprep.mubr.bf16.mxu0 %v1438_v26  ;;  %826 = vmatprep.mubr.bf16.mxu1 %v1440_v27 }
  0x36   : > { %731 = vmatmul.mubr.bf16.gmra.mrb[8].mxu0 %v1442_v28  ;;  %827 = vmatmul.mubr.bf16.gmra.mrb[8].mxu1 %v1443_v29 }
  0x37   : > { %738 = vmatprep.mubr.bf16.mxu0 %v1445_v30  ;;  %834 = vmatprep.mubr.bf16.mxu1 %v1447_v31 }
  0x3e   : > { %739 = vmatmul.mubr.bf16.gmra.mrb[12].mxu0 %v1449_v32  ;;  %835 = vmatmul.mubr.bf16.gmra.mrb[12].mxu1 %v1450_v33 }
  0x3f   : > { %746 = vmatprep.mubr.bf16.mxu0 %v1451_v34  ;;  %1352 = vmatprep.mubr.msk.bf16.mxu1 %vm633_vm0, %v1453_v35 }
  0x46   : > { %747 = vmatmul.mubr.bf16.gmra.mrb[16].mxu0 %v1454_v36  ;;  %1353 = vmatmul.mubr.msk.bf16.vlgmr.msra.gmra.mrb[16].mxu1 %vm633_vm0, %v1455_v37 }
  0x47   : > { %754 = vmatprep.mubr.bf16.mxu0 %v1456_v38  ;;  %1356 = vmatprep.mubr.msk.bf16.mxu1 %vm633_vm0, %v1458_v39 }
  0x4e   : > { %755 = vmatmul.mubr.bf16.gmra.mrb[20].mxu0 %v1459_v40  ;;  %1357 = vmatmul.mubr.msk.bf16.gmra.mrb[20].mxu1 %vm633_vm0, %v1460_v41 }
  0x4f   : > { %762 = vmatprep.mubr.bf16.mxu0 %v1461_v42  ;;  %1360 = vmatprep.mubr.msk.bf16.mxu1 %vm633_vm0, %v1463_v43 }
  0x56   : > { %763 = vmatmul.mubr.bf16.gmra.mrb[24].mxu0 %v1464_v44  ;;  %1361 = vmatmul.mubr.msk.bf16.gmra.mrb[24].mxu1 %vm633_vm0, %v1465_v45 }
  0x57   : > { %770 = vmatprep.mubr.bf16.mxu0 %v1466_v46  ;;  %1364 = vmatprep.mubr.msk.bf16.mxu1 %vm633_vm0, %v1468_v47 }
  0x5e   : > { %771 = vmatmul.mubr.bf16.gmra.mrb[28].mxu0 %v1469_v48  ;;  %1365 = vmatmul.mubr.msk.bf16.gmra.mrb[28].mxu1 %vm633_vm0, %v1470_v49 }
  0x5f   : > { %778 = vmatprep.mubr.bf16.mxu0 %v1471_v50  ;;  %1368 = vmatprep.mubr.msk.bf16.mxu1 %vm633_vm0, %v1473_v51  ;;  %v1672_v50 = vld [vmem:[%s1763_s2] ss:$0 sm:$0xff] }
  0x66   : > { %779 = vmatmul.mubr.bf16.gmra.mrb[32].mxu0 %v1474_v52  ;;  %1369 = vmatmul.mubr.msk.bf16.gmra.mrb[32].mxu1 %vm633_vm0, %v1475_v53 }
  0x67   : > { %786 = vmatprep.mubr.bf16.mxu0 %v1476_v54  ;;  %1372 = vmatprep.mubr.msk.bf16.mxu1 %vm633_vm0, %v1478_v55 }
  0x6e   : > { %787 = vmatmul.mubr.bf16.gmra.mrb[36].mxu0 %v1479_v56  ;;  %1373 = vmatmul.mubr.msk.bf16.gmra.mrb[36].mxu1 %vm633_vm0, %v1480_v57 }
  0x6f   : > { %794 = vmatprep.mubr.bf16.mxu0 %v1481_v58  ;;  %1376 = vmatprep.mubr.msk.bf16.mxu1 %vm633_vm0, %v1483_v59 }
  0x76   : > { %795 = vmatmul.mubr.bf16.gmra.mrb[40].mxu0 %v1484_v60  ;;  %1377 = vmatmul.mubr.msk.bf16.gmra.mrb[40].mxu1 %vm633_vm0, %v1485_v61 }
  0x77   : > { %802 = vmatprep.mubr.bf16.mxu0 %v1486_v62  ;;  %1380 = vmatprep.mubr.msk.bf16.mxu1 %vm633_vm0, %v1488_v63 }
  0x7e   : > { %803 = vmatmul.mubr.bf16.gmra.mrb[44].mxu0 %v1489_v0  ;;  %1381 = vmatmul.mubr.msk.bf16.gmra.mrb[44].mxu1 %vm633_vm0, %v1490_v1 }
  0xf9   : > { %v1234_v2 = vpop.f32.mrb[0].mxu0  ;;  %v1306_v3 = vpop.f32.mrb[0].mxu1 }
  0xfa   : > { %v1235_v4 = vpop.f32.mrb[1].mxu0  ;;  %v1307_v5 = vpop.f32.mrb[1].mxu1 }
  0xfb   : > { %v1236_v6 = vadd.f32 %v1235_v4, %v1234_v2  ;;  %v1237_v7 = vpop.f32.mrb[2].mxu0  ;;  %v1653_v8 = vadd.f32 %v1307_v5, %v1306_v3  ;;  %v1309_v9 = vpop.f32.mrb[2].mxu1 }
  0xfc   : > { %v1238_v10 = vpop.f32.mrb[3].mxu0  ;;  %v1310_v11 = vpop.f32.mrb[3].mxu1 }
  0xfd   : > { %v1239_v12 = vadd.f32 %v1238_v10, %v1237_v7  ;;  %v1655_v13 = vadd.f32 %v1310_v11, %v1309_v9  ;;  %v717_v54 = vadd.f32 %v1236_v6, %v1672_v50 }
  0xff   : > { %v720_v63 = vadd.f32 %v1239_v12, %v1672_v50 }
 0x101   : > { %v1240_v14 = vpop.f32.mrb[4].mxu0  ;;  %v1312_v15 = vpop.f32.mrb[4].mxu1 }
 0x102   : > { %v1241_v16 = vpop.f32.mrb[5].mxu0  ;;  %v1313_v17 = vpop.f32.mrb[5].mxu1 }
 0x103   : > { %v1242_v18 = vadd.f32 %v1241_v16, %v1240_v14  ;;  %v1243_v19 = vpop.f32.mrb[6].mxu0  ;;  %v1657_v20 = vadd.f32 %v1313_v17, %v1312_v15  ;;  %v1315_v21 = vpop.f32.mrb[6].mxu1 }
 0x104   : > { %v1244_v22 = vpop.f32.mrb[7].mxu0  ;;  %v1316_v23 = vpop.f32.mrb[7].mxu1 }
 0x105   : > { %v1245_v24 = vadd.f32 %v1244_v22, %v1243_v19  ;;  %v1659_v25 = vadd.f32 %v1316_v23, %v1315_v21  ;;  %v725_v51 = vadd.f32 %v1242_v18, %v1672_v50 }
 0x107   : > { %v728_v58 = vadd.f32 %v1245_v24, %v1672_v50 }
 0x109   : > { %v1246_v26 = vpop.f32.mrb[8].mxu0  ;;  %v1318_v27 = vpop.f32.mrb[8].mxu1 }
 0x10a   : > { %v1247_v28 = vpop.f32.mrb[9].mxu0  ;;  %v1319_v29 = vpop.f32.mrb[9].mxu1 }
 0x10b   : > { %v1248_v30 = vadd.f32 %v1247_v28, %v1246_v26  ;;  %v1249_v31 = vpop.f32.mrb[10].mxu0  ;;  %v1661_v32 = vadd.f32 %v1319_v29, %v1318_v27  ;;  %v1321_v33 = vpop.f32.mrb[10].mxu1 }
 0x10c   : > { %v1250_v34 = vpop.f32.mrb[11].mxu0  ;;  %v1322_v35 = vpop.f32.mrb[11].mxu1 }
 0x10d   : > { %v1251_v36 = vadd.f32 %v1250_v34, %v1249_v31  ;;  %v1663_v37 = vadd.f32 %v1322_v35, %v1321_v33  ;;  %v733_v15 = vadd.f32 %v1248_v30, %v1672_v50 }
 0x10f   : > { %v736_v24 = vadd.f32 %v1251_v36, %v1672_v50 }
 0x111   : > { %v1252_v38 = vpop.f32.mrb[12].mxu0  ;;  %v1324_v39 = vpop.f32.mrb[12].mxu1 }
 0x112   : > { %v1253_v40 = vpop.f32.mrb[13].mxu0  ;;  %v1325_v41 = vpop.f32.mrb[13].mxu1 }
 0x113   : > { %v1254_v42 = vadd.f32 %v1253_v40, %v1252_v38  ;;  %v1255_v43 = vpop.f32.mrb[14].mxu0  ;;  %v1665_v44 = vadd.f32 %v1325_v41, %v1324_v39  ;;  %v1327_v45 = vpop.f32.mrb[14].mxu1 }
 0x114   : > { %v1256_v46 = vpop.f32.mrb[15].mxu0  ;;  %v1328_v47 = vpop.f32.mrb[15].mxu1 }
 0x115   : > { %v1257_v48 = vadd.f32 %v1256_v46, %v1255_v43  ;;  %v1667_v49 = vadd.f32 %v1328_v47, %v1327_v45  ;;  %v741_v10 = vadd.f32 %v1254_v42, %v1672_v50 }
 0x117   : > { %v744_v18 = vadd.f32 %v1257_v48, %v1672_v50 }
 0x119   : > { %v1258_v52 = vpop.f32.mrb[16].mxu0  ;;  %v1354_v53 = vpop.f32.mrb[16].mxu1 }
 0x11a   : > { %v886_v55 = vadd.f32 %v1354_v53, %v725_v51  ;;  %v1259_v56 = vpop.f32.mrb[17].mxu0  ;;  %v877_v57 = vpop.f32.mrb[17].mxu1 }
 0x11b   : > { %v1260_v59 = vadd.f32 %v1259_v56, %v1258_v52  ;;  %v878_v60 = vadd.f32 %v877_v57, %v717_v54  ;;  %v1261_v61 = vpop.f32.mrb[18].mxu0  ;;  %v1355_v62 = vpop.f32.mrb[18].mxu1 }
 0x11c   : > { %v1006_v0 = vmax.f32 %v886_v55, 0.0  ;;  %v889_v1 = vadd.f32 %v1355_v62, %v728_v58  ;;  %v1262_v2 = vpop.f32.mrb[19].mxu0  ;;  %v880_v3 = vpop.f32.mrb[19].mxu1 }
 0x11d   : > { %v1004_v4 = vmax.f32 %v878_v60, 0.0  ;;  %v1263_v5 = vadd.f32 %v1262_v2, %v1261_v61  ;;  %v881_v6 = vadd.f32 %v880_v3, %v720_v63  ;;  %v749_v41 = vadd.f32 %v1260_v59, %v1672_v50 }
 0x11e   : > { %1038 = vst [vmem:[%s1681_s8 + $0x10] sm:$0xff] %v1006_v0  ;;  %v1007_v7 = vmax.f32 %v889_v1, 0.0 }
 0x11f   : > { %1036 = vst [vmem:[%s1681_s8] sm:$0xff] %v1004_v4  ;;  %v1005_v9 = vmax.f32 %v881_v6, 0.0  ;;  %v752_v52 = vadd.f32 %v1263_v5, %v1672_v50 }
 0x120   : > { %1039 = vst [vmem:[%s1681_s8 + $0x18] sm:$0xff] %v1007_v7 }
 0x121   : > { %1037 = vst [vmem:[%s1681_s8 + $0x8] sm:$0xff] %v1005_v9  ;;  %v1264_v11 = vpop.f32.mrb[20].mxu0  ;;  %v1358_v14 = vpop.f32.mrb[20].mxu1 }
 0x122   : > { %v902_v12 = vadd.f32 %v1358_v14, %v741_v10  ;;  %v1265_v16 = vpop.f32.mrb[21].mxu0  ;;  %v893_v17 = vpop.f32.mrb[21].mxu1 }
 0x123   : > { %v1266_v19 = vadd.f32 %v1265_v16, %v1264_v11  ;;  %v894_v21 = vadd.f32 %v893_v17, %v733_v15  ;;  %v1267_v22 = vpop.f32.mrb[22].mxu0  ;;  %v1359_v23 = vpop.f32.mrb[22].mxu1 }
 0x124   : > { %v1010_v26 = vmax.f32 %v902_v12, 0.0  ;;  %v905_v27 = vadd.f32 %v1359_v23, %v744_v18  ;;  %v1268_v28 = vpop.f32.mrb[23].mxu0  ;;  %v896_v29 = vpop.f32.mrb[23].mxu1 }
 0x125   : > { %v1008_v30 = vmax.f32 %v894_v21, 0.0  ;;  %v1269_v31 = vadd.f32 %v1268_v28, %v1267_v22  ;;  %v897_v33 = vadd.f32 %v896_v29, %v736_v24  ;;  %v757_v38 = vadd.f32 %v1266_v19, %v1672_v50 }
 0x126   : > { %1042 = vst [vmem:[%s1681_s8 + $0x30] sm:$0xff] %v1010_v26  ;;  %v1011_v34 = vmax.f32 %v905_v27, 0.0 }
 0x127   : > { %1040 = vst [vmem:[%s1681_s8 + $0x20] sm:$0xff] %v1008_v30  ;;  %v1009_v35 = vmax.f32 %v897_v33, 0.0  ;;  %v760_v45 = vadd.f32 %v1269_v31, %v1672_v50 }
 0x128   : > { %1043 = vst [vmem:[%s1681_s8 + $0x38] sm:$0xff] %v1011_v34 }
 0x129   : > { %1041 = vst [vmem:[%s1681_s8 + $0x28] sm:$0xff] %v1009_v35  ;;  %v1270_v39 = vpop.f32.mrb[24].mxu0  ;;  %v1362_v40 = vpop.f32.mrb[24].mxu1 }
 0x12a   : > { %v918_v36 = vadd.f32 %v1362_v40, %v757_v38  ;;  %v1271_v42 = vpop.f32.mrb[25].mxu0  ;;  %v909_v43 = vpop.f32.mrb[25].mxu1 }
 0x12b   : > { %v1272_v46 = vadd.f32 %v1271_v42, %v1270_v39  ;;  %v910_v47 = vadd.f32 %v909_v43, %v749_v41  ;;  %v1273_v48 = vpop.f32.mrb[26].mxu0  ;;  %v1363_v51 = vpop.f32.mrb[26].mxu1 }
 0x12c   : > { %v1014_v53 = vmax.f32 %v918_v36, 0.0  ;;  %v921_v54 = vadd.f32 %v1363_v51, %v760_v45  ;;  %v1274_v55 = vpop.f32.mrb[27].mxu0  ;;  %v912_v56 = vpop.f32.mrb[27].mxu1 }
 0x12d   : > { %v1012_v57 = vmax.f32 %v910_v47, 0.0  ;;  %v1275_v58 = vadd.f32 %v1274_v55, %v1273_v48  ;;  %v913_v59 = vadd.f32 %v912_v56, %v752_v52  ;;  %v765_v0 = vadd.f32 %v1272_v46, %v1672_v50 }
 0x12e   : > { %1046 = vst [vmem:[%s1681_s8 + $0x50] sm:$0xff] %v1014_v53  ;;  %v1015_v60 = vmax.f32 %v921_v54, 0.0 }
 0x12f   : > { %1044 = vst [vmem:[%s1681_s8 + $0x40] sm:$0xff] %v1012_v57  ;;  %v1013_v61 = vmax.f32 %v913_v59, 0.0  ;;  %v768_v7 = vadd.f32 %v1275_v58, %v1672_v50  ;;  %v821_v58 = vadd.f32 %v1657_v20, %v1672_v50 }
 0x130   : > { %1047 = vst [vmem:[%s1681_s8 + $0x58] sm:$0xff] %v1015_v60 }
 0x131   : > { %1045 = vst [vmem:[%s1681_s8 + $0x48] sm:$0xff] %v1013_v61  ;;  %v1276_v62 = vpop.f32.mrb[28].mxu0  ;;  %v1366_v63 = vpop.f32.mrb[28].mxu1 }
 0x132   : > { %v1277_v1 = vpop.f32.mrb[29].mxu0  ;;  %v925_v2 = vpop.f32.mrb[29].mxu1 }
 0x133   : > { %v1278_v3 = vadd.f32 %v1277_v1, %v1276_v62  ;;  %v926_v4 = vadd.f32 %v925_v2, %v765_v0  ;;  %v1279_v5 = vpop.f32.mrb[30].mxu0  ;;  %v1367_v6 = vpop.f32.mrb[30].mxu1 }
 0x134   : > { %v1280_v9 = vpop.f32.mrb[31].mxu0  ;;  %v928_v10 = vpop.f32.mrb[31].mxu1 }
 0x135   : > { %v773_v11 = vadd.f32 %v1278_v3, %v1672_v50  ;;  %v1016_v14 = vmax.f32 %v926_v4, 0.0  ;;  %v1281_v15 = vadd.f32 %v1280_v9, %v1279_v5  ;;  %v929_v12 = vadd.f32 %v928_v10, %v768_v7 }
 0x136   : > { %v824_v3 = vadd.f32 %v1659_v25, %v1672_v50  ;;  %v816_v9 = vadd.f32 %v1655_v13, %v1672_v50 }
 0x137   : > { %v934_v16 = vadd.f32 %v1366_v63, %v773_v11  ;;  %1048 = vst [vmem:[%s1681_s8 + $0x60] sm:$0xff] %v1016_v14  ;;  %v776_v17 = vadd.f32 %v1281_v15, %v1672_v50  ;;  %v1017_v18 = vmax.f32 %v929_v12, 0.0  ;;  %v813_v63 = vadd.f32 %v1653_v8, %v1672_v50 }
 0x139   : > { %v1018_v19 = vmax.f32 %v934_v16, 0.0  ;;  %v937_v21 = vadd.f32 %v1367_v6, %v776_v17  ;;  %1049 = vst [vmem:[%s1681_s8 + $0x68] sm:$0xff] %v1017_v18  ;;  %v1282_v22 = vpop.f32.mrb[32].mxu0  ;;  %v1370_v23 = vpop.f32.mrb[32].mxu1 }
 0x13a   : > { %v1283_v24 = vpop.f32.mrb[33].mxu0  ;;  %v941_v26 = vpop.f32.mrb[33].mxu1 }
 0x13b   : > { %1050 = vst [vmem:[%s1681_s8 + $0x70] sm:$0xff] %v1018_v19  ;;  %v1019_v27 = vmax.f32 %v937_v21, 0.0  ;;  %v1284_v28 = vadd.f32 %v1283_v24, %v1282_v22  ;;  %v1285_v29 = vpop.f32.mrb[34].mxu0  ;;  %v1371_v30 = vpop.f32.mrb[34].mxu1  ;;  %v837_v21 = vadd.f32 %v1665_v44, %v1672_v50 }
 0x13c   : > { %v1286_v31 = vpop.f32.mrb[35].mxu0  ;;  %v944_v33 = vpop.f32.mrb[35].mxu1 }
 0x13d   : > { %1051 = vst [vmem:[%s1681_s8 + $0x78] sm:$0xff] %v1019_v27  ;;  %v781_v34 = vadd.f32 %v1284_v28, %v1672_v50  ;;  %v1287_v35 = vadd.f32 %v1286_v31, %v1285_v29  ;;  %v829_v27 = vadd.f32 %v1661_v32, %v1672_v50  ;;  %v840_v31 = vadd.f32 %v1667_v49, %v1672_v50 }
 0x13f   : > { %v942_v38 = vadd.f32 %v941_v26, %v781_v34  ;;  %v784_v39 = vadd.f32 %v1287_v35, %v1672_v50 }
 0x141   : > { %v1020_v40 = vmax.f32 %v942_v38, 0.0  ;;  %v945_v41 = vadd.f32 %v944_v33, %v784_v39  ;;  %v1288_v36 = vpop.f32.mrb[36].mxu0  ;;  %v1714_v42 = vpop.f32.mrb[36].mxu1  ;;  %v832_v39 = vadd.f32 %v1663_v37, %v1672_v50 }
 0x142   : > { %v1289_v43 = vpop.f32.mrb[37].mxu0  ;;  %v957_v45 = vpop.f32.mrb[37].mxu1 }
 0x143   : > { %1052 = vst [vmem:[%s1681_s8 + $0x80] sm:$0xff] %v1020_v40  ;;  %v1021_v46 = vmax.f32 %v945_v41, 0.0  ;;  %v1290_v47 = vadd.f32 %v1289_v43, %v1288_v36  ;;  %v1291_v48 = vpop.f32.mrb[38].mxu0  ;;  %v1717_v51 = vpop.f32.mrb[38].mxu1 }
 0x144   : > { %v1292_v52 = vpop.f32.mrb[39].mxu0  ;;  %v960_v53 = vpop.f32.mrb[39].mxu1 }
 0x145   : > { %1053 = vst [vmem:[%s1681_s8 + $0x88] sm:$0xff] %v1021_v46  ;;  %v789_v54 = vadd.f32 %v1290_v47, %v1672_v50  ;;  %v1293_v55 = vadd.f32 %v1292_v52, %v1291_v48 }
 0x147   : > { %v950_v56 = vadd.f32 %v1370_v23, %v789_v54  ;;  %v792_v57 = vadd.f32 %v1293_v55, %v1672_v50 }
 0x149   : > { %v1022_v59 = vmax.f32 %v950_v56, 0.0  ;;  %v953_v60 = vadd.f32 %v1371_v30, %v792_v57  ;;  %v1294_v61 = vpop.f32.mrb[40].mxu0  ;;  %v1378_v62 = vpop.f32.mrb[40].mxu1 }
 0x14a   : > { %v982_v0 = vadd.f32 %v1378_v62, %v821_v58  ;;  %v1295_v1 = vpop.f32.mrb[41].mxu0  ;;  %v973_v2 = vpop.f32.mrb[41].mxu1 }
 0x14b   : > { %1054 = vst [vmem:[%s1681_s8 + $0x90] sm:$0xff] %v1022_v59  ;;  %v1023_v4 = vmax.f32 %v953_v60, 0.0  ;;  %v1296_v5 = vadd.f32 %v1295_v1, %v1294_v61  ;;  %v974_v6 = vadd.f32 %v973_v2, %v813_v63  ;;  %v1297_v20 = vpop.f32.mrb[42].mxu0  ;;  %v1379_v7 = vpop.f32.mrb[42].mxu1 }
 0x14c   : > { %v1030_v8 = vmax.f32 %v982_v0, 0.0  ;;  %v985_v10 = vadd.f32 %v1379_v7, %v824_v3  ;;  %v1298_v11 = vpop.f32.mrb[43].mxu0  ;;  %v976_v14 = vpop.f32.mrb[43].mxu1 }
 0x14d   : > { %1055 = vst [vmem:[%s1681_s8 + $0x98] sm:$0xff] %v1023_v4  ;;  %v797_v25 = vadd.f32 %v1296_v5, %v1672_v50  ;;  %v1028_v15 = vmax.f32 %v974_v6, 0.0  ;;  %v1299_v12 = vadd.f32 %v1298_v11, %v1297_v20  ;;  %v977_v16 = vadd.f32 %v976_v14, %v816_v9 }
 0x14e   : > { %1062 = vst [vmem:[%s1681_s8 + $0xd0] sm:$0xff] %v1030_v8  ;;  %v1031_v17 = vmax.f32 %v985_v10, 0.0 }
 0x14f   : > { %v958_v18 = vadd.f32 %v957_v45, %v797_v25  ;;  %1060 = vst [vmem:[%s1681_s8 + $0xc0] sm:$0xff] %v1028_v15  ;;  %v800_v19 = vadd.f32 %v1299_v12, %v1672_v50  ;;  %v1029_v13 = vmax.f32 %v977_v16, 0.0 }
 0x150   : > { %1063 = vst [vmem:[%s1681_s8 + $0xd8] sm:$0xff] %v1031_v17 }
 0x151   : > { %v1024_v22 = vmax.f32 %v958_v18, 0.0  ;;  %v961_v23 = vadd.f32 %v960_v53, %v800_v19  ;;  %1061 = vst [vmem:[%s1681_s8 + $0xc8] sm:$0xff] %v1029_v13  ;;  %v1300_v24 = vpop.f32.mrb[44].mxu0  ;;  %v1382_v26 = vpop.f32.mrb[44].mxu1 }
 0x152   : > { %v998_v28 = vadd.f32 %v1382_v26, %v837_v21  ;;  %v1301_v29 = vpop.f32.mrb[45].mxu0  ;;  %v989_v30 = vpop.f32.mrb[45].mxu1 }
 0x153   : > { %1056 = vst [vmem:[%s1681_s8 + $0xa0] sm:$0xff] %v1024_v22  ;;  %v1025_v33 = vmax.f32 %v961_v23, 0.0  ;;  %v1302_v34 = vadd.f32 %v1301_v29, %v1300_v24  ;;  %v990_v44 = vadd.f32 %v989_v30, %v829_v27  ;;  %v1303_v35 = vpop.f32.mrb[46].mxu0  ;;  %v1383_v38 = vpop.f32.mrb[46].mxu1 }
 0x154   : > { %v1034_v32 = vmax.f32 %v998_v28, 0.0  ;;  %v1001_v40 = vadd.f32 %v1383_v38, %v840_v31  ;;  %v1304_v41 = vpop.f32.mrb[47].mxu0  ;;  %v992_v36 = vpop.f32.mrb[47].mxu1 }
 0x155   : > { %1057 = vst [vmem:[%s1681_s8 + $0xa8] sm:$0xff] %v1025_v33  ;;  %v805_v49 = vadd.f32 %v1302_v34, %v1672_v50  ;;  %v1032_v43 = vmax.f32 %v990_v44, 0.0  ;;  %v1305_v45 = vadd.f32 %v1304_v41, %v1303_v35  ;;  %v993_v46 = vadd.f32 %v992_v36, %v832_v39 }
 0x156   : > { %1066 = vst [vmem:[%s1681_s8 + $0xf0] sm:$0xff] %v1034_v32  ;;  %v1035_v47 = vmax.f32 %v1001_v40, 0.0 }
 0x157   : > { %v966_v48 = vadd.f32 %v1714_v42, %v805_v49  ;;  %1064 = vst [vmem:[%s1681_s8 + $0xe0] sm:$0xff] %v1032_v43  ;;  %v808_v37 = vadd.f32 %v1305_v45, %v1672_v50  ;;  %v1033_v52 = vmax.f32 %v993_v46, 0.0 }
 0x158   : > { %1067 = vst [vmem:[%s1681_s8 + $0xf8] sm:$0xff] %v1035_v47 }
 0x159   : > { %v1026_v53 = vmax.f32 %v966_v48, 0.0  ;;  %v969_v54 = vadd.f32 %v1717_v51, %v808_v37  ;;  %1065 = vst [vmem:[%s1681_s8 + $0xe8] sm:$0xff] %v1033_v52 }
 0x15b   : > { %1058 = vst [vmem:[%s1681_s8 + $0xb0] sm:$0xff] %v1026_v53  ;;  %v1027_v55 = vmax.f32 %v969_v54, 0.0 }
 0x15d   : > { %1059 = vst [vmem:[%s1681_s8 + $0xb8] sm:$0xff] %v1027_v55 }
 0x15e PF: > { %s13_s12 = sadd.s32 1, %s1497_s12  }
 0x15f   : > { %p10_p4 = scmp.ge.s32.totalorder %s13_s12, 4  }
 0x161   :  { %12 = sbr.rel (!%p10_p4) target bundleno = 1 (0x1), region = 62 }

// kernel: segmented_faster_rcnn_forward.12
= control target key start
LH: loop header
LB: loop body
LE: loop exit
PB: predicated region body
PF: predicated region fallthrough
CT: control target
= control target key end

     0   :  { %s766_s12 = smov 0   ;;  %s898_s0 = inlined_call_operand.vmem [shape: bf16[512,32], index: 0, kind: input, shape index: {}]   ;;  %s899_s1 = inlined_call_operand.vmem [shape: bf16[32,128], index: 1, kind: input, shape index: {}]   ;;  %s900_s2 = inlined_call_operand.vmem [shape: f32[1,128], index: 2, kind: input, shape index: {}]   ;;  %s901_s3 = inlined_call_operand.vmem [shape: f32[512,128], index: 3, kind: output, shape index: {}]  }
   0x1 LB: > { %s608_s13 = sadd.s32 4294967295, %s744_s12   ;;  %p612_p0 = scmp.ge.s32.totalorder %s744_s12, 1  ;;  %s744_s12 = sphi %s766_s12, %s13_s12  }
   0x2   : > { %p138_p1 = scmp.lt.s32.totalorder %s744_s12, 3 }
   0x4   : > { %p139_p2 = pnand %p612_p0, %p138_p1 }
   0x5   : > { %v720_v0 = vld [vmem:[%s899_s1] sm:$0xff] (!%p139_p2)   ;;  %s613_s16 = sshll.u32 (!%p139_p2), %s608_s13, 5  ;;  %v721_v1 = vld [vmem:[%s899_s1 + $0x8] sm:$0xff] (!%p139_p2)   ;;  %vm310_vm0 = vcmask (!%p139_p2), 261120  }
   0x6   : > { %142 = sbr.rel (%p139_p2) target bundleno = 261 (0x105), region = 32  ;;  %p163_p3 = scmp.lt.s32.totalorder (!%p139_p2), %s613_s16, 63  ;;  %672 = vmatprep.subr.bf16.mxu0 (!%p139_p2), %v720_v0  ;;  %708 = vmatprep.subr.bf16.mxu1 (!%p139_p2), %v720_v0  ;;  %v824_v18 = vld [vmem:[%s900_s2] ss:$0 sm:$0xff] (!%p139_p2) }
   0x7   : > { %673 = vmatpush3.bf16.msra.mxu0 (!%p139_p2), %v720_v0  ;;  %710 = vmatpush3.bf16.msra.mxu1 (!%p139_p2), %v720_v0 }
   0x8   : > { %674 = vmatprep.subr.bf16.mxu0 (!%p139_p2), %v721_v1  ;;  %709 = vmatprep.subr.bf16.mxu1 (!%p139_p2), %v721_v1 }
   0xb   : > { %675 = vmatpush3.bf16.msra.mxu0 (!%p139_p2), %v721_v1  ;;  %711 = vmatpush3.bf16.msra.mxu1 (!%p139_p2), %v721_v1 }
   0xd   : > { %s903_s16 = smov (!%p163_p3, %s613_s16), 63 }
   0xe   : > { %s614_s19 = sshll.u32 %s903_s16, 2  ;;  %s616_s23 = sshll.u32 %s903_s16, 3 }
   0xf   : > { %s786_s22 = scalar_lea.vmem %s898_s0, %s614_s19  ;;  %s829_s28 = scalar_lea.vmem %s901_s3, %s616_s23 }
  0x10   : > { %v722_v2 = vld [vmem:[%s786_s22] sm:$0xff]   ;;  %v724_v4 = vld [vmem:[%s786_s22 + $0x8] sm:$0xff]   ;;  %v726_v6 = vld [vmem:[%s786_s22 + $0x10] sm:$0xff]  }
  0x11   : > { %v723_v3 = vld [vmem:[%s786_s22 + $0x40] sm:$0xff]   ;;  %676 = vmatprep.mubr.msk.bf16.mxu0 %vm310_vm0, %v722_v2  ;;  %v725_v5 = vld [vmem:[%s786_s22 + $0x48] sm:$0xff]   ;;  %v727_v7 = vld [vmem:[%s786_s22 + $0x50] sm:$0xff]  }
  0x12   : > { %692 = vmatprep.mubr.msk.bf16.mxu1 %vm310_vm0, %v723_v3  ;;  %677 = vmatmul.mubr.msk.bf16.vlgmr.msra.gmra.mrb[0].mxu0 %vm310_vm0, %v724_v4  ;;  %v728_v8 = vld [vmem:[%s786_s22 + $0x18] sm:$0xff]   ;;  %v730_v10 = vld [vmem:[%s786_s22 + $0x20] sm:$0xff]   ;;  %v732_v12 = vld [vmem:[%s786_s22 + $0x28] sm:$0xff]  }
  0x13   : > { %693 = vmatmul.mubr.msk.bf16.vlgmr.msra.gmra.mrb[0].mxu1 %vm310_vm0, %v725_v5  ;;  %680 = vmatprep.mubr.msk.bf16.mxu0 %vm310_vm0, %v726_v6  ;;  %v729_v9 = vld [vmem:[%s786_s22 + $0x58] sm:$0xff]   ;;  %v731_v11 = vld [vmem:[%s786_s22 + $0x60] sm:$0xff]   ;;  %v733_v13 = vld [vmem:[%s786_s22 + $0x68] sm:$0xff]  }
  0x14   : > { %696 = vmatprep.mubr.msk.bf16.mxu1 %vm310_vm0, %v727_v7  ;;  %v734_v14 = vld [vmem:[%s786_s22 + $0x30] sm:$0xff]   ;;  %v736_v16 = vld [vmem:[%s786_s22 + $0x38] sm:$0xff]  }
  0x15   : > { %v735_v15 = vld [vmem:[%s786_s22 + $0x70] sm:$0xff]   ;;  %v737_v17 = vld [vmem:[%s786_s22 + $0x78] sm:$0xff]  }
  0x1a   : > { %681 = vmatmul.mubr.msk.bf16.gmra.mrb[4].mxu0 %vm310_vm0, %v728_v8 }
  0x1b   : > { %697 = vmatmul.mubr.msk.bf16.gmra.mrb[4].mxu1 %vm310_vm0, %v729_v9  ;;  %684 = vmatprep.mubr.msk.bf16.mxu0 %vm310_vm0, %v730_v10 }
  0x1c   : > { %700 = vmatprep.mubr.msk.bf16.mxu1 %vm310_vm0, %v731_v11 }
  0x22   : > { %685 = vmatmul.mubr.msk.bf16.gmra.mrb[8].mxu0 %vm310_vm0, %v732_v12 }
  0x23   : > { %701 = vmatmul.mubr.msk.bf16.gmra.mrb[8].mxu1 %vm310_vm0, %v733_v13  ;;  %688 = vmatprep.mubr.msk.bf16.mxu0 %vm310_vm0, %v734_v14 }
  0x24   : > { %704 = vmatprep.mubr.msk.bf16.mxu1 %vm310_vm0, %v735_v15 }
  0x2a   : > { %689 = vmatmul.mubr.msk.bf16.gmra.mrb[12].mxu0 %vm310_vm0, %v736_v16 }
  0x2b   : > { %705 = vmatmul.mubr.msk.bf16.gmra.mrb[12].mxu1 %vm310_vm0, %v737_v17 }
  0xe5   : > { %v678_v19 = vpop.f32.mrb[0].mxu0 }
  0xe6   : > { %v402_v20 = vadd.f32 %v678_v19, %v824_v18  ;;  %v694_v21 = vpop.f32.mrb[0].mxu1  ;;  %v393_v22 = vpop.f32.mrb[1].mxu0 }
  0xe7   : > { %v466_v23 = vadd.f32 %v694_v21, %v824_v18  ;;  %v394_v24 = vadd.f32 %v824_v18, %v393_v22  ;;  %v457_v25 = vpop.f32.mrb[1].mxu1  ;;  %v679_v26 = vpop.f32.mrb[2].mxu0 }
  0xe8   : > { %522 = vst [vmem:[%s829_s28 + $0x10] sm:$0xff] %v402_v20  ;;  %v458_v27 = vadd.f32 %v824_v18, %v457_v25  ;;  %v405_v28 = vadd.f32 %v679_v26, %v824_v18  ;;  %v695_v29 = vpop.f32.mrb[2].mxu1  ;;  %v396_v30 = vpop.f32.mrb[3].mxu0 }
  0xe9   : > { %538 = vst [vmem:[%s829_s28 + $0x90] sm:$0xff] %v466_v23  ;;  %520 = vst [vmem:[%s829_s28] sm:$0xff] %v394_v24  ;;  %v469_v31 = vadd.f32 %v695_v29, %v824_v18  ;;  %v397_v32 = vadd.f32 %v824_v18, %v396_v30  ;;  %v460_v33 = vpop.f32.mrb[3].mxu1 }
  0xea   : > { %536 = vst [vmem:[%s829_s28 + $0x80] sm:$0xff] %v458_v27  ;;  %523 = vst [vmem:[%s829_s28 + $0x18] sm:$0xff] %v405_v28  ;;  %v461_v34 = vadd.f32 %v824_v18, %v460_v33 }
  0xeb   : > { %539 = vst [vmem:[%s829_s28 + $0x98] sm:$0xff] %v469_v31  ;;  %521 = vst [vmem:[%s829_s28 + $0x8] sm:$0xff] %v397_v32 }
  0xec   : > { %537 = vst [vmem:[%s829_s28 + $0x88] sm:$0xff] %v461_v34 }
  0xed   : > { %v682_v35 = vpop.f32.mrb[4].mxu0 }
  0xee   : > { %v418_v36 = vadd.f32 %v682_v35, %v824_v18  ;;  %v698_v37 = vpop.f32.mrb[4].mxu1  ;;  %v409_v38 = vpop.f32.mrb[5].mxu0 }
  0xef   : > { %v482_v39 = vadd.f32 %v698_v37, %v824_v18  ;;  %v410_v40 = vadd.f32 %v824_v18, %v409_v38  ;;  %v473_v41 = vpop.f32.mrb[5].mxu1  ;;  %v683_v42 = vpop.f32.mrb[6].mxu0 }
  0xf0   : > { %526 = vst [vmem:[%s829_s28 + $0x30] sm:$0xff] %v418_v36  ;;  %v474_v43 = vadd.f32 %v824_v18, %v473_v41  ;;  %v421_v44 = vadd.f32 %v683_v42, %v824_v18  ;;  %v699_v45 = vpop.f32.mrb[6].mxu1  ;;  %v412_v46 = vpop.f32.mrb[7].mxu0 }
  0xf1   : > { %542 = vst [vmem:[%s829_s28 + $0xb0] sm:$0xff] %v482_v39  ;;  %524 = vst [vmem:[%s829_s28 + $0x20] sm:$0xff] %v410_v40  ;;  %v485_v47 = vadd.f32 %v699_v45, %v824_v18  ;;  %v413_v48 = vadd.f32 %v824_v18, %v412_v46  ;;  %v476_v49 = vpop.f32.mrb[7].mxu1 }
  0xf2   : > { %540 = vst [vmem:[%s829_s28 + $0xa0] sm:$0xff] %v474_v43  ;;  %527 = vst [vmem:[%s829_s28 + $0x38] sm:$0xff] %v421_v44  ;;  %v477_v50 = vadd.f32 %v824_v18, %v476_v49 }
  0xf3   : > { %543 = vst [vmem:[%s829_s28 + $0xb8] sm:$0xff] %v485_v47  ;;  %525 = vst [vmem:[%s829_s28 + $0x28] sm:$0xff] %v413_v48 }
  0xf4   : > { %541 = vst [vmem:[%s829_s28 + $0xa8] sm:$0xff] %v477_v50 }
  0xf5   : > { %v686_v51 = vpop.f32.mrb[8].mxu0 }
  0xf6   : > { %v434_v52 = vadd.f32 %v686_v51, %v824_v18  ;;  %v702_v53 = vpop.f32.mrb[8].mxu1  ;;  %v425_v54 = vpop.f32.mrb[9].mxu0 }
  0xf7   : > { %v498_v55 = vadd.f32 %v702_v53, %v824_v18  ;;  %v426_v56 = vadd.f32 %v824_v18, %v425_v54  ;;  %v489_v57 = vpop.f32.mrb[9].mxu1  ;;  %v687_v58 = vpop.f32.mrb[10].mxu0 }
  0xf8   : > { %530 = vst [vmem:[%s829_s28 + $0x50] sm:$0xff] %v434_v52  ;;  %v490_v59 = vadd.f32 %v824_v18, %v489_v57  ;;  %v437_v60 = vadd.f32 %v687_v58, %v824_v18  ;;  %v703_v61 = vpop.f32.mrb[10].mxu1  ;;  %v428_v62 = vpop.f32.mrb[11].mxu0 }
  0xf9   : > { %546 = vst [vmem:[%s829_s28 + $0xd0] sm:$0xff] %v498_v55  ;;  %528 = vst [vmem:[%s829_s28 + $0x40] sm:$0xff] %v426_v56  ;;  %v501_v63 = vadd.f32 %v703_v61, %v824_v18  ;;  %v429_v0 = vadd.f32 %v824_v18, %v428_v62  ;;  %v492_v1 = vpop.f32.mrb[11].mxu1 }
  0xfa   : > { %544 = vst [vmem:[%s829_s28 + $0xc0] sm:$0xff] %v490_v59  ;;  %531 = vst [vmem:[%s829_s28 + $0x58] sm:$0xff] %v437_v60  ;;  %v493_v2 = vadd.f32 %v824_v18, %v492_v1 }
  0xfb   : > { %547 = vst [vmem:[%s829_s28 + $0xd8] sm:$0xff] %v501_v63  ;;  %529 = vst [vmem:[%s829_s28 + $0x48] sm:$0xff] %v429_v0 }
  0xfc   : > { %545 = vst [vmem:[%s829_s28 + $0xc8] sm:$0xff] %v493_v2 }
  0xfd   : > { %v690_v3 = vpop.f32.mrb[12].mxu0 }
  0xfe   : > { %v450_v4 = vadd.f32 %v690_v3, %v824_v18  ;;  %v706_v5 = vpop.f32.mrb[12].mxu1  ;;  %v441_v6 = vpop.f32.mrb[13].mxu0 }
  0xff   : > { %v514_v7 = vadd.f32 %v706_v5, %v824_v18  ;;  %v442_v8 = vadd.f32 %v824_v18, %v441_v6  ;;  %v505_v9 = vpop.f32.mrb[13].mxu1  ;;  %v691_v10 = vpop.f32.mrb[14].mxu0 }
 0x100   : > { %534 = vst [vmem:[%s829_s28 + $0x70] sm:$0xff] %v450_v4  ;;  %v506_v11 = vadd.f32 %v824_v18, %v505_v9  ;;  %v453_v12 = vadd.f32 %v691_v10, %v824_v18  ;;  %v707_v13 = vpop.f32.mrb[14].mxu1  ;;  %v444_v14 = vpop.f32.mrb[15].mxu0 }
 0x101   : > { %550 = vst [vmem:[%s829_s28 + $0xf0] sm:$0xff] %v514_v7  ;;  %532 = vst [vmem:[%s829_s28 + $0x60] sm:$0xff] %v442_v8  ;;  %v517_v15 = vadd.f32 %v707_v13, %v824_v18  ;;  %v445_v16 = vadd.f32 %v824_v18, %v444_v14  ;;  %v508_v17 = vpop.f32.mrb[15].mxu1 }
 0x102   : > { %548 = vst [vmem:[%s829_s28 + $0xe0] sm:$0xff] %v506_v11  ;;  %535 = vst [vmem:[%s829_s28 + $0x78] sm:$0xff] %v453_v12  ;;  %v509_v19 = vadd.f32 %v824_v18, %v508_v17 }
 0x103   : > { %551 = vst [vmem:[%s829_s28 + $0xf8] sm:$0xff] %v517_v15  ;;  %533 = vst [vmem:[%s829_s28 + $0x68] sm:$0xff] %v445_v16 }
 0x104   : > { %549 = vst [vmem:[%s829_s28 + $0xe8] sm:$0xff] %v509_v19 }
 0x105 PF: > { %s13_s12 = sadd.s32 1, %s744_s12  }
 0x106   : > { %p10_p4 = scmp.ge.s32.totalorder %s13_s12, 4  }
 0x108   :  { %12 = sbr.rel (!%p10_p4) target bundleno = 1 (0x1), region = 62 }

// kernel: neg.18
= control target key start
LH: loop header
LB: loop body
LE: loop exit
PB: predicated region body
PF: predicated region fallthrough
CT: control target
= control target key end

     0   :  { %s24_s0 = inlined_call_operand.vmem [shape: f32[15,1], index: 0, kind: input, shape index: {}]   ;;  %s25_s1 = inlined_call_operand.vmem [shape: f32[15,1], index: 1, kind: output, shape index: {}]  }
   0x1   :  { %v2_v0 = vld [vmem:[%s24_s0] sm:$0x1] }
   0x2   :  { %v5_v1 = vxor.u32 2147483648, %v2_v0 }
   0x4   :  { %7 = vst [vmem:[%s25_s1] sm:$0x1] %v5_v1 }

// kernel: custom-call
= control target key start
LH: loop header
LB: loop body
LE: loop exit
PB: predicated region body
PF: predicated region fallthrough
CT: control target
= control target key end

     0   :  { %5 = vsyncpa [#allocation9], 0  ;;  %v1248_v0 = vmov 2147483648   ;;  %v1249_v1 = vmov 2147483647   ;;  %s1404_s0 = inlined_call_operand.vmem [shape: f32[2,3840], index: 0, kind: input, shape index: {}]   ;;  %s1405_s1 = inlined_call_operand.hbm [shape: f32[2,8], index: 1, kind: output, shape index: {0}]   ;;  %s1406_s2 = inlined_call_operand.vmem [shape: s32[2,8], index: 2, kind: output, shape index: {1}]  }
   0x1   :  { %7 = vst [vmem:[#allocation12] sm:$0xff] %v1248_v0  ;;  %8 = vst [vmem:[#allocation14] sm:$0xff] %v1249_v1 }
   0x2   :  { %v27_v2 = vld [vmem:[%s1404_s0] sm:$0xff]  ;;  %v29_v3 = vld [vmem:[%s1404_s0 + $0x8] sm:$0xff]  ;;  %v55_v4 = vlaneseq  ;;  %v31_v5 = vld [vmem:[%s1404_s0 + $0x10] sm:$0xff]  ;;  %v1250_v7 = vmov 2147483648   ;;  %v1251_v8 = vmov 2147483647  }
   0x3   :  { %v33_v6 = vld [vmem:[%s1404_s0 + $0x18] sm:$0xff]  ;;  %168 = vst [vmem:[#allocation13] sm:$0xff] %v1250_v7  ;;  %169 = vst [vmem:[#allocation15] sm:$0xff] %v1251_v8  ;;  %v35_v9 = vld [vmem:[%s1404_s0 + $0x20] sm:$0xff]  ;;  %vm65_vm0 = vcmp.lt.s32.totalorder %v27_v2, 0  ;;  %vm74_vm1 = vcmp.lt.s32.totalorder %v29_v3, 0 }
   0x4   :  { %v37_v10 = vld [vmem:[%s1404_s0 + $0x28] sm:$0xff]  ;;  %v1184_v11 = vld [vmem:[%s1404_s0 + $0x38] sm:$0xf]  ;;  %v1295_v12 = vshrl.u32 %v55_v4, 7  ;;  %v39_v13 = vld [vmem:[%s1404_s0 + $0x30] sm:$0xff]  ;;  %v56_v14 = vand.u32 127, %v55_v4 }
   0x5   :  { %51 = vst [vmem:[#allocation16 + $0x38] sm:$0xf] %v1184_v11  ;;  %v66_v15 = vsub.s32 2147483647, %v27_v2  ;;  %v75_v17 = vsub.s32 2147483647, %v29_v3 }
   0x6   :  { %v59_v16 = vshrl.u32 %v1295_v12, 1  ;;  %vm83_vm2 = vcmp.lt.s32.totalorder %v31_v5, 0  ;;  %v84_v18 = vsub.s32 2147483647, %v31_v5  ;;  %vm92_vm3 = vcmp.lt.s32.totalorder %v33_v6, 0  ;;  %s1305_s0 = smov 0  }
   0x7   :  { %v93_v19 = vsub.s32 2147483647, %v33_v6  ;;  %vm101_vm4 = vcmp.lt.s32.totalorder %v35_v9, 0  ;;  %v102_v20 = vsub.s32 2147483647, %v35_v9  ;;  %vm110_vm5 = vcmp.lt.s32.totalorder %v37_v10, 0 }
   0x8   :  { %v61_v21 = vmul.u32 128, %v59_v16  ;;  %v111_v22 = vsub.s32 2147483647, %v37_v10  ;;  %vm119_vm6 = vcmp.lt.s32.totalorder %v39_v13, 0  ;;  %v120_v23 = vsub.s32 2147483647, %v39_v13 }
   0x9   :  { %v67_v25 = vsel %vm65_vm0, %v66_v15, %v27_v2  ;;  %v76_v26 = vsel %vm74_vm1, %v75_v17, %v29_v3  ;;  %v85_v27 = vsel %vm83_vm2, %v84_v18, %v31_v5  ;;  %v94_v28 = vsel %vm92_vm3, %v93_v19, %v33_v6 }
   0xa   :  { %v62_v24 = vadd.s32 %v61_v21, %v56_v14  ;;  %v103_v29 = vsel %vm101_vm4, %v102_v20, %v35_v9  ;;  %v112_v30 = vsel %vm110_vm5, %v111_v22, %v37_v10  ;;  %v121_v31 = vsel %vm119_vm6, %v120_v23, %v39_v13 }
   0xc   :  { %vm69_vm7 = vcmp.lt.s32.totalorder %v62_v24, 3840  ;;  %v77_v32 = vadd.s32 512, %v62_v24  ;;  %v86_v33 = vadd.s32 1024, %v62_v24  ;;  %v95_v34 = vadd.s32 1536, %v62_v24  ;;  %v127_v35 = vld [vmem:[#allocation16 + $0x38] sm:$0xff]  ;;  %145 = vst [vmem:[#allocation17] sm:$0xff] %v62_v24 }
   0xd   :  { %v70_v36 = vsel %vm69_vm7, %v67_v25, 2147483648  ;;  %v104_v37 = vadd.s32 2048, %v62_v24  ;;  %v113_v38 = vadd.s32 2560, %v62_v24  ;;  %v122_v39 = vadd.s32 3072, %v62_v24 }
   0xe   :  { %71 = vst [vmem:[#allocation16] sm:$0xff] %v70_v36  ;;  %vm78_vm8 = vcmp.lt.s32.totalorder %v77_v32, 3840  ;;  %vm87_vm9 = vcmp.lt.s32.totalorder %v86_v33, 3840  ;;  %vm96_vm10 = vcmp.lt.s32.totalorder %v95_v34, 3840  ;;  %vm128_vm11 = vcmp.lt.s32.totalorder %v127_v35, 0  ;;  %148 = vst [vmem:[#allocation17 + $0x8] sm:$0xff] %v77_v32 }
   0xf   :  { %151 = vst [vmem:[#allocation17 + $0x10] sm:$0xff] %v86_v33  ;;  %154 = vst [vmem:[#allocation17 + $0x18] sm:$0xff] %v95_v34  ;;  %v79_v40 = vsel %vm78_vm8, %v76_v26, 2147483648  ;;  %v88_v41 = vsel %vm87_vm9, %v85_v27, 2147483648  ;;  %v97_v42 = vsel %vm96_vm10, %v94_v28, 2147483648  ;;  %vm105_vm12 = vcmp.lt.s32.totalorder %v104_v37, 3840 }
  0x10   :  { %157 = vst [vmem:[#allocation17 + $0x20] sm:$0xff] %v104_v37  ;;  %160 = vst [vmem:[#allocation17 + $0x28] sm:$0xff] %v113_v38  ;;  %v106_v43 = vsel %vm105_vm12, %v103_v29, 2147483648  ;;  %vm114_vm13 = vcmp.lt.s32.totalorder %v113_v38, 3840  ;;  %vm123_vm14 = vcmp.lt.s32.totalorder %v122_v39, 3840  ;;  %v131_v47 = vadd.s32 3584, %v62_v24 }
  0x11   :  { %163 = vst [vmem:[#allocation17 + $0x30] sm:$0xff] %v122_v39  ;;  %80 = vst [vmem:[#allocation16 + $0x8] sm:$0xff] %v79_v40  ;;  %v129_v44 = vsub.s32 2147483647, %v127_v35  ;;  %v115_v45 = vsel %vm114_vm13, %v112_v30, 2147483648  ;;  %v124_v46 = vsel %vm123_vm14, %v121_v31, 2147483648 }
  0x12   :  { %89 = vst [vmem:[#allocation16 + $0x10] sm:$0xff] %v88_v41  ;;  %98 = vst [vmem:[#allocation16 + $0x18] sm:$0xff] %v97_v42  ;;  %vm132_vm15 = vcmp.lt.s32.totalorder %v131_v47, 3840 }
  0x13   :  { %107 = vst [vmem:[#allocation16 + $0x20] sm:$0xff] %v106_v43  ;;  %116 = vst [vmem:[#allocation16 + $0x28] sm:$0xff] %v115_v45  ;;  %v130_v48 = vsel %vm128_vm11, %v129_v44, %v127_v35 }
  0x14   :  { %125 = vst [vmem:[#allocation16 + $0x30] sm:$0xff] %v124_v46  ;;  %166 = vst [vmem:[#allocation17 + $0x38] sm:$0xff] %v131_v47  ;;  %v133_v49 = vsel %vm132_vm15, %v130_v48, 2147483648 }
  0x15   :  { %134 = vst [vmem:[#allocation16 + $0x38] sm:$0xff] %v133_v49 }
  0x16 LB: > { %v177_v50 = vld [vmem:[#allocation16] sm:$0xff]  ;;  %v183_v53 = vld [vmem:[#allocation17 + $0x8] sm:$0xff]  ;;  %v196_v55 = vld [vmem:[#allocation17 + $0x10] sm:$0xff]  ;;  %s581_s25 = scalar_lea.vmem [#allocation13], %s1246_s0  ;;  %s583_s26 = scalar_lea.vmem [#allocation15], %s1246_s0  ;;  %s1246_s0 = sphi %s1305_s0, %s176_s0  }
  0x17   : > { %v178_v51 = vld [vmem:[#allocation17] sm:$0xff]  ;;  %v209_v59 = vld [vmem:[#allocation17 + $0x18] sm:$0xff]  ;;  %v235_v3 = vld [vmem:[#allocation17 + $0x28] sm:$0xff]  ;;  %s176_s0 = sadd.s32 1, %s1246_s0  }
  0x18   : > { %v181_v52 = vld [vmem:[#allocation16 + $0x8] sm:$0xff]  ;;  %vm187_vm2 = vcmp.lt.s32.totalorder %v183_v53, %v178_v51  ;;  %v222_v63 = vld [vmem:[#allocation17 + $0x20] sm:$0xff]  ;;  %v248_v8 = vld [vmem:[#allocation17 + $0x30] sm:$0xff]  ;;  %p173_p2 = scmp.ge.s32.totalorder %s176_s0, 8  }
  0x19   : > { %vm185_vm0 = vcmp.gt.s32.totalorder %v181_v52, %v177_v50  ;;  %vm186_vm1 = vcmp.eq.s32.totalorder %v181_v52, %v177_v50  ;;  %v194_v54 = vld [vmem:[#allocation16 + $0x10] sm:$0xff]  ;;  %v207_v58 = vld [vmem:[#allocation16 + $0x18] sm:$0xff]  ;;  %s1257_s0 = smov (%p173_p2), [#allocation8]  }
  0x1a   : > { %vm188_vm3 = vmand %vm186_vm1, %vm187_vm2  ;;  %v220_v62 = vld [vmem:[#allocation16 + $0x20] sm:$0xff]  ;;  %v233_v2 = vld [vmem:[#allocation16 + $0x28] sm:$0xff] }
  0x1b   : > { %vm189_vm4 = vmor %vm185_vm0, %vm188_vm3  ;;  %v246_v7 = vld [vmem:[#allocation16 + $0x30] sm:$0xff]  ;;  %v261_v13 = vld [vmem:[#allocation17 + $0x38] sm:$0xff] }
  0x1c   : > { %v190_v56 = vsel %vm189_vm4, %v181_v52, %v177_v50  ;;  %v191_v57 = vsel %vm189_vm4, %v183_v53, %v178_v51  ;;  %v259_v11 = vld [vmem:[#allocation16 + $0x38] sm:$0xff] }
  0x1d   : > { %vm198_vm5 = vcmp.gt.s32.totalorder %v194_v54, %v190_v56  ;;  %vm199_vm6 = vcmp.eq.s32.totalorder %v194_v54, %v190_v56  ;;  %vm200_vm7 = vcmp.lt.s32.totalorder %v196_v55, %v191_v57 }
  0x1e   : > { %vm201_vm8 = vmand %vm199_vm6, %vm200_vm7 }
  0x1f   : > { %vm202_vm9 = vmor %vm198_vm5, %vm201_vm8 }
  0x20   : > { %v203_v60 = vsel %vm202_vm9, %v194_v54, %v190_v56  ;;  %v204_v61 = vsel %vm202_vm9, %v196_v55, %v191_v57 }
  0x21   : > { %vm211_vm10 = vcmp.gt.s32.totalorder %v207_v58, %v203_v60  ;;  %vm212_vm11 = vcmp.eq.s32.totalorder %v207_v58, %v203_v60  ;;  %vm213_vm12 = vcmp.lt.s32.totalorder %v209_v59, %v204_v61 }
  0x22   : > { %vm214_vm13 = vmand %vm212_vm11, %vm213_vm12 }
  0x23   : > { %vm215_vm14 = vmor %vm211_vm10, %vm214_vm13 }
  0x24   : > { %v216_v0 = vsel %vm215_vm14, %v207_v58, %v203_v60  ;;  %v217_v1 = vsel %vm215_vm14, %v209_v59, %v204_v61 }
  0x25   : > { %vm224_vm15 = vcmp.gt.s32.totalorder %v220_v62, %v216_v0  ;;  %vm225_vm0 = vcmp.eq.s32.totalorder %v220_v62, %v216_v0  ;;  %vm226_vm1 = vcmp.lt.s32.totalorder %v222_v63, %v217_v1 }
  0x26   : > { %vm227_vm2 = vmand %vm225_vm0, %vm226_vm1 }
  0x27   : > { %vm228_vm3 = vmor %vm224_vm15, %vm227_vm2 }
  0x28   : > { %v229_v5 = vsel %vm228_vm3, %v220_v62, %v216_v0  ;;  %v230_v6 = vsel %vm228_vm3, %v222_v63, %v217_v1 }
  0x29   : > { %vm237_vm4 = vcmp.gt.s32.totalorder %v233_v2, %v229_v5  ;;  %vm238_vm5 = vcmp.eq.s32.totalorder %v233_v2, %v229_v5  ;;  %vm239_vm6 = vcmp.lt.s32.totalorder %v235_v3, %v230_v6 }
  0x2a   : > { %vm240_vm7 = vmand %vm238_vm5, %vm239_vm6 }
  0x2b   : > { %vm241_vm8 = vmor %vm237_vm4, %vm240_vm7 }
  0x2c   : > { %v242_v9 = vsel %vm241_vm8, %v233_v2, %v229_v5  ;;  %v243_v10 = vsel %vm241_vm8, %v235_v3, %v230_v6 }
  0x2d   : > { %vm250_vm9 = vcmp.gt.s32.totalorder %v246_v7, %v242_v9  ;;  %vm251_vm10 = vcmp.eq.s32.totalorder %v246_v7, %v242_v9  ;;  %vm252_vm11 = vcmp.lt.s32.totalorder %v248_v8, %v243_v10 }
  0x2e   : > { %vm253_vm12 = vmand %vm251_vm10, %vm252_vm11 }
  0x2f   : > { %vm254_vm13 = vmor %vm250_vm9, %vm253_vm12 }
  0x30   : > { %v255_v14 = vsel %vm254_vm13, %v246_v7, %v242_v9  ;;  %v256_v15 = vsel %vm254_vm13, %v248_v8, %v243_v10 }
  0x31   : > { %vm263_vm14 = vcmp.gt.s32.totalorder %v259_v11, %v255_v14  ;;  %vm264_vm15 = vcmp.eq.s32.totalorder %v259_v11, %v255_v14  ;;  %vm265_vm0 = vcmp.lt.s32.totalorder %v261_v13, %v256_v15 }
  0x32   : > { %vm266_vm1 = vmand %vm264_vm15, %vm265_vm0 }
  0x33   : > { %vm267_vm2 = vmor %vm263_vm14, %vm266_vm1 }
  0x34   : > { %v268_v16 = vsel %vm267_vm2, %v259_v11, %v255_v14  ;;  %v269_v17 = vsel %vm267_vm2, %v261_v13, %v256_v15 }
  0x35   : > { %v271_v18 = vrot.slane %v268_v16, 2  ;;  %v272_v19 = vrot.slane %v269_v17, 2 }
  0x37   : > { %vm274_vm3 = vcmp.gt.s32.totalorder %v271_v18, %v268_v16  ;;  %vm275_vm4 = vcmp.eq.s32.totalorder %v271_v18, %v268_v16  ;;  %vm276_vm5 = vcmp.lt.s32.totalorder %v272_v19, %v269_v17 }
  0x38   : > { %vm277_vm6 = vmand %vm275_vm4, %vm276_vm5 }
  0x39   : > { %vm278_vm7 = vmor %vm274_vm3, %vm277_vm6 }
  0x3a   : > { %v279_v20 = vsel %vm278_vm7, %v271_v18, %v268_v16  ;;  %v280_v21 = vsel %vm278_vm7, %v272_v19, %v269_v17 }
  0x3b   : > { %v282_v22 = vrot.slane %v279_v20, 2  ;;  %v283_v23 = vrot.slane %v280_v21, 2 }
  0x3d   : > { %vm285_vm8 = vcmp.gt.s32.totalorder %v282_v22, %v279_v20  ;;  %vm286_vm9 = vcmp.eq.s32.totalorder %v282_v22, %v279_v20  ;;  %vm287_vm10 = vcmp.lt.s32.totalorder %v283_v23, %v280_v21 }
  0x3e   : > { %vm288_vm11 = vmand %vm286_vm9, %vm287_vm10 }
  0x3f   : > { %vm289_vm12 = vmor %vm285_vm8, %vm288_vm11 }
  0x40   : > { %v290_v24 = vsel %vm289_vm12, %v282_v22, %v279_v20  ;;  %v291_v25 = vsel %vm289_vm12, %v283_v23, %v280_v21 }
  0x41   : > { %v293_v26 = vrot.slane %v290_v24, 2  ;;  %v294_v27 = vrot.slane %v291_v25, 2 }
  0x43   : > { %vm296_vm13 = vcmp.gt.s32.totalorder %v293_v26, %v290_v24  ;;  %vm297_vm14 = vcmp.eq.s32.totalorder %v293_v26, %v290_v24  ;;  %vm298_vm15 = vcmp.lt.s32.totalorder %v294_v27, %v291_v25 }
  0x44   : > { %vm299_vm0 = vmand %vm297_vm14, %vm298_vm15 }
  0x45   : > { %vm300_vm1 = vmor %vm296_vm13, %vm299_vm0 }
  0x46   : > { %v302_v28 = vsel %vm300_vm1, %v294_v27, %v291_v25  ;;  %v301_v29 = vsel %vm300_vm1, %v293_v26, %v290_v24 }
  0x47   : > { %336 = vxpose.xlu1.b32.start [1/16] %v302_v28, 128  ;;  %304 = vxpose.xlu0.b32.start [1/16] %v301_v29, 128 }
  0x4b   : > { %337 = vxpose.xlu1.b32.cont [2/16] %v302_v28, 128  ;;  %305 = vxpose.xlu0.b32.cont [2/16] %v301_v29, 128 }
  0x4f   : > { %338 = vxpose.xlu1.b32.cont [3/16] %v302_v28, 128  ;;  %306 = vxpose.xlu0.b32.cont [3/16] %v301_v29, 128 }
  0x53   : > { %339 = vxpose.xlu1.b32.cont [4/16] %v302_v28, 128  ;;  %307 = vxpose.xlu0.b32.cont [4/16] %v301_v29, 128 }
  0x57   : > { %340 = vxpose.xlu1.b32.cont [5/16] %v302_v28, 128  ;;  %308 = vxpose.xlu0.b32.cont [5/16] %v301_v29, 128 }
  0x5b   : > { %341 = vxpose.xlu1.b32.cont [6/16] %v302_v28, 128  ;;  %309 = vxpose.xlu0.b32.cont [6/16] %v301_v29, 128 }
  0x5f   : > { %342 = vxpose.xlu1.b32.cont [7/16] %v302_v28, 128  ;;  %310 = vxpose.xlu0.b32.cont [7/16] %v301_v29, 128 }
  0x63   : > { %343 = vxpose.xlu1.b32.cont [8/16] %v302_v28, 128  ;;  %311 = vxpose.xlu0.b32.cont [8/16] %v301_v29, 128 }
  0x67   : > { %344 = vxpose.xlu1.b32.cont [9/16] %v302_v28, 128  ;;  %312 = vxpose.xlu0.b32.cont [9/16] %v301_v29, 128 }
  0x6b   : > { %345 = vxpose.xlu1.b32.cont [10/16] %v302_v28, 128  ;;  %313 = vxpose.xlu0.b32.cont [10/16] %v301_v29, 128 }
  0x6f   : > { %346 = vxpose.xlu1.b32.cont [11/16] %v302_v28, 128  ;;  %314 = vxpose.xlu0.b32.cont [11/16] %v301_v29, 128 }
  0x73   : > { %347 = vxpose.xlu1.b32.cont [12/16] %v302_v28, 128  ;;  %315 = vxpose.xlu0.b32.cont [12/16] %v301_v29, 128 }
  0x77   : > { %348 = vxpose.xlu1.b32.cont [13/16] %v302_v28, 128  ;;  %316 = vxpose.xlu0.b32.cont [13/16] %v301_v29, 128 }
  0x7b   : > { %349 = vxpose.xlu1.b32.cont [14/16] %v302_v28, 128  ;;  %317 = vxpose.xlu0.b32.cont [14/16] %v301_v29, 128 }
  0x7f   : > { %350 = vxpose.xlu1.b32.cont [15/16] %v302_v28, 128  ;;  %318 = vxpose.xlu0.b32.cont [15/16] %v301_v29, 128 }
  0x83   : > { %351 = vxpose.xlu1.b32.end [16/16] %v302_v28, 128  ;;  %319 = vxpose.xlu0.b32.end [16/16] %v301_v29, 128 }
  0xc7   : > { %v352_v30 = vpop.trf.xlu1  ;;  %v320_v31 = vpop.trf.xlu0 }
  0xcb   : > { %v353_v32 = vpop.trf.xlu1  ;;  %v321_v33 = vpop.trf.xlu0 }
  0xcc   : > { %vm372_vm2 = vcmp.lt.s32.totalorder %v353_v32, %v352_v30  ;;  %vm370_vm3 = vcmp.gt.s32.totalorder %v321_v33, %v320_v31  ;;  %vm371_vm4 = vcmp.eq.s32.totalorder %v321_v33, %v320_v31 }
  0xcd   : > { %vm373_vm5 = vmand %vm371_vm4, %vm372_vm2 }
  0xce   : > { %vm374_vm6 = vmor %vm370_vm3, %vm373_vm5 }
  0xcf   : > { %v375_v34 = vsel %vm374_vm6, %v321_v33, %v320_v31  ;;  %v354_v35 = vpop.trf.xlu1  ;;  %v376_v36 = vsel %vm374_vm6, %v353_v32, %v352_v30  ;;  %v322_v37 = vpop.trf.xlu0 }
  0xd0   : > { %vm381_vm7 = vcmp.lt.s32.totalorder %v354_v35, %v376_v36  ;;  %vm379_vm8 = vcmp.gt.s32.totalorder %v322_v37, %v375_v34  ;;  %vm380_vm9 = vcmp.eq.s32.totalorder %v322_v37, %v375_v34 }
  0xd1   : > { %vm382_vm10 = vmand %vm380_vm9, %vm381_vm7 }
  0xd2   : > { %vm383_vm11 = vmor %vm379_vm8, %vm382_vm10 }
  0xd3   : > { %v384_v38 = vsel %vm383_vm11, %v322_v37, %v375_v34  ;;  %v355_v39 = vpop.trf.xlu1  ;;  %v385_v40 = vsel %vm383_vm11, %v354_v35, %v376_v36  ;;  %v323_v41 = vpop.trf.xlu0 }
  0xd4   : > { %vm390_vm12 = vcmp.lt.s32.totalorder %v355_v39, %v385_v40  ;;  %vm388_vm13 = vcmp.gt.s32.totalorder %v323_v41, %v384_v38  ;;  %vm389_vm14 = vcmp.eq.s32.totalorder %v323_v41, %v384_v38 }
  0xd5   : > { %vm391_vm15 = vmand %vm389_vm14, %vm390_vm12 }
  0xd6   : > { %vm392_vm0 = vmor %vm388_vm13, %vm391_vm15 }
  0xd7   : > { %v393_v42 = vsel %vm392_vm0, %v323_v41, %v384_v38  ;;  %v356_v43 = vpop.trf.xlu1  ;;  %v394_v44 = vsel %vm392_vm0, %v355_v39, %v385_v40  ;;  %v324_v45 = vpop.trf.xlu0 }
  0xd8   : > { %vm399_vm1 = vcmp.lt.s32.totalorder %v356_v43, %v394_v44  ;;  %vm397_vm2 = vcmp.gt.s32.totalorder %v324_v45, %v393_v42  ;;  %vm398_vm3 = vcmp.eq.s32.totalorder %v324_v45, %v393_v42 }
  0xd9   : > { %vm400_vm4 = vmand %vm398_vm3, %vm399_vm1 }
  0xda   : > { %vm401_vm5 = vmor %vm397_vm2, %vm400_vm4 }
  0xdb   : > { %v402_v46 = vsel %vm401_vm5, %v324_v45, %v393_v42  ;;  %v357_v47 = vpop.trf.xlu1  ;;  %v403_v48 = vsel %vm401_vm5, %v356_v43, %v394_v44  ;;  %v325_v49 = vpop.trf.xlu0 }
  0xdc   : > { %vm408_vm6 = vcmp.lt.s32.totalorder %v357_v47, %v403_v48  ;;  %vm406_vm7 = vcmp.gt.s32.totalorder %v325_v49, %v402_v46  ;;  %vm407_vm8 = vcmp.eq.s32.totalorder %v325_v49, %v402_v46 }
  0xdd   : > { %vm409_vm9 = vmand %vm407_vm8, %vm408_vm6 }
  0xde   : > { %vm410_vm10 = vmor %vm406_vm7, %vm409_vm9 }
  0xdf   : > { %v411_v50 = vsel %vm410_vm10, %v325_v49, %v402_v46  ;;  %v358_v51 = vpop.trf.xlu1  ;;  %v412_v52 = vsel %vm410_vm10, %v357_v47, %v403_v48  ;;  %v326_v53 = vpop.trf.xlu0 }
  0xe0   : > { %vm417_vm11 = vcmp.lt.s32.totalorder %v358_v51, %v412_v52  ;;  %vm415_vm12 = vcmp.gt.s32.totalorder %v326_v53, %v411_v50  ;;  %vm416_vm13 = vcmp.eq.s32.totalorder %v326_v53, %v411_v50 }
  0xe1   : > { %vm418_vm14 = vmand %vm416_vm13, %vm417_vm11 }
  0xe2   : > { %vm419_vm15 = vmor %vm415_vm12, %vm418_vm14 }
  0xe3   : > { %v420_v54 = vsel %vm419_vm15, %v326_v53, %v411_v50  ;;  %v359_v55 = vpop.trf.xlu1  ;;  %v421_v56 = vsel %vm419_vm15, %v358_v51, %v412_v52  ;;  %v327_v57 = vpop.trf.xlu0 }
  0xe4   : > { %vm426_vm0 = vcmp.lt.s32.totalorder %v359_v55, %v421_v56  ;;  %vm424_vm1 = vcmp.gt.s32.totalorder %v327_v57, %v420_v54  ;;  %vm425_vm2 = vcmp.eq.s32.totalorder %v327_v57, %v420_v54 }
  0xe5   : > { %vm427_vm3 = vmand %vm425_vm2, %vm426_vm0 }
  0xe6   : > { %vm428_vm4 = vmor %vm424_vm1, %vm427_vm3 }
  0xe7   : > { %v429_v58 = vsel %vm428_vm4, %v327_v57, %v420_v54  ;;  %v360_v59 = vpop.trf.xlu1  ;;  %v430_v60 = vsel %vm428_vm4, %v359_v55, %v421_v56  ;;  %v328_v61 = vpop.trf.xlu0 }
  0xe8   : > { %vm435_vm5 = vcmp.lt.s32.totalorder %v360_v59, %v430_v60  ;;  %vm433_vm6 = vcmp.gt.s32.totalorder %v328_v61, %v429_v58  ;;  %vm434_vm7 = vcmp.eq.s32.totalorder %v328_v61, %v429_v58 }
  0xe9   : > { %vm436_vm8 = vmand %vm434_vm7, %vm435_vm5 }
  0xea   : > { %vm437_vm9 = vmor %vm433_vm6, %vm436_vm8 }
  0xeb   : > { %v438_v62 = vsel %vm437_vm9, %v328_v61, %v429_v58  ;;  %v361_v63 = vpop.trf.xlu1  ;;  %v439_v0 = vsel %vm437_vm9, %v360_v59, %v430_v60  ;;  %v329_v1 = vpop.trf.xlu0  ;;  %v1252_v61 = vmov 2147483648  }
  0xec   : > { %vm444_vm10 = vcmp.lt.s32.totalorder %v361_v63, %v439_v0  ;;  %vm442_vm11 = vcmp.gt.s32.totalorder %v329_v1, %v438_v62  ;;  %vm443_vm12 = vcmp.eq.s32.totalorder %v329_v1, %v438_v62 }
  0xed   : > { %vm445_vm13 = vmand %vm443_vm12, %vm444_vm10 }
  0xee   : > { %vm446_vm14 = vmor %vm442_vm11, %vm445_vm13 }
  0xef   : > { %v447_v2 = vsel %vm446_vm14, %v329_v1, %v438_v62  ;;  %v362_v3 = vpop.trf.xlu1  ;;  %v448_v5 = vsel %vm446_vm14, %v361_v63, %v439_v0  ;;  %v330_v6 = vpop.trf.xlu0  ;;  %v1253_v62 = vmov 2147483647  }
  0xf0   : > { %vm453_vm15 = vcmp.lt.s32.totalorder %v362_v3, %v448_v5  ;;  %vm451_vm0 = vcmp.gt.s32.totalorder %v330_v6, %v447_v2  ;;  %vm452_vm1 = vcmp.eq.s32.totalorder %v330_v6, %v447_v2 }
  0xf1   : > { %vm454_vm2 = vmand %vm452_vm1, %vm453_vm15 }
  0xf2   : > { %vm455_vm3 = vmor %vm451_vm0, %vm454_vm2 }
  0xf3   : > { %v456_v7 = vsel %vm455_vm3, %v330_v6, %v447_v2  ;;  %v363_v8 = vpop.trf.xlu1  ;;  %v457_v9 = vsel %vm455_vm3, %v362_v3, %v448_v5  ;;  %v331_v10 = vpop.trf.xlu0  ;;  %v679_v3 = vld [vmem:[#allocation12] sm:$0xff] (%p173_p2)  ;;  %v680_v5 = vld [vmem:[#allocation14] sm:$0xff] (%p173_p2)  ;;  %v1254_v6 = vmov (%p173_p2), 839939668  }
  0xf4   : > { %vm462_vm4 = vcmp.lt.s32.totalorder %v363_v8, %v457_v9  ;;  %vm460_vm5 = vcmp.gt.s32.totalorder %v331_v10, %v456_v7  ;;  %vm461_vm6 = vcmp.eq.s32.totalorder %v331_v10, %v456_v7 }
  0xf5   : > { %vm463_vm7 = vmand %vm461_vm6, %vm462_vm4 }
  0xf6   : > { %vm464_vm8 = vmor %vm460_vm5, %vm463_vm7 }
  0xf7   : > { %v465_v11 = vsel %vm464_vm8, %v331_v10, %v456_v7  ;;  %v364_v13 = vpop.trf.xlu1  ;;  %v466_v14 = vsel %vm464_vm8, %v363_v8, %v457_v9  ;;  %v332_v15 = vpop.trf.xlu0  ;;  %v704_v7 = vunpack.c.l.s4 (%p173_p2), %v1254_v6  ;;  %v1255_v8 = vmov (%p173_p2), 1417023538  }
  0xf8   : > { %vm471_vm9 = vcmp.lt.s32.totalorder %v364_v13, %v466_v14  ;;  %vm469_vm10 = vcmp.gt.s32.totalorder %v332_v15, %v465_v11  ;;  %vm470_vm11 = vcmp.eq.s32.totalorder %v332_v15, %v465_v11  ;;  %v732_v9 = vunpack.c.l.s4 (%p173_p2), %v1255_v8 }
  0xf9   : > { %vm472_vm12 = vmand %vm470_vm11, %vm471_vm9  ;;  %v705_v10 = vunpack.c.0.s8 (%p173_p2), %v704_v7 }
  0xfa   : > { %vm473_vm13 = vmor %vm469_vm10, %vm472_vm12 }
  0xfb   : > { %v474_v16 = vsel %vm473_vm13, %v332_v15, %v465_v11  ;;  %v365_v17 = vpop.trf.xlu1  ;;  %v475_v18 = vsel %vm473_vm13, %v364_v13, %v466_v14  ;;  %v333_v19 = vpop.trf.xlu0  ;;  %v725_v15 = vand.u32 (%p173_p2), 4, %v1295_v12 }
  0xfc   : > { %vm480_vm14 = vcmp.lt.s32.totalorder %v365_v17, %v475_v18  ;;  %vm478_vm15 = vcmp.gt.s32.totalorder %v333_v19, %v474_v16  ;;  %vm479_vm0 = vcmp.eq.s32.totalorder %v333_v19, %v474_v16 }
  0xfd   : > { %vm481_vm1 = vmand %vm479_vm0, %vm480_vm14 }
  0xfe   : > { %vm482_vm2 = vmor %vm478_vm15, %vm481_vm1 }
  0xff   : > { %v483_v20 = vsel %vm482_vm2, %v333_v19, %v474_v16  ;;  %v366_v21 = vpop.trf.xlu1  ;;  %v484_v22 = vsel %vm482_vm2, %v365_v17, %v475_v18  ;;  %v334_v23 = vpop.trf.xlu0  ;;  %v733_v17 = vunpack.c.0.s8 (%p173_p2), %v732_v9 }
 0x100   : > { %vm489_vm3 = vcmp.lt.s32.totalorder %v366_v21, %v484_v22  ;;  %vm487_vm4 = vcmp.gt.s32.totalorder %v334_v23, %v483_v20  ;;  %vm488_vm5 = vcmp.eq.s32.totalorder %v334_v23, %v483_v20 }
 0x101   : > { %vm490_vm6 = vmand %vm488_vm5, %vm489_vm3 }
 0x102   : > { %vm491_vm7 = vmor %vm487_vm4, %vm490_vm6 }
 0x103   : > { %v492_v24 = vsel %vm491_vm7, %v334_v23, %v483_v20  ;;  %v367_v25 = vpop.trf.xlu1  ;;  %v493_v26 = vsel %vm491_vm7, %v366_v21, %v484_v22  ;;  %v335_v27 = vpop.trf.xlu0  ;;  %v1256_v23 = vmov (%p173_p2), 1732584193  }
 0x104   : > { %vm498_vm8 = vcmp.lt.s32.totalorder %v367_v25, %v493_v26  ;;  %vm496_vm9 = vcmp.gt.s32.totalorder %v335_v27, %v492_v24  ;;  %vm497_vm10 = vcmp.eq.s32.totalorder %v335_v27, %v492_v24 }
 0x105   : > { %vm499_vm11 = vmand %vm497_vm10, %vm498_vm8 }
 0x106   : > { %vm500_vm12 = vmor %vm496_vm9, %vm499_vm11 }
 0x107   : > { %v501_v28 = vsel %vm500_vm12, %v335_v27, %v492_v24  ;;  %v502_v29 = vsel %vm500_vm12, %v367_v25, %v493_v26  ;;  %v760_v24 = vunpack.c.l.s4 (%p173_p2), %v1256_v23  ;;  %v1330_v25 = vsub.s32 (%p173_p2), %v733_v17, %v1295_v12 }
 0x108   : > { %v504_v30 = vrot.slane %v501_v28, 1  ;;  %v505_v31 = vrot.slane %v502_v29, 1  ;;  %v753_v26 = vand.u32 (%p173_p2), 2, %v1295_v12 }
 0x10a   : > { %vm507_vm13 = vcmp.gt.s32.totalorder %v504_v30, %v501_v28  ;;  %vm508_vm14 = vcmp.eq.s32.totalorder %v504_v30, %v501_v28  ;;  %vm509_vm15 = vcmp.lt.s32.totalorder %v505_v31, %v502_v29 }
 0x10b   : > { %vm510_vm0 = vmand %vm508_vm14, %vm509_vm15 }
 0x10c   : > { %vm511_vm1 = vmor %vm507_vm13, %vm510_vm0 }
 0x10d   : > { %v512_v32 = vsel %vm511_vm1, %v504_v30, %v501_v28  ;;  %v513_v33 = vsel %vm511_vm1, %v505_v31, %v502_v29  ;;  %v761_v29 = vunpack.c.0.s8 (%p173_p2), %v760_v24 }
 0x10e   : > { %v515_v34 = vrot.slane %v512_v32, 1  ;;  %v516_v35 = vrot.slane %v513_v33, 1 }
 0x110   : > { %vm518_vm2 = vcmp.gt.s32.totalorder %v515_v34, %v512_v32  ;;  %vm519_vm3 = vcmp.eq.s32.totalorder %v515_v34, %v512_v32  ;;  %vm520_vm4 = vcmp.lt.s32.totalorder %v516_v35, %v513_v33 }
 0x111   : > { %vm521_vm5 = vmand %vm519_vm3, %vm520_vm4 }
 0x112   : > { %vm522_vm6 = vmor %vm518_vm2, %vm521_vm5 }
 0x113   : > { %v523_v36 = vsel %vm522_vm6, %v515_v34, %v512_v32  ;;  %v524_v37 = vsel %vm522_vm6, %v516_v35, %v513_v33  ;;  %v1344_v34 = vsub.s32 (%p173_p2), %v761_v29, %v1295_v12 }
 0x114   : > { %v526_v38 = vrot.slane %v523_v36, 1  ;;  %v527_v39 = vrot.slane %v524_v37, 1 }
 0x116   : > { %vm531_vm7 = vcmp.lt.s32.totalorder %v527_v39, %v524_v37  ;;  %vm529_vm8 = vcmp.gt.s32.totalorder %v526_v38, %v523_v36  ;;  %vm530_vm9 = vcmp.eq.s32.totalorder %v526_v38, %v523_v36 }
 0x117   : > { %vm532_vm10 = vmand %vm530_vm9, %vm531_vm7 }
 0x118   : > { %vm533_vm11 = vmor %vm529_vm8, %vm532_vm10 }
 0x119   : > { %v534_v40 = vsel %vm533_vm11, %v526_v38, %v523_v36  ;;  %v535_v41 = vsel %vm533_vm11, %v527_v39, %v524_v37  ;;  %v781_v38 = vand.u32 (%p173_p2), 1, %v1295_v12 }
 0x11a   : > { %v537_v42 = vrot.slane %v534_v40, 1  ;;  %v538_v43 = vrot.slane %v535_v41, 1 }
 0x11c   : > { %vm540_vm12 = vcmp.gt.s32.totalorder %v537_v42, %v534_v40  ;;  %vm541_vm13 = vcmp.eq.s32.totalorder %v537_v42, %v534_v40  ;;  %vm542_vm14 = vcmp.lt.s32.totalorder %v538_v43, %v535_v41 }
 0x11d   : > { %vm543_vm15 = vmand %vm541_vm13, %vm542_vm14 }
 0x11e   : > { %vm544_vm0 = vmor %vm540_vm12, %vm543_vm15 }
 0x11f   : > { %v545_v44 = vsel %vm544_vm0, %v537_v42, %v534_v40  ;;  %v546_v45 = vsel %vm544_vm0, %v538_v43, %v535_v41 }
 0x120   : > { %v548_v46 = vrot.slane %v545_v44, 1  ;;  %v549_v47 = vrot.slane %v546_v45, 1 }
 0x122   : > { %vm551_vm1 = vcmp.gt.s32.totalorder %v548_v46, %v545_v44  ;;  %vm552_vm2 = vcmp.eq.s32.totalorder %v548_v46, %v545_v44  ;;  %vm553_vm3 = vcmp.lt.s32.totalorder %v549_v47, %v546_v45 }
 0x123   : > { %vm554_vm4 = vmand %vm552_vm2, %vm553_vm3 }
 0x124   : > { %vm555_vm5 = vmor %vm551_vm1, %vm554_vm4 }
 0x125   : > { %v556_v48 = vsel %vm555_vm5, %v548_v46, %v545_v44  ;;  %v557_v49 = vsel %vm555_vm5, %v549_v47, %v546_v45 }
 0x126   : > { %v559_v50 = vrot.slane %v556_v48, 1  ;;  %v560_v51 = vrot.slane %v557_v49, 1 }
 0x128   : > { %vm562_vm6 = vcmp.gt.s32.totalorder %v559_v50, %v556_v48  ;;  %vm563_vm7 = vcmp.eq.s32.totalorder %v559_v50, %v556_v48  ;;  %vm564_vm8 = vcmp.lt.s32.totalorder %v560_v51, %v557_v49 }
 0x129   : > { %vm565_vm9 = vmand %vm563_vm7, %vm564_vm8  ;;  %vm1324_vm7 = vcmp.ne.s32.totalorder (%p173_p2), %v725_v15, 0 }
 0x12a   : > { %vm566_vm10 = vmor %vm562_vm6, %vm565_vm9 }
 0x12b   : > { %v567_v52 = vsel %vm566_vm10, %v559_v50, %v556_v48  ;;  %v568_v53 = vsel %vm566_vm10, %v560_v51, %v557_v49 }
 0x12c   : > { %v570_v54 = vrot.slane %v567_v52, 1  ;;  %v571_v55 = vrot.slane %v568_v53, 1 }
 0x12e   : > { %vm573_vm11 = vcmp.gt.s32.totalorder %v570_v54, %v567_v52  ;;  %vm574_vm12 = vcmp.eq.s32.totalorder %v570_v54, %v567_v52  ;;  %vm575_vm13 = vcmp.lt.s32.totalorder %v571_v55, %v568_v53 }
 0x12f   : > { %vm576_vm14 = vmand %vm574_vm12, %vm575_vm13 }
 0x130   : > { %vm577_vm15 = vmor %vm573_vm11, %vm576_vm14 }
 0x131   : > { %v579_v56 = vsel %vm577_vm15, %v571_v55, %v568_v53  ;;  %v578_v57 = vsel %vm577_vm15, %v570_v54, %v567_v52 }
 0x132   : > { %586 = vxpose.xlu0.b32.start.end [1/1] (short) (narrow) %v579_v56, 8  ;;  %582 = vst [vmem:[%s581_s25] sm:$0x1] %v578_v57  ;;  %584 = vst [vmem:[%s583_s26] sm:$0x1] %v579_v56  ;;  %s1120_s25 = sshll.u32 (%p173_p2), %s1257_s0, 4  ;;  %s1121_s25 = int_to_ptr.vmem [resolvable:$true] %s1120_s25 }
 0x133   :  { %s1216_s26 = scalar_lea.vmem (%p173_p2), %s1121_s25, 32  ;;  %p1221_p4 = scmp.lt.s32.totalorder (%p173_p2), %s1121_s25, %s1121_s25 }
 0x134   :  { %p1217_p3 = scmp.ne.s32.totalorder (%p173_p2), %s1121_s25, %s1216_s26  ;;  %p1222_p5 = scmp.lt.s32.totalorder (%p173_p2), %s1216_s26, %s1216_s26 }
 0x136   :  { %p1223_p6 = por (%p173_p2), %p1222_p5, %p1221_p4 }
 0x138   :  { %p1224_p7 = pnand (%p173_p2), %p1223_p6, %p1217_p3 }
 0x139   :  { %v667_v1 = vld [vmem:[#allocation13 + $0x7] ss:$-1 sm:$0xff] (%p173_p2)  ;;  %v673_v2 = vld [vmem:[#allocation15 + $0x7] ss:$-1 sm:$0xff] (%p173_p2) }
 0x13a   :  { %vm685_vm2 = vcmp.gt.s32.totalorder (%p173_p2), %v679_v3, %v667_v1  ;;  %vm686_vm3 = vcmp.eq.s32.totalorder (%p173_p2), %v679_v3, %v667_v1  ;;  %vm687_vm4 = vcmp.lt.s32.totalorder (%p173_p2), %v680_v5, %v673_v2 }
 0x13b   :  { %vm688_vm5 = vmand (%p173_p2), %vm686_vm3, %vm687_vm4  ;;  %vm1337_vm3 = vcmp.ne.s32.totalorder (%p173_p2), %v753_v26, 0 }
 0x13c   :  { %vm689_vm6 = vmor (%p173_p2), %vm685_vm2, %vm688_vm5 }
 0x13d   :  { %v690_v11 = vsel (%p173_p2), %vm689_vm6, %v679_v3, %v667_v1  ;;  %v692_v13 = vsel (%p173_p2), %vm689_vm6, %v667_v1, %v679_v3  ;;  %v694_v14 = vsel (%p173_p2), %vm689_vm6, %v680_v5, %v673_v2  ;;  %v696_v16 = vsel (%p173_p2), %vm689_vm6, %v673_v2, %v680_v5 }
 0x1b2   : > { %v602_v58 = vpop.trf.xlu0 }
 0x1b3   : > { %v641_v59 = vrot.slane %v602_v58, 1  ;;  %1193 = vpush %v602_v58 }
 0x1b5   : > { %1195 = vpush %v641_v59 }
 0x1e4   : > { %s1194_s27 = spop %1193 }
 0x1e5   : > { %s619_s28 = sshrl.u32 %s1194_s27, 9  ;;  %s621_s29 = ssub.s32 0, %s1194_s27 }
 0x1e6   : > { %p620_p0 = scmp.lt.s32.totalorder %s1194_s27, 0  ;;  %s1185_s30 = smin.u32 %s1194_s27, %s621_s29 }
 0x1e7   : > { %s623_s3 = sand.u32 511, %s1185_s30   ;;  %s1187_s4 = sshll.u32 %s619_s28, 3 }
 0x1e8   : > { %s624_s5 = ssub.s32 0, %s623_s3  ;;  %s1196_s6 = spop %1195 }
 0x1e9   : > { %s1414_s5 = smov (!%p620_p0, %s624_s5), %s623_s3  ;;  %s645_s10 = ssub.s32 0, %s1196_s6 }
 0x1ea   : > { %s626_s7 = sshrl.u32 %s1414_s5, 7  ;;  %s628_s8 = sand.u32 127, %s1414_s5  }
 0x1eb   : > { %s1186_s9 = sshll.u32 %s626_s7, 8  ;;  %s1189_s12 = smin.u32 %s1196_s6, %s645_s10 }
 0x1ec   : > { %s629_s11 = sadd.s32 %s1186_s9, %s628_s8  ;;  %p644_p1 = scmp.lt.s32.totalorder %s1196_s6, 0 }
 0x1ed   : > { %v631_v60 = vstv %s629_s11  ;;  %s647_s13 = sand.u32 511, %s1189_s12   ;;  %s635_s15 = scalar_lea.vmem [#allocation16], %s1187_s4 }
 0x1ee   : > { %vm633_vm0 = vcmp.eq.s32.totalorder %v55_v4, %v631_v60  ;;  %s648_s14 = ssub.s32 0, %s647_s13  ;;  %s638_s16 = scalar_lea.vmem [#allocation17], %s1187_s4 }
 0x1ef   : > { %636 = vst.msk [vmem:[%s635_s15] sm:$0xff] %vm633_vm0, %v1252_v61  ;;  %639 = vst.msk [vmem:[%s638_s16] sm:$0xff] %vm633_vm0, %v1253_v62  ;;  %s1416_s14 = smov (!%p644_p1, %s648_s14), %s647_s13  ;;  %s643_s17 = sshrl.u32 %s1196_s6, 9 }
 0x1f0   : > { %s650_s18 = sshrl.u32 %s1416_s14, 7  ;;  %s652_s19 = sand.u32 127, %s1416_s14  }
 0x1f1   : > { %s1190_s20 = sshll.u32 %s650_s18, 8  ;;  %s1191_s22 = sshll.u32 %s643_s17, 3 }
 0x1f2   : > { %s653_s21 = sadd.s32 %s1190_s20, %s652_s19  ;;  %s659_s23 = scalar_lea.vmem [#allocation16], %s1191_s22 }
 0x1f3   : > { %v655_v63 = vstv %s653_s21  ;;  %s662_s24 = scalar_lea.vmem [#allocation17], %s1191_s22 }
 0x1f4   : > { %v656_v0 = vadd.s32 128, %v655_v63  ;;  %175 = sbr.rel (!%p173_p2) target bundleno = 22 (0x16), region = 131 }
 0x1f6   : > { %vm657_vm1 = vcmp.eq.s32.totalorder %v55_v4, %v656_v0  ;;  %v1319_v4 = vsub.s32 (%p173_p2), %v705_v10, %v1295_v12 }
 0x1f7   : > { %660 = vst.msk [vmem:[%s659_s23] sm:$0xff] %vm657_vm1, %v1252_v61  ;;  %663 = vst.msk [vmem:[%s662_s24] sm:$0xff] %vm657_vm1, %v1253_v62 }
 0x1f8   :  { %v709_v18 = vrot.slane (%p173_p2), %v690_v11, %v1319_v4  ;;  %v716_v19 = vrot.slane (%p173_p2), %v694_v14, %v1319_v4  ;;  %v890_v20 = vrot.slane (%p173_p2), %v692_v13, %v1319_v4  ;;  %v897_v22 = vrot.slane (%p173_p2), %v696_v16, %v1319_v4 }
 0x1fa   :  { %vm718_vm8 = vcmp.gt.s32.totalorder (%p173_p2), %v690_v11, %v709_v18  ;;  %vm719_vm9 = vcmp.eq.s32.totalorder (%p173_p2), %v690_v11, %v709_v18  ;;  %vm720_vm10 = vcmp.lt.s32.totalorder (%p173_p2), %v694_v14, %v716_v19  ;;  %vm900_vm12 = vcmp.eq.s32.totalorder (%p173_p2), %v692_v13, %v890_v20 }
 0x1fb   :  { %vm721_vm11 = vmand %vm719_vm9, %vm720_vm10  ;;  %vm901_vm13 = vcmp.lt.s32.totalorder %v696_v16, %v897_v22  ;;  %vm899_vm15 = vcmp.gt.s32.totalorder %v692_v13, %v890_v20 }
 0x1fc   :  { %vm722_vm14 = vmor %vm718_vm8, %vm721_vm11 }
 0x1fd   :  { %vm727_vm0 = vmxor %vm722_vm14, %vm1324_vm7 }
 0x1fe   :  { %v728_v27 = vsel %vm727_vm0, %v690_v11, %v709_v18  ;;  %v729_v28 = vsel %vm727_vm0, %v694_v14, %v716_v19  ;;  %vm902_vm1 = vmand %vm900_vm12, %vm901_vm13 }
 0x1ff   :  { %v737_v30 = vrot.slane %v728_v27, %v1330_v25  ;;  %v744_v31 = vrot.slane %v729_v28, %v1330_v25  ;;  %vm903_vm2 = vmor %vm899_vm15, %vm902_vm1 }
 0x200   :  { %vm908_vm4 = vmxor %vm903_vm2, %vm1324_vm7 }
 0x201   :  { %vm746_vm5 = vcmp.gt.s32.totalorder %v728_v27, %v737_v30  ;;  %vm747_vm6 = vcmp.eq.s32.totalorder %v728_v27, %v737_v30  ;;  %vm748_vm8 = vcmp.lt.s32.totalorder %v729_v28, %v744_v31  ;;  %v909_v33 = vsel %vm908_vm4, %v692_v13, %v890_v20 }
 0x202   :  { %vm749_vm9 = vmand %vm747_vm6, %vm748_vm8  ;;  %v910_v35 = vsel %vm908_vm4, %v696_v16, %v897_v22  ;;  %v918_v36 = vrot.slane %v909_v33, %v1330_v25 }
 0x203   :  { %vm750_vm10 = vmor %vm746_vm5, %vm749_vm9  ;;  %v925_v37 = vrot.slane %v910_v35, %v1330_v25  ;;  %vm1353_vm5 = vcmp.ne.s32.totalorder %v781_v38, 0 }
 0x204   :  { %vm755_vm11 = vmxor %vm750_vm10, %vm1337_vm3  ;;  %vm927_vm12 = vcmp.gt.s32.totalorder %v909_v33, %v918_v36  ;;  %vm928_vm13 = vcmp.eq.s32.totalorder %v909_v33, %v918_v36 }
 0x205   :  { %v756_v39 = vsel %vm755_vm11, %v728_v27, %v737_v30  ;;  %v757_v40 = vsel %vm755_vm11, %v729_v28, %v744_v31  ;;  %vm929_vm14 = vcmp.lt.s32.totalorder %v910_v35, %v925_v37 }
 0x206   :  { %v765_v41 = vrot.slane %v756_v39, %v1344_v34  ;;  %v772_v42 = vrot.slane %v757_v40, %v1344_v34  ;;  %vm930_vm15 = vmand %vm928_vm13, %vm929_vm14 }
 0x207   :  { %vm931_vm0 = vmor %vm927_vm12, %vm930_vm15 }
 0x208   :  { %vm774_vm1 = vcmp.gt.s32.totalorder %v756_v39, %v765_v41  ;;  %vm775_vm2 = vcmp.eq.s32.totalorder %v756_v39, %v765_v41  ;;  %vm776_vm4 = vcmp.lt.s32.totalorder %v757_v40, %v772_v42  ;;  %vm936_vm6 = vmxor %vm931_vm0, %vm1337_vm3 }
 0x209   :  { %vm777_vm8 = vmand %vm775_vm2, %vm776_vm4  ;;  %v937_v12 = vsel %vm936_vm6, %v909_v33, %v918_v36  ;;  %v938_v44 = vsel %vm936_vm6, %v910_v35, %v925_v37 }
 0x20a   :  { %vm778_vm9 = vmor %vm774_vm1, %vm777_vm8  ;;  %v946_v45 = vrot.slane %v937_v12, %v1344_v34  ;;  %v953_v46 = vrot.slane %v938_v44, %v1344_v34 }
 0x20b   :  { %vm783_vm10 = vmxor %vm778_vm9, %vm1353_vm5 }
 0x20c   :  { %v784_v47 = vsel %vm783_vm10, %v756_v39, %v765_v41  ;;  %v785_v48 = vsel %vm783_vm10, %v757_v40, %v772_v42  ;;  %vm955_vm11 = vcmp.gt.s32.totalorder %v937_v12, %v946_v45  ;;  %vm956_vm12 = vcmp.eq.s32.totalorder %v937_v12, %v946_v45 }
 0x20d   :  { %v799_v49 = vrot.slane %v784_v47, %v1319_v4  ;;  %v806_v50 = vrot.slane %v785_v48, %v1319_v4  ;;  %vm957_vm13 = vcmp.lt.s32.totalorder %v938_v44, %v953_v46 }
 0x20e   :  { %vm958_vm14 = vmand %vm956_vm12, %vm957_vm13 }
 0x20f   :  { %vm808_vm15 = vcmp.gt.s32.totalorder %v784_v47, %v799_v49  ;;  %vm809_vm0 = vcmp.eq.s32.totalorder %v784_v47, %v799_v49  ;;  %vm810_vm1 = vcmp.lt.s32.totalorder %v785_v48, %v806_v50  ;;  %vm959_vm2 = vmor %vm955_vm11, %vm958_vm14 }
 0x210   :  { %vm811_vm4 = vmand %vm809_vm0, %vm810_vm1 }
 0x211   :  { %vm812_vm6 = vmor %vm808_vm15, %vm811_vm4 }
 0x212   :  { %vm817_vm8 = vmxor %vm812_vm6, %vm1324_vm7 }
 0x213   :  { %v818_v51 = vsel %vm817_vm8, %v784_v47, %v799_v49  ;;  %v819_v52 = vsel %vm817_vm8, %v785_v48, %v806_v50  ;;  %vm964_vm9 = vmxor %vm959_vm2, %vm1353_vm5 }
 0x214   :  { %v827_v53 = vrot.slane %v818_v51, %v1330_v25  ;;  %v834_v54 = vrot.slane %v819_v52, %v1330_v25  ;;  %v965_v55 = vsel %vm964_vm9, %v937_v12, %v946_v45  ;;  %v966_v56 = vsel %vm964_vm9, %v938_v44, %v953_v46 }
 0x215   :  { %v980_v57 = vrot.slane %v965_v55, %v1319_v4  ;;  %v987_v58 = vrot.slane %v966_v56, %v1319_v4 }
 0x216   :  { %vm836_vm10 = vcmp.gt.s32.totalorder %v818_v51, %v827_v53  ;;  %vm837_vm11 = vcmp.eq.s32.totalorder %v818_v51, %v827_v53  ;;  %vm838_vm12 = vcmp.lt.s32.totalorder %v819_v52, %v834_v54 }
 0x217   :  { %vm839_vm13 = vmand %vm837_vm11, %vm838_vm12  ;;  %vm990_vm14 = vcmp.eq.s32.totalorder %v965_v55, %v980_v57  ;;  %vm991_vm15 = vcmp.lt.s32.totalorder %v966_v56, %v987_v58  ;;  %vm989_vm1 = vcmp.gt.s32.totalorder %v965_v55, %v980_v57 }
 0x218   :  { %vm840_vm0 = vmor %vm836_vm10, %vm839_vm13 }
 0x219   :  { %vm845_vm2 = vmxor %vm840_vm0, %vm1337_vm3 }
 0x21a   :  { %v846_v59 = vsel %vm845_vm2, %v818_v51, %v827_v53  ;;  %v847_v60 = vsel %vm845_vm2, %v819_v52, %v834_v54  ;;  %vm992_vm4 = vmand %vm990_vm14, %vm991_vm15 }
 0x21b   :  { %v855_v61 = vrot.slane %v846_v59, %v1344_v34  ;;  %v862_v62 = vrot.slane %v847_v60, %v1344_v34  ;;  %vm993_vm6 = vmor %vm989_vm1, %vm992_vm4 }
 0x21c   :  { %vm998_vm8 = vmxor %vm993_vm6, %vm1324_vm7 }
 0x21d   :  { %vm864_vm9 = vcmp.gt.s32.totalorder %v846_v59, %v855_v61  ;;  %vm865_vm11 = vcmp.eq.s32.totalorder %v846_v59, %v855_v61  ;;  %vm866_vm12 = vcmp.lt.s32.totalorder %v847_v60, %v862_v62  ;;  %v999_v63 = vsel %vm998_vm8, %v965_v55, %v980_v57 }
 0x21e   :  { %vm867_vm10 = vmand %vm865_vm11, %vm866_vm12  ;;  %v1000_v0 = vsel %vm998_vm8, %v966_v56, %v987_v58  ;;  %v1008_v1 = vrot.slane %v999_v63, %v1330_v25 }
 0x21f   :  { %vm868_vm13 = vmor %vm864_vm9, %vm867_vm10  ;;  %v1015_v2 = vrot.slane %v1000_v0, %v1330_v25 }
 0x220   :  { %vm873_vm14 = vmxor %vm868_vm13, %vm1353_vm5  ;;  %vm1017_vm15 = vcmp.gt.s32.totalorder %v999_v63, %v1008_v1  ;;  %vm1018_vm0 = vcmp.eq.s32.totalorder %v999_v63, %v1008_v1 }
 0x221   :  { %v874_v3 = vsel %vm873_vm14, %v846_v59, %v855_v61  ;;  %v875_v5 = vsel %vm873_vm14, %v847_v60, %v862_v62  ;;  %vm1019_vm1 = vcmp.lt.s32.totalorder %v1000_v0, %v1015_v2 }
 0x222   :  { %877 = vst [vmem:[#allocation12] sm:$0xff] %v874_v3  ;;  %878 = vst [vmem:[#allocation14] sm:$0xff] %v875_v5 }
 0x223   :  { %vm1020_vm7 = vmand %vm1018_vm0, %vm1019_vm1 }
 0x224   :  { %vm1021_vm2 = vmor %vm1017_vm15, %vm1020_vm7 }
 0x225   :  { %vm1026_vm4 = vmxor %vm1021_vm2, %vm1337_vm3 }
 0x226   :  { %v1027_v6 = vsel %vm1026_vm4, %v999_v63, %v1008_v1  ;;  %v1028_v7 = vsel %vm1026_vm4, %v1000_v0, %v1015_v2 }
 0x227   :  { %v1036_v8 = vrot.slane %v1027_v6, %v1344_v34  ;;  %v1043_v9 = vrot.slane %v1028_v7, %v1344_v34 }
 0x229   :  { %vm1045_vm6 = vcmp.gt.s32.totalorder %v1027_v6, %v1036_v8  ;;  %vm1046_vm8 = vcmp.eq.s32.totalorder %v1027_v6, %v1036_v8  ;;  %vm1047_vm9 = vcmp.lt.s32.totalorder %v1028_v7, %v1043_v9  ;;  %v1085_v13 = vld [vmem:[#allocation14] sm:$0xff]  ;;  %v1061_v14 = vld [vmem:[#allocation12] sm:$0xff] }
 0x22a   :  { %vm1048_vm11 = vmand %vm1046_vm8, %vm1047_vm9  ;;  %1086 = vxpose.xlu0.b32.start.end [1/1] (short) (narrow) %v1085_v13, 8  ;;  %vm1062_vm3 = vcmp.lt.s32.totalorder %v1061_v14, 0  ;;  %v1063_v15 = vsub.s32 2147483647, %v1061_v14 }
 0x22b   :  { %vm1049_vm12 = vmor %vm1045_vm6, %vm1048_vm11 }
 0x22c   :  { %vm1054_vm10 = vmxor %vm1049_vm12, %vm1353_vm5  ;;  %v1064_v16 = vsel %vm1062_vm3, %v1063_v15, %v1061_v14 }
 0x22d   :  { %v1055_v10 = vsel %vm1054_vm10, %v1027_v6, %v1036_v8  ;;  %v1056_v11 = vsel %vm1054_vm10, %v1028_v7, %v1043_v9  ;;  %1065 = vst [vmem:[#allocation12] sm:$0xff] %v1064_v16 }
 0x22e   :  { %1058 = vst [vmem:[#allocation13] sm:$0xff] %v1055_v10  ;;  %1059 = vst [vmem:[#allocation15] sm:$0xff] %v1056_v11  ;;  %1067 = vxpose.xlu0.b32.start.end [1/1] (short) (narrow) %v1064_v16, 8 }
 0x2aa   :  { %v1087_v4 = vpop.trf.xlu0 }
 0x2ab   :  { %1103 = vst [vmem:[#allocation10] sm:$0xff] %v1087_v4 }
 0x2ae   :  { %v1068_v17 = vpop.trf.xlu0 }
 0x2af   :  { %1084 = vst [vmem:[#allocation7] sm:$0xff] %v1068_v17 }
 0x2b2   :  { %v1113_v18 = vld [vmem:[#allocation10] sm:$0x3] }
 0x2b3   :  { %1115 = vst [vmem:[#allocation11] sm:$0x3] %v1113_v18 }
 0x2b6   :  { %v1107_v19 = vld [vmem:[#allocation7] sm:$0x3] }
 0x2b7   :  { %1109 = vst [vmem:[#allocation8] sm:$0x3] %v1107_v19 }
 0x2b8   :  { %1227 = shalt.err (!%p1224_p7)
}
 0x2b9   :  { %s1228_s29 = scalar_lea.hbm %s1405_s1, 32 }
 0x2ba   :  { %p1229_p8 = scmp.ne.s32.totalorder %s1405_s1, %s1228_s29  ;;  %p1232_p9 = scmp.lt.u32.totalorder %s1228_s29, %s1405_s1 }
 0x2bc   :  { %p1234_p10 = pnand %p1232_p9, %p1229_p8 }
 0x2be   :  { %1237 = shalt.err (!%p1234_p10)
}
 0x2bf   :  { %1123 = dma.vmem_to_hbm [thread:$0]  %s1121_s25, 32, %s1405_s1, [#allocation9]   ;;  %v1139_v20 = vld [vmem:[#allocation11] sm:$0x3] }
 0x2c0   :  { %1140 = vst [vmem:[%s1406_s2] sm:$0x3] %v1139_v20 }
 0x2c1   :  { %1242 = dma.done.wait [#allocation9], 32  }
 0x2c2   :  { %1243 = vsyncadd [#allocation9], 4294967264 }
 0x2c3   :  { %1156 = vsyncpa [#allocation9], 1 }

// kernel: segmented_faster_rcnn_forward.14
= control target key start
LH: loop header
LB: loop body
LE: loop exit
PB: predicated region body
PF: predicated region fallthrough
CT: control target
= control target key end

     0   :  { %v50_v34 = vlaneseq  ;;  %s507_s1 = inlined_call_operand.vmem [shape: bf16[256,256], index: 1, kind: input, shape index: {}]   ;;  %s508_s0 = inlined_call_operand.vmem [shape: bf16[16,256], index: 0, kind: input, shape index: {}]   ;;  %s509_s2 = inlined_call_operand.vmem [shape: f32[1,256], index: 2, kind: input, shape index: {}]   ;;  %s510_s3 = inlined_call_operand.vmem [shape: f32[16,256], index: 3, kind: output, shape index: {}]  }
   0x1   :  { %v319_v0 = vld [vmem:[%s507_s1 + $0x4] ss:$8 sps:$4 sm:$0xff]   ;;  %v321_v1 = vld [vmem:[%s507_s1] ss:$8 sps:$4 sm:$0xff]   ;;  %v322_v2 = vld [vmem:[%s507_s1 + $0x14] ss:$8 sps:$4 sm:$0xff]  }
   0x2   :  { %230 = vmatprep.subr.bf16.mxu0 %v319_v0  ;;  %v324_v3 = vld [vmem:[%s507_s1 + $0x10] ss:$8 sps:$4 sm:$0xff]   ;;  %v325_v4 = vld [vmem:[%s507_s1 + $0x24] ss:$8 sps:$4 sm:$0xff]   ;;  %v327_v5 = vld [vmem:[%s507_s1 + $0x20] ss:$8 sps:$4 sm:$0xff]  }
   0x3   :  { %231 = vmatpush1.bf16.msra.mxu0 %v321_v1  ;;  %v328_v6 = vld [vmem:[%s507_s1 + $0x34] ss:$8 sps:$4 sm:$0xff]   ;;  %v330_v7 = vld [vmem:[%s507_s1 + $0x30] ss:$8 sps:$4 sm:$0xff]   ;;  %v331_v8 = vld [vmem:[%s507_s1 + $0x44] ss:$8 sps:$4 sm:$0xff]  }
   0x4   :  { %232 = vmatprep.subr.bf16.mxu0 %v322_v2  ;;  %v333_v9 = vld [vmem:[%s507_s1 + $0x40] ss:$8 sps:$4 sm:$0xff]   ;;  %v334_v10 = vld [vmem:[%s507_s1 + $0x54] ss:$8 sps:$4 sm:$0xff]   ;;  %v336_v11 = vld [vmem:[%s507_s1 + $0x50] ss:$8 sps:$4 sm:$0xff]  }
   0x5   :  { %v337_v12 = vld [vmem:[%s507_s1 + $0x64] ss:$8 sps:$4 sm:$0xff]   ;;  %v339_v14 = vld [vmem:[%s507_s1 + $0x60] ss:$8 sps:$4 sm:$0xff]   ;;  %v340_v15 = vld [vmem:[%s507_s1 + $0x74] ss:$8 sps:$4 sm:$0xff]  }
   0x6   :  { %v369_v13 = vld [vmem:[%s508_s0 + $0x4] ss:$8 sps:$4 sm:$0xff]   ;;  %v342_v16 = vld [vmem:[%s507_s1 + $0x70] ss:$8 sps:$4 sm:$0xff]   ;;  %v345_v18 = vld [vmem:[%s507_s1 + $0x80] ss:$8 sps:$4 sm:$0xff]  }
   0x7   :  { %233 = vmatpush1.bf16.msra.mxu0 %v324_v3  ;;  %262 = vmatprep.mubr.bf16.mxu0 %v369_v13  ;;  %v343_v17 = vld [vmem:[%s507_s1 + $0x84] ss:$8 sps:$4 sm:$0xff]   ;;  %v346_v19 = vld [vmem:[%s507_s1 + $0x94] ss:$8 sps:$4 sm:$0xff]   ;;  %v348_v20 = vld [vmem:[%s507_s1 + $0x90] ss:$8 sps:$4 sm:$0xff]  }
   0x8   :  { %234 = vmatprep.subr.bf16.mxu0 %v325_v4  ;;  %v349_v21 = vld [vmem:[%s507_s1 + $0xa4] ss:$8 sps:$4 sm:$0xff]   ;;  %v351_v22 = vld [vmem:[%s507_s1 + $0xa0] ss:$8 sps:$4 sm:$0xff]   ;;  %v352_v23 = vld [vmem:[%s507_s1 + $0xb4] ss:$8 sps:$4 sm:$0xff]  }
   0x9   :  { %v354_v24 = vld [vmem:[%s507_s1 + $0xb0] ss:$8 sps:$4 sm:$0xff]   ;;  %v355_v25 = vld [vmem:[%s507_s1 + $0xc4] ss:$8 sps:$4 sm:$0xff]   ;;  %v357_v26 = vld [vmem:[%s507_s1 + $0xc0] ss:$8 sps:$4 sm:$0xff]  }
   0xa   :  { %v358_v27 = vld [vmem:[%s507_s1 + $0xd4] ss:$8 sps:$4 sm:$0xff]   ;;  %v360_v28 = vld [vmem:[%s507_s1 + $0xd0] ss:$8 sps:$4 sm:$0xff]   ;;  %v361_v29 = vld [vmem:[%s507_s1 + $0xe4] ss:$8 sps:$4 sm:$0xff]  }
   0xb   :  { %235 = vmatpush1.bf16.msra.mxu0 %v327_v5  ;;  %v363_v30 = vld [vmem:[%s507_s1 + $0xe0] ss:$8 sps:$4 sm:$0xff]   ;;  %v364_v31 = vld [vmem:[%s507_s1 + $0xf4] ss:$8 sps:$4 sm:$0xff]   ;;  %v366_v32 = vld [vmem:[%s507_s1 + $0xf0] ss:$8 sps:$4 sm:$0xff]  }
   0xc   :  { %236 = vmatprep.subr.bf16.mxu0 %v328_v6  ;;  %v367_v33 = vld [vmem:[%s508_s0] ss:$8 sps:$4 sm:$0xff]   ;;  %v51_v35 = vshrl.u32 %v50_v34, 7 }
   0xd   :  { %v48_v37 = vld [vmem:[%s509_s2] sm:$0x3] }
   0xe   :  { %v52_v36 = vsub.s32 0, %v51_v35  ;;  %v56_v38 = vsub.s32 1, %v51_v35 }
   0xf   :  { %237 = vmatpush1.bf16.msra.mxu0 %v330_v7 }
  0x10   :  { %238 = vmatprep.subr.bf16.mxu0 %v331_v8  ;;  %v53_v39 = vrot.slane %v48_v37, %v52_v36  ;;  %v57_v40 = vrot.slane %v48_v37, %v56_v38 }
  0x13   :  { %239 = vmatpush1.bf16.msra.mxu0 %v333_v9 }
  0x14   :  { %240 = vmatprep.subr.bf16.mxu0 %v334_v10 }
  0x17   :  { %241 = vmatpush1.bf16.msra.mxu0 %v336_v11 }
  0x18   :  { %242 = vmatprep.subr.bf16.mxu0 %v337_v12 }
  0x1b   :  { %243 = vmatpush1.bf16.msra.mxu0 %v339_v14 }
  0x1c   :  { %244 = vmatprep.subr.bf16.mxu0 %v340_v15 }
  0x1f   :  { %245 = vmatpush1.bf16.msra.mxu0 %v342_v16 }
  0x20   :  { %246 = vmatprep.subr.bf16.mxu0 %v343_v17 }
  0x23   :  { %247 = vmatpush1.bf16.msra.mxu0 %v345_v18 }
  0x24   :  { %248 = vmatprep.subr.bf16.mxu0 %v346_v19 }
  0x27   :  { %249 = vmatpush1.bf16.msra.mxu0 %v348_v20 }
  0x28   :  { %250 = vmatprep.subr.bf16.mxu0 %v349_v21 }
  0x2b   :  { %251 = vmatpush1.bf16.msra.mxu0 %v351_v22 }
  0x2c   :  { %252 = vmatprep.subr.bf16.mxu0 %v352_v23 }
  0x2f   :  { %253 = vmatpush1.bf16.msra.mxu0 %v354_v24 }
  0x30   :  { %254 = vmatprep.subr.bf16.mxu0 %v355_v25 }
  0x33   :  { %255 = vmatpush1.bf16.msra.mxu0 %v357_v26 }
  0x34   :  { %256 = vmatprep.subr.bf16.mxu0 %v358_v27 }
  0x37   :  { %257 = vmatpush1.bf16.msra.mxu0 %v360_v28 }
  0x38   :  { %258 = vmatprep.subr.bf16.mxu0 %v361_v29 }
  0x3b   :  { %259 = vmatpush1.bf16.msra.mxu0 %v363_v30 }
  0x3c   :  { %260 = vmatprep.subr.bf16.mxu0 %v364_v31 }
  0x3f   :  { %261 = vmatpush1.bf16.msra.mxu0 %v366_v32 }
  0x42   :  { %263 = vmatmul.mubr.bf16.vlgmr.msra.gmra.mrb[0].mxu0 %v367_v33 }
 0x115   :  { %v264_v41 = vpop.f32.mrb[0].mxu0 }
 0x116   :  { %v265_v42 = vadd.f32 %v264_v41, %v53_v39  ;;  %v266_v43 = vpop.f32.mrb[1].mxu0 }
 0x117   :  { %v267_v44 = vadd.f32 %v266_v43, %v57_v40  ;;  %v268_v45 = vpop.f32.mrb[2].mxu0 }
 0x118   :  { %v273_v46 = vmax.f32 %v265_v42, 0.0  ;;  %v269_v47 = vadd.f32 %v268_v45, %v53_v39  ;;  %v270_v48 = vpop.f32.mrb[3].mxu0 }
 0x119   :  { %v274_v49 = vmax.f32 %v267_v44, 0.0  ;;  %v271_v50 = vadd.f32 %v270_v48, %v57_v40 }
 0x11a   :  { %277 = vst [vmem:[%s510_s3] sm:$0xff] %v273_v46  ;;  %v275_v51 = vmax.f32 %v269_v47, 0.0 }
 0x11b   :  { %278 = vst [vmem:[%s510_s3 + $0x8] sm:$0xff] %v274_v49  ;;  %v276_v52 = vmax.f32 %v271_v50, 0.0 }
 0x11c   :  { %279 = vst [vmem:[%s510_s3 + $0x10] sm:$0xff] %v275_v51 }
 0x11d   :  { %280 = vst [vmem:[%s510_s3 + $0x18] sm:$0xff] %v276_v52 }

// kernel: segmented_faster_rcnn_forward.13
= control target key start
LH: loop header
LB: loop body
LE: loop exit
PB: predicated region body
PF: predicated region fallthrough
CT: control target
= control target key end

     0   :  { %vm1282_vm0 = vcmask 261120   ;;  %s2814_s1 = inlined_call_operand.vmem [shape: bf16[1568,256], index: 1, kind: input, shape index: {}]   ;;  %s2815_s0 = inlined_call_operand.vmem [shape: bf16[16,1568], index: 0, kind: input, shape index: {}]   ;;  %s2816_s2 = inlined_call_operand.vmem [shape: f32[1,256], index: 2, kind: input, shape index: {}]   ;;  %s2817_s3 = inlined_call_operand.vmem [shape: f32[16,256], index: 3, kind: output, shape index: {}]  }
   0x1   :  { %v1838_v0 = vld [vmem:[%s2814_s1 + $0x4] ss:$8 sps:$4 sm:$0xff]   ;;  %v1842_v2 = vld [vmem:[%s2814_s1] ss:$8 sps:$4 sm:$0xff]   ;;  %v1844_v4 = vld [vmem:[%s2814_s1 + $0x14] ss:$8 sps:$4 sm:$0xff]  }
   0x2   :  { %v1840_v1 = vld [vmem:[%s2814_s1 + $0x304] ss:$8 sps:$4 sm:$0xff]   ;;  %1286 = vmatprep.subr.bf16.mxu1 %v1838_v0  ;;  %v1843_v3 = vld [vmem:[%s2814_s1 + $0x300] ss:$8 sps:$4 sm:$0xff]   ;;  %v1846_v5 = vld [vmem:[%s2814_s1 + $0x314] ss:$8 sps:$4 sm:$0xff]  }
   0x3   :  { %1415 = vmatprep.subr.bf16.mxu0 %v1840_v1  ;;  %1287 = vmatpush1.bf16.msra.mxu1 %v1842_v2  ;;  %v1848_v6 = vld [vmem:[%s2814_s1 + $0x10] ss:$8 sps:$4 sm:$0xff]   ;;  %v1850_v8 = vld [vmem:[%s2814_s1 + $0x24] ss:$8 sps:$4 sm:$0xff]   ;;  %v1854_v10 = vld [vmem:[%s2814_s1 + $0x20] ss:$8 sps:$4 sm:$0xff]  }
   0x4   :  { %1416 = vmatpush1.bf16.msra.mxu0 %v1843_v3  ;;  %1288 = vmatprep.subr.bf16.mxu1 %v1844_v4  ;;  %v1849_v7 = vld [vmem:[%s2814_s1 + $0x310] ss:$8 sps:$4 sm:$0xff]   ;;  %v1852_v9 = vld [vmem:[%s2814_s1 + $0x324] ss:$8 sps:$4 sm:$0xff]   ;;  %v1855_v11 = vld [vmem:[%s2814_s1 + $0x320] ss:$8 sps:$4 sm:$0xff]  }
   0x5   :  { %1417 = vmatprep.subr.bf16.mxu0 %v1846_v5  ;;  %v1856_v12 = vld [vmem:[%s2814_s1 + $0x34] ss:$8 sps:$4 sm:$0xff]   ;;  %v1860_v14 = vld [vmem:[%s2814_s1 + $0x30] ss:$8 sps:$4 sm:$0xff]   ;;  %v1862_v16 = vld [vmem:[%s2814_s1 + $0x44] ss:$8 sps:$4 sm:$0xff]  }
   0x6   :  { %v1858_v13 = vld [vmem:[%s2814_s1 + $0x334] ss:$8 sps:$4 sm:$0xff]   ;;  %v1861_v15 = vld [vmem:[%s2814_s1 + $0x330] ss:$8 sps:$4 sm:$0xff]   ;;  %v1864_v17 = vld [vmem:[%s2814_s1 + $0x344] ss:$8 sps:$4 sm:$0xff]  }
   0x7   :  { %1289 = vmatpush1.bf16.msra.mxu1 %v1848_v6  ;;  %v1866_v18 = vld [vmem:[%s2814_s1 + $0x40] ss:$8 sps:$4 sm:$0xff]   ;;  %v1868_v20 = vld [vmem:[%s2814_s1 + $0x54] ss:$8 sps:$4 sm:$0xff]   ;;  %v1872_v22 = vld [vmem:[%s2814_s1 + $0x50] ss:$8 sps:$4 sm:$0xff]  }
   0x8   :  { %1418 = vmatpush1.bf16.msra.mxu0 %v1849_v7  ;;  %1290 = vmatprep.subr.bf16.mxu1 %v1850_v8  ;;  %v1867_v19 = vld [vmem:[%s2814_s1 + $0x340] ss:$8 sps:$4 sm:$0xff]   ;;  %v1870_v21 = vld [vmem:[%s2814_s1 + $0x354] ss:$8 sps:$4 sm:$0xff]   ;;  %v1873_v23 = vld [vmem:[%s2814_s1 + $0x350] ss:$8 sps:$4 sm:$0xff]  }
   0x9   :  { %1419 = vmatprep.subr.bf16.mxu0 %v1852_v9  ;;  %v1874_v24 = vld [vmem:[%s2814_s1 + $0x64] ss:$8 sps:$4 sm:$0xff]   ;;  %v1878_v26 = vld [vmem:[%s2814_s1 + $0x60] ss:$8 sps:$4 sm:$0xff]   ;;  %v1880_v28 = vld [vmem:[%s2814_s1 + $0x74] ss:$8 sps:$4 sm:$0xff]  }
   0xa   :  { %v1876_v25 = vld [vmem:[%s2814_s1 + $0x364] ss:$8 sps:$4 sm:$0xff]   ;;  %v1879_v27 = vld [vmem:[%s2814_s1 + $0x360] ss:$8 sps:$4 sm:$0xff]   ;;  %v1882_v29 = vld [vmem:[%s2814_s1 + $0x374] ss:$8 sps:$4 sm:$0xff]  }
   0xb   :  { %1291 = vmatpush1.bf16.msra.mxu1 %v1854_v10  ;;  %v1884_v30 = vld [vmem:[%s2814_s1 + $0x70] ss:$8 sps:$4 sm:$0xff]   ;;  %v1886_v32 = vld [vmem:[%s2814_s1 + $0x84] ss:$8 sps:$4 sm:$0xff]   ;;  %v1890_v34 = vld [vmem:[%s2814_s1 + $0x80] ss:$8 sps:$4 sm:$0xff]  }
   0xc   :  { %1420 = vmatpush1.bf16.msra.mxu0 %v1855_v11  ;;  %1292 = vmatprep.subr.bf16.mxu1 %v1856_v12  ;;  %v1885_v31 = vld [vmem:[%s2814_s1 + $0x370] ss:$8 sps:$4 sm:$0xff]   ;;  %v1888_v33 = vld [vmem:[%s2814_s1 + $0x384] ss:$8 sps:$4 sm:$0xff]   ;;  %v1891_v35 = vld [vmem:[%s2814_s1 + $0x380] ss:$8 sps:$4 sm:$0xff]  }
   0xd   :  { %1421 = vmatprep.subr.bf16.mxu0 %v1858_v13  ;;  %v1892_v36 = vld [vmem:[%s2814_s1 + $0x94] ss:$8 sps:$4 sm:$0xff]   ;;  %v1896_v38 = vld [vmem:[%s2814_s1 + $0x90] ss:$8 sps:$4 sm:$0xff]   ;;  %v1898_v40 = vld [vmem:[%s2814_s1 + $0xa4] ss:$8 sps:$4 sm:$0xff]  }
   0xe   :  { %v1894_v37 = vld [vmem:[%s2814_s1 + $0x394] ss:$8 sps:$4 sm:$0xff]   ;;  %v1897_v39 = vld [vmem:[%s2814_s1 + $0x390] ss:$8 sps:$4 sm:$0xff]   ;;  %v1900_v41 = vld [vmem:[%s2814_s1 + $0x3a4] ss:$8 sps:$4 sm:$0xff]  }
   0xf   :  { %1293 = vmatpush1.bf16.msra.mxu1 %v1860_v14  ;;  %v1902_v42 = vld [vmem:[%s2814_s1 + $0xa0] ss:$8 sps:$4 sm:$0xff]   ;;  %v1904_v44 = vld [vmem:[%s2814_s1 + $0xb4] ss:$8 sps:$4 sm:$0xff]   ;;  %v1908_v46 = vld [vmem:[%s2814_s1 + $0xb0] ss:$8 sps:$4 sm:$0xff]  }
  0x10   :  { %1422 = vmatpush1.bf16.msra.mxu0 %v1861_v15  ;;  %1294 = vmatprep.subr.bf16.mxu1 %v1862_v16  ;;  %v1903_v43 = vld [vmem:[%s2814_s1 + $0x3a0] ss:$8 sps:$4 sm:$0xff]   ;;  %v1906_v45 = vld [vmem:[%s2814_s1 + $0x3b4] ss:$8 sps:$4 sm:$0xff]   ;;  %v1909_v47 = vld [vmem:[%s2814_s1 + $0x3b0] ss:$8 sps:$4 sm:$0xff]  }
  0x11   :  { %1423 = vmatprep.subr.bf16.mxu0 %v1864_v17  ;;  %v1936_v48 = vld [vmem:[%s2815_s0 + $0x4] ss:$52 sps:$4 sm:$0xff]   ;;  %v1942_v51 = vld [vmem:[%s2815_s0 + $0x1c] ss:$52 sps:$4 sm:$0xff]   ;;  %v1914_v52 = vld [vmem:[%s2814_s1 + $0xc0] ss:$8 sps:$4 sm:$0xff]  }
  0x12   :  { %v1910_v49 = vld [vmem:[%s2814_s1 + $0xc4] ss:$8 sps:$4 sm:$0xff]   ;;  %1318 = vmatprep.mubr.bf16.mxu1 %v1936_v48  ;;  %v1915_v53 = vld [vmem:[%s2814_s1 + $0x3c0] ss:$8 sps:$4 sm:$0xff]   ;;  %v1916_v54 = vld [vmem:[%s2814_s1 + $0xd4] ss:$8 sps:$4 sm:$0xff]   ;;  %1447 = vmatprep.mubr.bf16.mxu0 %v1942_v51 }
  0x13   :  { %1295 = vmatpush1.bf16.msra.mxu1 %v1866_v18  ;;  %v1912_v50 = vld [vmem:[%s2814_s1 + $0x3c4] ss:$8 sps:$4 sm:$0xff]   ;;  %v1918_v55 = vld [vmem:[%s2814_s1 + $0x3d4] ss:$8 sps:$4 sm:$0xff]   ;;  %v1920_v56 = vld [vmem:[%s2814_s1 + $0xd0] ss:$8 sps:$4 sm:$0xff]  }
  0x14   :  { %1424 = vmatpush1.bf16.msra.mxu0 %v1867_v19  ;;  %1296 = vmatprep.subr.bf16.mxu1 %v1868_v20  ;;  %v1921_v57 = vld [vmem:[%s2814_s1 + $0x3d0] ss:$8 sps:$4 sm:$0xff]   ;;  %v1922_v58 = vld [vmem:[%s2814_s1 + $0xe4] ss:$8 sps:$4 sm:$0xff]   ;;  %v1926_v60 = vld [vmem:[%s2814_s1 + $0xe0] ss:$8 sps:$4 sm:$0xff]  }
  0x15   :  { %1425 = vmatprep.subr.bf16.mxu0 %v1870_v21  ;;  %v1924_v59 = vld [vmem:[%s2814_s1 + $0x3e4] ss:$8 sps:$4 sm:$0xff]   ;;  %v1927_v61 = vld [vmem:[%s2814_s1 + $0x3e0] ss:$8 sps:$4 sm:$0xff]   ;;  %v1928_v62 = vld [vmem:[%s2814_s1 + $0xf4] ss:$8 sps:$4 sm:$0xff]  }
  0x16   :  { %v1930_v63 = vld [vmem:[%s2814_s1 + $0x3f4] ss:$8 sps:$4 sm:$0xff]   ;;  %v1932_v0 = vld [vmem:[%s2814_s1 + $0xf0] ss:$8 sps:$4 sm:$0xff]   ;;  %v1939_v2 = vld [vmem:[%s2814_s1 + $0x104] ss:$8 sps:$4 sm:$0xff]  }
  0x17   :  { %1297 = vmatpush1.bf16.msra.mxu1 %v1872_v22  ;;  %v1933_v1 = vld [vmem:[%s2814_s1 + $0x3f0] ss:$8 sps:$4 sm:$0xff]   ;;  %v1945_v3 = vld [vmem:[%s2814_s1 + $0x404] ss:$8 sps:$4 sm:$0xff]   ;;  %v1934_v4 = vld [vmem:[%s2815_s0] ss:$52 sps:$4 sm:$0xff]  }
  0x18   :  { %1426 = vmatpush1.bf16.msra.mxu0 %v1873_v23  ;;  %1298 = vmatprep.subr.bf16.mxu1 %v1874_v24  ;;  %v1937_v5 = vld [vmem:[%s2814_s1 + $0x100] ss:$8 sps:$4 sm:$0xff]   ;;  %v1940_v6 = vld [vmem:[%s2815_s0 + $0x18] ss:$52 sps:$4 sm:$0xff]   ;;  %v1948_v8 = vld [vmem:[%s2814_s1 + $0x114] ss:$8 sps:$4 sm:$0xff]  }
  0x19   :  { %1427 = vmatprep.subr.bf16.mxu0 %v1876_v25  ;;  %v1943_v7 = vld [vmem:[%s2814_s1 + $0x400] ss:$8 sps:$4 sm:$0xff]   ;;  %v1951_v9 = vld [vmem:[%s2814_s1 + $0x414] ss:$8 sps:$4 sm:$0xff]   ;;  %v1946_v10 = vld [vmem:[%s2814_s1 + $0x110] ss:$8 sps:$4 sm:$0xff]  }
  0x1a   :  { %v1949_v11 = vld [vmem:[%s2814_s1 + $0x410] ss:$8 sps:$4 sm:$0xff]   ;;  %v1954_v12 = vld [vmem:[%s2814_s1 + $0x124] ss:$8 sps:$4 sm:$0xff]   ;;  %v1952_v14 = vld [vmem:[%s2814_s1 + $0x120] ss:$8 sps:$4 sm:$0xff]  }
  0x1b   :  { %1299 = vmatpush1.bf16.msra.mxu1 %v1878_v26  ;;  %v1957_v13 = vld [vmem:[%s2814_s1 + $0x424] ss:$8 sps:$4 sm:$0xff]   ;;  %v1955_v15 = vld [vmem:[%s2814_s1 + $0x420] ss:$8 sps:$4 sm:$0xff]   ;;  %v1960_v16 = vld [vmem:[%s2814_s1 + $0x134] ss:$8 sps:$4 sm:$0xff]  }
  0x1c   :  { %1428 = vmatpush1.bf16.msra.mxu0 %v1879_v27  ;;  %1300 = vmatprep.subr.bf16.mxu1 %v1880_v28  ;;  %v1963_v17 = vld [vmem:[%s2814_s1 + $0x434] ss:$8 sps:$4 sm:$0xff]   ;;  %v1958_v18 = vld [vmem:[%s2814_s1 + $0x130] ss:$8 sps:$4 sm:$0xff]   ;;  %v1966_v20 = vld [vmem:[%s2814_s1 + $0x144] ss:$8 sps:$4 sm:$0xff]  }
  0x1d   :  { %1429 = vmatprep.subr.bf16.mxu0 %v1882_v29  ;;  %v1961_v19 = vld [vmem:[%s2814_s1 + $0x430] ss:$8 sps:$4 sm:$0xff]   ;;  %v1969_v21 = vld [vmem:[%s2814_s1 + $0x444] ss:$8 sps:$4 sm:$0xff]   ;;  %v1964_v22 = vld [vmem:[%s2814_s1 + $0x140] ss:$8 sps:$4 sm:$0xff]  }
  0x1e   :  { %v1967_v23 = vld [vmem:[%s2814_s1 + $0x440] ss:$8 sps:$4 sm:$0xff]   ;;  %v1972_v24 = vld [vmem:[%s2814_s1 + $0x154] ss:$8 sps:$4 sm:$0xff]   ;;  %v1970_v26 = vld [vmem:[%s2814_s1 + $0x150] ss:$8 sps:$4 sm:$0xff]  }
  0x1f   :  { %1301 = vmatpush1.bf16.msra.mxu1 %v1884_v30  ;;  %v1975_v25 = vld [vmem:[%s2814_s1 + $0x454] ss:$8 sps:$4 sm:$0xff]   ;;  %v1973_v27 = vld [vmem:[%s2814_s1 + $0x450] ss:$8 sps:$4 sm:$0xff]   ;;  %v1978_v28 = vld [vmem:[%s2814_s1 + $0x164] ss:$8 sps:$4 sm:$0xff]  }
  0x20   :  { %1430 = vmatpush1.bf16.msra.mxu0 %v1885_v31  ;;  %1302 = vmatprep.subr.bf16.mxu1 %v1886_v32  ;;  %v1981_v29 = vld [vmem:[%s2814_s1 + $0x464] ss:$8 sps:$4 sm:$0xff]   ;;  %v1976_v30 = vld [vmem:[%s2814_s1 + $0x160] ss:$8 sps:$4 sm:$0xff]   ;;  %v1984_v32 = vld [vmem:[%s2814_s1 + $0x174] ss:$8 sps:$4 sm:$0xff]  }
  0x21   :  { %1431 = vmatprep.subr.bf16.mxu0 %v1888_v33  ;;  %v1979_v31 = vld [vmem:[%s2814_s1 + $0x460] ss:$8 sps:$4 sm:$0xff]   ;;  %v1987_v33 = vld [vmem:[%s2814_s1 + $0x474] ss:$8 sps:$4 sm:$0xff]  }
  0x22   :  { %v2000_v48 = vld [vmem:[%s2814_s1 + $0x1a0] ss:$8 sps:$4 sm:$0xff]   ;;  %v2011_v51 = vld [vmem:[%s2814_s1 + $0x4b4] ss:$8 sps:$4 sm:$0xff]  }
  0x23   :  { %1303 = vmatpush1.bf16.msra.mxu1 %v1890_v34  ;;  %v2038_v34 = vld [vmem:[%s2815_s0 + $0xc] ss:$52 sps:$4 sm:$0xff]  }
  0x24   :  { %1432 = vmatpush1.bf16.msra.mxu0 %v1891_v35  ;;  %1304 = vmatprep.subr.bf16.mxu1 %v1892_v36  ;;  %v1982_v35 = vld [vmem:[%s2814_s1 + $0x170] ss:$8 sps:$4 sm:$0xff]  }
  0x25   :  { %1433 = vmatprep.subr.bf16.mxu0 %v1894_v37  ;;  %v1985_v36 = vld [vmem:[%s2814_s1 + $0x470] ss:$8 sps:$4 sm:$0xff]  }
  0x26   :  { %v2044_v37 = vld [vmem:[%s2815_s0 + $0x24] ss:$52 sps:$4 sm:$0xff]  }
  0x27   :  { %1305 = vmatpush1.bf16.msra.mxu1 %v1896_v38  ;;  %v1990_v38 = vld [vmem:[%s2814_s1 + $0x184] ss:$8 sps:$4 sm:$0xff]  }
  0x28   :  { %1434 = vmatpush1.bf16.msra.mxu0 %v1897_v39  ;;  %1306 = vmatprep.subr.bf16.mxu1 %v1898_v40  ;;  %v1993_v39 = vld [vmem:[%s2814_s1 + $0x484] ss:$8 sps:$4 sm:$0xff]   ;;  %v1988_v40 = vld [vmem:[%s2814_s1 + $0x180] ss:$8 sps:$4 sm:$0xff]  }
  0x29   :  { %1435 = vmatprep.subr.bf16.mxu0 %v1900_v41  ;;  %v1991_v41 = vld [vmem:[%s2814_s1 + $0x480] ss:$8 sps:$4 sm:$0xff]  }
  0x2b   :  { %1307 = vmatpush1.bf16.msra.mxu1 %v1902_v42  ;;  %v1996_v42 = vld [vmem:[%s2814_s1 + $0x194] ss:$8 sps:$4 sm:$0xff]  }
  0x2c   :  { %1436 = vmatpush1.bf16.msra.mxu0 %v1903_v43  ;;  %1308 = vmatprep.subr.bf16.mxu1 %v1904_v44  ;;  %v1999_v43 = vld [vmem:[%s2814_s1 + $0x494] ss:$8 sps:$4 sm:$0xff]   ;;  %v1994_v44 = vld [vmem:[%s2814_s1 + $0x190] ss:$8 sps:$4 sm:$0xff]  }
  0x2d   :  { %1437 = vmatprep.subr.bf16.mxu0 %v1906_v45  ;;  %v1997_v45 = vld [vmem:[%s2814_s1 + $0x490] ss:$8 sps:$4 sm:$0xff]  }
  0x2f   :  { %1309 = vmatpush1.bf16.msra.mxu1 %v1908_v46  ;;  %v2002_v46 = vld [vmem:[%s2814_s1 + $0x1a4] ss:$8 sps:$4 sm:$0xff]  }
  0x30   :  { %1438 = vmatpush1.bf16.msra.mxu0 %v1909_v47  ;;  %1310 = vmatprep.subr.bf16.mxu1 %v1910_v49  ;;  %v2005_v47 = vld [vmem:[%s2814_s1 + $0x4a4] ss:$8 sps:$4 sm:$0xff]   ;;  %v2003_v49 = vld [vmem:[%s2814_s1 + $0x4a0] ss:$8 sps:$4 sm:$0xff]  }
  0x31   :  { %1439 = vmatprep.subr.bf16.mxu0 %v1912_v50  ;;  %v2008_v50 = vld [vmem:[%s2814_s1 + $0x1b4] ss:$8 sps:$4 sm:$0xff]  }
  0x33   :  { %1311 = vmatpush1.bf16.msra.mxu1 %v1914_v52  ;;  %v2006_v52 = vld [vmem:[%s2814_s1 + $0x1b0] ss:$8 sps:$4 sm:$0xff]  }
  0x34   :  { %1440 = vmatpush1.bf16.msra.mxu0 %v1915_v53  ;;  %1312 = vmatprep.subr.bf16.mxu1 %v1916_v54  ;;  %v2009_v53 = vld [vmem:[%s2814_s1 + $0x4b0] ss:$8 sps:$4 sm:$0xff]   ;;  %v2014_v54 = vld [vmem:[%s2814_s1 + $0x1c4] ss:$8 sps:$4 sm:$0xff]  }
  0x35   :  { %1441 = vmatprep.subr.bf16.mxu0 %v1918_v55  ;;  %v2017_v55 = vld [vmem:[%s2814_s1 + $0x4c4] ss:$8 sps:$4 sm:$0xff]  }
  0x37   :  { %1313 = vmatpush1.bf16.msra.mxu1 %v1920_v56  ;;  %v2012_v56 = vld [vmem:[%s2814_s1 + $0x1c0] ss:$8 sps:$4 sm:$0xff]  }
  0x38   :  { %1442 = vmatpush1.bf16.msra.mxu0 %v1921_v57  ;;  %1314 = vmatprep.subr.bf16.mxu1 %v1922_v58  ;;  %v2015_v57 = vld [vmem:[%s2814_s1 + $0x4c0] ss:$8 sps:$4 sm:$0xff]   ;;  %v2020_v58 = vld [vmem:[%s2814_s1 + $0x1d4] ss:$8 sps:$4 sm:$0xff]  }
  0x39   :  { %1443 = vmatprep.subr.bf16.mxu0 %v1924_v59  ;;  %v2023_v59 = vld [vmem:[%s2814_s1 + $0x4d4] ss:$8 sps:$4 sm:$0xff]  }
  0x3b   :  { %1315 = vmatpush1.bf16.msra.mxu1 %v1926_v60  ;;  %v2018_v60 = vld [vmem:[%s2814_s1 + $0x1d0] ss:$8 sps:$4 sm:$0xff]  }
  0x3c   :  { %1444 = vmatpush1.bf16.msra.mxu0 %v1927_v61  ;;  %1316 = vmatprep.subr.bf16.mxu1 %v1928_v62  ;;  %v2021_v61 = vld [vmem:[%s2814_s1 + $0x4d0] ss:$8 sps:$4 sm:$0xff]   ;;  %v2026_v62 = vld [vmem:[%s2814_s1 + $0x1e4] ss:$8 sps:$4 sm:$0xff]  }
  0x3d   :  { %1445 = vmatprep.subr.bf16.mxu0 %v1930_v63  ;;  %v2029_v63 = vld [vmem:[%s2814_s1 + $0x4e4] ss:$8 sps:$4 sm:$0xff]  }
  0x3f   :  { %1317 = vmatpush1.bf16.msra.mxu1 %v1932_v0  ;;  %v2024_v0 = vld [vmem:[%s2814_s1 + $0x1e0] ss:$8 sps:$4 sm:$0xff]  }
  0x40   :  { %1446 = vmatpush1.bf16.msra.mxu0 %v1933_v1  ;;  %1329 = vmatprep.subr.bf16.mxu1 %v1939_v2  ;;  %v2027_v1 = vld [vmem:[%s2814_s1 + $0x4e0] ss:$8 sps:$4 sm:$0xff]   ;;  %v2032_v2 = vld [vmem:[%s2814_s1 + $0x1f4] ss:$8 sps:$4 sm:$0xff]  }
  0x41   :  { %1458 = vmatprep.subr.bf16.mxu0 %v1945_v3  ;;  %v2035_v3 = vld [vmem:[%s2814_s1 + $0x4f4] ss:$8 sps:$4 sm:$0xff]  }
  0x42   :  { %1319 = vmatmul.mubr.bf16.vlgmr.msra.gmra.mrb[0].mxu1 %v1934_v4  ;;  %v2030_v4 = vld [vmem:[%s2814_s1 + $0x1f0] ss:$8 sps:$4 sm:$0xff]  }
  0x43   :  { %1448 = vmatmul.mubr.bf16.vlgmr.msra.gmra.mrb[0].mxu0 %v1940_v6  ;;  %1330 = vmatpush1.bf16.msra.mxu1 %v1937_v5  ;;  %v2033_v5 = vld [vmem:[%s2814_s1 + $0x4f0] ss:$8 sps:$4 sm:$0xff]   ;;  %v2041_v6 = vld [vmem:[%s2814_s1 + $0x204] ss:$8 sps:$4 sm:$0xff]  }
  0x44   :  { %1459 = vmatpush1.bf16.msra.mxu0 %v1943_v7  ;;  %1331 = vmatprep.subr.bf16.mxu1 %v1948_v8  ;;  %v2047_v7 = vld [vmem:[%s2814_s1 + $0x504] ss:$8 sps:$4 sm:$0xff]   ;;  %v2036_v8 = vld [vmem:[%s2815_s0 + $0x8] ss:$52 sps:$4 sm:$0xff]  }
  0x45   :  { %1460 = vmatprep.subr.bf16.mxu0 %v1951_v9  ;;  %1361 = vmatprep.mubr.bf16.mxu1 %v2038_v34  ;;  %v2039_v9 = vld [vmem:[%s2814_s1 + $0x200] ss:$8 sps:$4 sm:$0xff]   ;;  %v2080_v34 = vld [vmem:[%s2814_s1 + $0x264] ss:$8 sps:$4 sm:$0xff]  }
  0x46   :  { %1490 = vmatprep.mubr.bf16.mxu0 %v2044_v37  ;;  %v2081_v37 = vld [vmem:[%s2814_s1 + $0x560] ss:$8 sps:$4 sm:$0xff]  }
  0x47   :  { %1332 = vmatpush1.bf16.msra.mxu1 %v1946_v10  ;;  %v2042_v10 = vld [vmem:[%s2815_s0 + $0x20] ss:$52 sps:$4 sm:$0xff]  }
  0x48   :  { %1461 = vmatpush1.bf16.msra.mxu0 %v1949_v11  ;;  %1333 = vmatprep.subr.bf16.mxu1 %v1954_v12  ;;  %v2045_v11 = vld [vmem:[%s2814_s1 + $0x500] ss:$8 sps:$4 sm:$0xff]   ;;  %v2050_v12 = vld [vmem:[%s2814_s1 + $0x214] ss:$8 sps:$4 sm:$0xff]  }
  0x49   :  { %1462 = vmatprep.subr.bf16.mxu0 %v1957_v13  ;;  %v2053_v13 = vld [vmem:[%s2814_s1 + $0x514] ss:$8 sps:$4 sm:$0xff]  }
  0x4b   :  { %1334 = vmatpush1.bf16.msra.mxu1 %v1952_v14  ;;  %v2048_v14 = vld [vmem:[%s2814_s1 + $0x210] ss:$8 sps:$4 sm:$0xff]  }
  0x4c   :  { %1463 = vmatpush1.bf16.msra.mxu0 %v1955_v15  ;;  %1335 = vmatprep.subr.bf16.mxu1 %v1960_v16  ;;  %v2051_v15 = vld [vmem:[%s2814_s1 + $0x510] ss:$8 sps:$4 sm:$0xff]   ;;  %v2056_v16 = vld [vmem:[%s2814_s1 + $0x224] ss:$8 sps:$4 sm:$0xff]  }
  0x4d   :  { %1464 = vmatprep.subr.bf16.mxu0 %v1963_v17  ;;  %v2059_v17 = vld [vmem:[%s2814_s1 + $0x524] ss:$8 sps:$4 sm:$0xff]  }
  0x4f   :  { %1336 = vmatpush1.bf16.msra.mxu1 %v1958_v18  ;;  %v2054_v18 = vld [vmem:[%s2814_s1 + $0x220] ss:$8 sps:$4 sm:$0xff]  }
  0x50   :  { %1465 = vmatpush1.bf16.msra.mxu0 %v1961_v19  ;;  %1337 = vmatprep.subr.bf16.mxu1 %v1966_v20  ;;  %v2140_v19 = vld [vmem:[%s2815_s0 + $0x14] ss:$52 sps:$4 sm:$0xff]  }
  0x51   :  { %1466 = vmatprep.subr.bf16.mxu0 %v1969_v21  ;;  %v2057_v20 = vld [vmem:[%s2814_s1 + $0x520] ss:$8 sps:$4 sm:$0xff]  }
  0x52   :  { %v2143_v21 = vld [vmem:[%s2815_s0 + $0x2c] ss:$52 sps:$4 sm:$0xff]  }
  0x53   :  { %1338 = vmatpush1.bf16.msra.mxu1 %v1964_v22  ;;  %v2062_v22 = vld [vmem:[%s2814_s1 + $0x234] ss:$8 sps:$4 sm:$0xff]  }
  0x54   :  { %1467 = vmatpush1.bf16.msra.mxu0 %v1967_v23  ;;  %1339 = vmatprep.subr.bf16.mxu1 %v1972_v24  ;;  %v2065_v23 = vld [vmem:[%s2814_s1 + $0x534] ss:$8 sps:$4 sm:$0xff]   ;;  %v2060_v24 = vld [vmem:[%s2814_s1 + $0x230] ss:$8 sps:$4 sm:$0xff]  }
  0x55   :  { %1468 = vmatprep.subr.bf16.mxu0 %v1975_v25  ;;  %v2063_v25 = vld [vmem:[%s2814_s1 + $0x530] ss:$8 sps:$4 sm:$0xff]  }
  0x57   :  { %1340 = vmatpush1.bf16.msra.mxu1 %v1970_v26  ;;  %v2068_v26 = vld [vmem:[%s2814_s1 + $0x244] ss:$8 sps:$4 sm:$0xff]  }
  0x58   :  { %1469 = vmatpush1.bf16.msra.mxu0 %v1973_v27  ;;  %1341 = vmatprep.subr.bf16.mxu1 %v1978_v28  ;;  %v2071_v27 = vld [vmem:[%s2814_s1 + $0x544] ss:$8 sps:$4 sm:$0xff]   ;;  %v2066_v28 = vld [vmem:[%s2814_s1 + $0x240] ss:$8 sps:$4 sm:$0xff]  }
  0x59   :  { %1470 = vmatprep.subr.bf16.mxu0 %v1981_v29  ;;  %v2069_v29 = vld [vmem:[%s2814_s1 + $0x540] ss:$8 sps:$4 sm:$0xff]  }
  0x5b   :  { %1342 = vmatpush1.bf16.msra.mxu1 %v1976_v30  ;;  %v2074_v30 = vld [vmem:[%s2814_s1 + $0x254] ss:$8 sps:$4 sm:$0xff]  }
  0x5c   :  { %1471 = vmatpush1.bf16.msra.mxu0 %v1979_v31  ;;  %1343 = vmatprep.subr.bf16.mxu1 %v1984_v32  ;;  %v2077_v31 = vld [vmem:[%s2814_s1 + $0x554] ss:$8 sps:$4 sm:$0xff]   ;;  %v2072_v32 = vld [vmem:[%s2814_s1 + $0x250] ss:$8 sps:$4 sm:$0xff]  }
  0x5d   :  { %1472 = vmatprep.subr.bf16.mxu0 %v1987_v33  ;;  %v2075_v33 = vld [vmem:[%s2814_s1 + $0x550] ss:$8 sps:$4 sm:$0xff]  }
  0x5f   :  { %1344 = vmatpush1.bf16.msra.mxu1 %v1982_v35  ;;  %v2083_v35 = vld [vmem:[%s2814_s1 + $0x564] ss:$8 sps:$4 sm:$0xff]  }
  0x60   :  { %1473 = vmatpush1.bf16.msra.mxu0 %v1985_v36  ;;  %1345 = vmatprep.subr.bf16.mxu1 %v1990_v38  ;;  %v2078_v36 = vld [vmem:[%s2814_s1 + $0x260] ss:$8 sps:$4 sm:$0xff]   ;;  %v2086_v38 = vld [vmem:[%s2814_s1 + $0x274] ss:$8 sps:$4 sm:$0xff]  }
  0x61   :  { %1474 = vmatprep.subr.bf16.mxu0 %v1993_v39  ;;  %v2089_v39 = vld [vmem:[%s2814_s1 + $0x574] ss:$8 sps:$4 sm:$0xff]  }
  0x63   :  { %1346 = vmatpush1.bf16.msra.mxu1 %v1988_v40  ;;  %v2084_v40 = vld [vmem:[%s2814_s1 + $0x270] ss:$8 sps:$4 sm:$0xff]  }
  0x64   :  { %1475 = vmatpush1.bf16.msra.mxu0 %v1991_v41  ;;  %1347 = vmatprep.subr.bf16.mxu1 %v1996_v42  ;;  %v2087_v41 = vld [vmem:[%s2814_s1 + $0x570] ss:$8 sps:$4 sm:$0xff]   ;;  %v2092_v42 = vld [vmem:[%s2814_s1 + $0x284] ss:$8 sps:$4 sm:$0xff]  }
  0x65   :  { %1476 = vmatprep.subr.bf16.mxu0 %v1999_v43  ;;  %v2095_v43 = vld [vmem:[%s2814_s1 + $0x584] ss:$8 sps:$4 sm:$0xff]  }
  0x67   :  { %1348 = vmatpush1.bf16.msra.mxu1 %v1994_v44  ;;  %v2090_v44 = vld [vmem:[%s2814_s1 + $0x280] ss:$8 sps:$4 sm:$0xff]  }
  0x68   :  { %1477 = vmatpush1.bf16.msra.mxu0 %v1997_v45  ;;  %1349 = vmatprep.subr.bf16.mxu1 %v2002_v46  ;;  %v2093_v45 = vld [vmem:[%s2814_s1 + $0x580] ss:$8 sps:$4 sm:$0xff]   ;;  %v2098_v46 = vld [vmem:[%s2814_s1 + $0x294] ss:$8 sps:$4 sm:$0xff]  }
  0x69   :  { %1478 = vmatprep.subr.bf16.mxu0 %v2005_v47  ;;  %v2101_v47 = vld [vmem:[%s2814_s1 + $0x594] ss:$8 sps:$4 sm:$0xff]  }
  0x6b   :  { %1350 = vmatpush1.bf16.msra.mxu1 %v2000_v48  ;;  %v2096_v48 = vld [vmem:[%s2814_s1 + $0x290] ss:$8 sps:$4 sm:$0xff]  }
  0x6c   :  { %1479 = vmatpush1.bf16.msra.mxu0 %v2003_v49  ;;  %1351 = vmatprep.subr.bf16.mxu1 %v2008_v50  ;;  %v2099_v49 = vld [vmem:[%s2814_s1 + $0x590] ss:$8 sps:$4 sm:$0xff]   ;;  %v2104_v50 = vld [vmem:[%s2814_s1 + $0x2a4] ss:$8 sps:$4 sm:$0xff]  }
  0x6d   :  { %1480 = vmatprep.subr.bf16.mxu0 %v2011_v51  ;;  %v2107_v51 = vld [vmem:[%s2814_s1 + $0x5a4] ss:$8 sps:$4 sm:$0xff]  }
  0x6f   :  { %1352 = vmatpush1.bf16.msra.mxu1 %v2006_v52  ;;  %v2102_v52 = vld [vmem:[%s2814_s1 + $0x2a0] ss:$8 sps:$4 sm:$0xff]  }
  0x70   :  { %1481 = vmatpush1.bf16.msra.mxu0 %v2009_v53  ;;  %1353 = vmatprep.subr.bf16.mxu1 %v2014_v54  ;;  %v2105_v53 = vld [vmem:[%s2814_s1 + $0x5a0] ss:$8 sps:$4 sm:$0xff]   ;;  %v2110_v54 = vld [vmem:[%s2814_s1 + $0x2b4] ss:$8 sps:$4 sm:$0xff]  }
  0x71   :  { %1482 = vmatprep.subr.bf16.mxu0 %v2017_v55  ;;  %v2113_v55 = vld [vmem:[%s2814_s1 + $0x5b4] ss:$8 sps:$4 sm:$0xff]  }
  0x73   :  { %1354 = vmatpush1.bf16.msra.mxu1 %v2012_v56  ;;  %v2108_v56 = vld [vmem:[%s2814_s1 + $0x2b0] ss:$8 sps:$4 sm:$0xff]  }
  0x74   :  { %1483 = vmatpush1.bf16.msra.mxu0 %v2015_v57  ;;  %1355 = vmatprep.subr.bf16.mxu1 %v2020_v58  ;;  %v2111_v57 = vld [vmem:[%s2814_s1 + $0x5b0] ss:$8 sps:$4 sm:$0xff]   ;;  %v2116_v58 = vld [vmem:[%s2814_s1 + $0x2c4] ss:$8 sps:$4 sm:$0xff]  }
  0x75   :  { %1484 = vmatprep.subr.bf16.mxu0 %v2023_v59  ;;  %v2119_v59 = vld [vmem:[%s2814_s1 + $0x5c4] ss:$8 sps:$4 sm:$0xff]  }
  0x77   :  { %1356 = vmatpush1.bf16.msra.mxu1 %v2018_v60  ;;  %v2114_v60 = vld [vmem:[%s2814_s1 + $0x2c0] ss:$8 sps:$4 sm:$0xff]  }
  0x78   :  { %1485 = vmatpush1.bf16.msra.mxu0 %v2021_v61  ;;  %1357 = vmatprep.subr.bf16.mxu1 %v2026_v62  ;;  %v2117_v61 = vld [vmem:[%s2814_s1 + $0x5c0] ss:$8 sps:$4 sm:$0xff]   ;;  %v2122_v62 = vld [vmem:[%s2814_s1 + $0x2d4] ss:$8 sps:$4 sm:$0xff]  }
  0x79   :  { %1486 = vmatprep.subr.bf16.mxu0 %v2029_v63  ;;  %v2125_v63 = vld [vmem:[%s2814_s1 + $0x5d4] ss:$8 sps:$4 sm:$0xff]  }
  0x7b   :  { %1358 = vmatpush1.bf16.msra.mxu1 %v2024_v0  ;;  %v2120_v0 = vld [vmem:[%s2814_s1 + $0x2d0] ss:$8 sps:$4 sm:$0xff]  }
  0x7c   :  { %1487 = vmatpush1.bf16.msra.mxu0 %v2027_v1  ;;  %1359 = vmatprep.subr.bf16.mxu1 %v2032_v2  ;;  %v2123_v1 = vld [vmem:[%s2814_s1 + $0x5d0] ss:$8 sps:$4 sm:$0xff]   ;;  %v2128_v2 = vld [vmem:[%s2814_s1 + $0x2e4] ss:$8 sps:$4 sm:$0xff]  }
  0x7d   :  { %1488 = vmatprep.subr.bf16.mxu0 %v2035_v3  ;;  %v2131_v3 = vld [vmem:[%s2814_s1 + $0x5e4] ss:$8 sps:$4 sm:$0xff]  }
  0x7f   :  { %1360 = vmatpush1.bf16.msra.mxu1 %v2030_v4  ;;  %v2126_v4 = vld [vmem:[%s2814_s1 + $0x2e0] ss:$8 sps:$4 sm:$0xff]  }
  0x80   :  { %1489 = vmatpush1.bf16.msra.mxu0 %v2033_v5  ;;  %1372 = vmatprep.subr.bf16.mxu1 %v2041_v6  ;;  %v2129_v5 = vld [vmem:[%s2814_s1 + $0x5e0] ss:$8 sps:$4 sm:$0xff]   ;;  %v2134_v6 = vld [vmem:[%s2814_s1 + $0x2f4] ss:$8 sps:$4 sm:$0xff]  }
  0x81   :  { %1501 = vmatprep.subr.bf16.mxu0 %v2047_v7  ;;  %v2137_v7 = vld [vmem:[%s2814_s1 + $0x5f4] ss:$8 sps:$4 sm:$0xff]  }
  0x82   :  { %1362 = vmatmul.mubr.bf16.vlgmr.msra.gmra.mrb[0].mxu1 %v2036_v8  ;;  %v2132_v8 = vld [vmem:[%s2814_s1 + $0x2f0] ss:$8 sps:$4 sm:$0xff]  }
  0x83   :  { %1491 = vmatmul.mubr.bf16.vlgmr.msra.gmra.mrb[0].mxu0 %v2042_v10  ;;  %1373 = vmatpush1.bf16.msra.mxu1 %v2039_v9  ;;  %v2135_v9 = vld [vmem:[%s2814_s1 + $0x5f0] ss:$8 sps:$4 sm:$0xff]   ;;  %v2146_v10 = vld [vmem:[%s2814_s1 + $0x604] ss:$8 sps:$4 sm:$0xff]  }
  0x84   :  { %1502 = vmatpush1.bf16.msra.mxu0 %v2045_v11  ;;  %1374 = vmatprep.subr.bf16.mxu1 %v2050_v12  ;;  %v2138_v11 = vld [vmem:[%s2815_s0 + $0x10] ss:$52 sps:$4 sm:$0xff]   ;;  %v2141_v12 = vld [vmem:[%s2815_s0 + $0x28] ss:$52 sps:$4 sm:$0xff]  }
  0x85   :  { %1503 = vmatprep.subr.bf16.mxu0 %v2053_v13  ;;  %1404 = vmatprep.mubr.bf16.mxu1 %v2140_v19  ;;  %v2144_v13 = vld [vmem:[%s2814_s1 + $0x600] ss:$8 sps:$4 sm:$0xff]  }
  0x86   :  { %1533 = vmatprep.mubr.bf16.mxu0 %v2143_v21 }
  0x87   :  { %1375 = vmatpush1.bf16.msra.mxu1 %v2048_v14  ;;  %v2149_v14 = vld [vmem:[%s2814_s1 + $0x614] ss:$8 sps:$4 sm:$0xff]  }
  0x88   :  { %1504 = vmatpush1.bf16.msra.mxu0 %v2051_v15  ;;  %1376 = vmatprep.subr.bf16.mxu1 %v2056_v16  ;;  %v2147_v15 = vld [vmem:[%s2814_s1 + $0x610] ss:$8 sps:$4 sm:$0xff]   ;;  %v2151_v16 = vmov 0  }
  0x89   :  { %1505 = vmatprep.subr.bf16.mxu0 %v2059_v17  ;;  %v2150_v17 = vld [vmem:[%s2815_s0 + $0x30] ss:$52 sps:$4 sm:$0xff]  }
  0x8b   :  { %1377 = vmatpush1.bf16.msra.mxu1 %v2054_v18  ;;  %v227_v18 = vlaneseq }
  0x8c   :  { %1506 = vmatpush1.bf16.msra.mxu0 %v2057_v20  ;;  %1378 = vmatprep.subr.bf16.mxu1 %v2062_v22 }
  0x8d   :  { %1507 = vmatprep.subr.bf16.mxu0 %v2065_v23  ;;  %v228_v19 = vshrl.u32 %v227_v18, 7 }
  0x8f   :  { %1379 = vmatpush1.bf16.msra.mxu1 %v2060_v24  ;;  %v229_v23 = vsub.s32 0, %v228_v19 }
  0x90   :  { %1508 = vmatpush1.bf16.msra.mxu0 %v2063_v25  ;;  %1380 = vmatprep.subr.bf16.mxu1 %v2068_v26  ;;  %v225_v25 = vld [vmem:[%s2816_s2] sm:$0x3]  ;;  %v233_v26 = vsub.s32 1, %v228_v19 }
  0x91   :  { %1509 = vmatprep.subr.bf16.mxu0 %v2071_v27  ;;  %v230_v27 = vrot.slane %v225_v25, %v229_v23 }
  0x93   :  { %1381 = vmatpush1.bf16.msra.mxu1 %v2066_v28  ;;  %v234_v28 = vrot.slane %v225_v25, %v233_v26 }
  0x94   :  { %1510 = vmatpush1.bf16.msra.mxu0 %v2069_v29  ;;  %1382 = vmatprep.subr.bf16.mxu1 %v2074_v30 }
  0x95   :  { %1511 = vmatprep.subr.bf16.mxu0 %v2077_v31 }
  0x97   :  { %1383 = vmatpush1.bf16.msra.mxu1 %v2072_v32 }
  0x98   :  { %1512 = vmatpush1.bf16.msra.mxu0 %v2075_v33  ;;  %1384 = vmatprep.subr.bf16.mxu1 %v2080_v34 }
  0x99   :  { %1513 = vmatprep.subr.bf16.mxu0 %v2083_v35 }
  0x9b   :  { %1385 = vmatpush1.bf16.msra.mxu1 %v2078_v36 }
  0x9c   :  { %1514 = vmatpush1.bf16.msra.mxu0 %v2081_v37  ;;  %1386 = vmatprep.subr.bf16.mxu1 %v2086_v38 }
  0x9d   :  { %1515 = vmatprep.subr.bf16.mxu0 %v2089_v39 }
  0x9f   :  { %1387 = vmatpush1.bf16.msra.mxu1 %v2084_v40 }
  0xa0   :  { %1516 = vmatpush1.bf16.msra.mxu0 %v2087_v41  ;;  %1388 = vmatprep.subr.bf16.mxu1 %v2092_v42 }
  0xa1   :  { %1517 = vmatprep.subr.bf16.mxu0 %v2095_v43 }
  0xa3   :  { %1389 = vmatpush1.bf16.msra.mxu1 %v2090_v44 }
  0xa4   :  { %1518 = vmatpush1.bf16.msra.mxu0 %v2093_v45  ;;  %1390 = vmatprep.subr.bf16.mxu1 %v2098_v46 }
  0xa5   :  { %1519 = vmatprep.subr.bf16.mxu0 %v2101_v47 }
  0xa7   :  { %1391 = vmatpush1.bf16.msra.mxu1 %v2096_v48 }
  0xa8   :  { %1520 = vmatpush1.bf16.msra.mxu0 %v2099_v49  ;;  %1392 = vmatprep.subr.bf16.mxu1 %v2104_v50 }
  0xa9   :  { %1521 = vmatprep.subr.bf16.mxu0 %v2107_v51 }
  0xab   :  { %1393 = vmatpush1.bf16.msra.mxu1 %v2102_v52 }
  0xac   :  { %1522 = vmatpush1.bf16.msra.mxu0 %v2105_v53  ;;  %1394 = vmatprep.subr.bf16.mxu1 %v2110_v54 }
  0xad   :  { %1523 = vmatprep.subr.bf16.mxu0 %v2113_v55 }
  0xaf   :  { %1395 = vmatpush1.bf16.msra.mxu1 %v2108_v56 }
  0xb0   :  { %1524 = vmatpush1.bf16.msra.mxu0 %v2111_v57  ;;  %1396 = vmatprep.subr.bf16.mxu1 %v2116_v58 }
  0xb1   :  { %1525 = vmatprep.subr.bf16.mxu0 %v2119_v59 }
  0xb3   :  { %1397 = vmatpush1.bf16.msra.mxu1 %v2114_v60 }
  0xb4   :  { %1526 = vmatpush1.bf16.msra.mxu0 %v2117_v61  ;;  %1398 = vmatprep.subr.bf16.mxu1 %v2122_v62 }
  0xb5   :  { %1527 = vmatprep.subr.bf16.mxu0 %v2125_v63 }
  0xb7   :  { %1399 = vmatpush1.bf16.msra.mxu1 %v2120_v0 }
  0xb8   :  { %1528 = vmatpush1.bf16.msra.mxu0 %v2123_v1  ;;  %1400 = vmatprep.subr.bf16.mxu1 %v2128_v2 }
  0xb9   :  { %1529 = vmatprep.subr.bf16.mxu0 %v2131_v3 }
  0xbb   :  { %1401 = vmatpush1.bf16.msra.mxu1 %v2126_v4 }
  0xbc   :  { %1530 = vmatpush1.bf16.msra.mxu0 %v2129_v5  ;;  %1402 = vmatprep.subr.bf16.mxu1 %v2134_v6 }
  0xbd   :  { %1531 = vmatprep.subr.bf16.mxu0 %v2137_v7 }
  0xbf   :  { %1403 = vmatpush1.bf16.msra.mxu1 %v2132_v8 }
  0xc0   :  { %1532 = vmatpush1.bf16.msra.mxu0 %v2135_v9 }
  0xc1   :  { %1544 = vmatprep.subr.bf16.mxu0 %v2146_v10 }
  0xc2   :  { %1405 = vmatmul.mubr.bf16.vlgmr.msra.gmra.mrb[0].mxu1 %v2138_v11 }
  0xc3   :  { %1534 = vmatmul.mubr.bf16.vlgmr.msra.gmra.mrb[0].mxu0 %v2141_v12 }
  0xc4   :  { %1545 = vmatpush1.bf16.msra.mxu0 %v2144_v13  ;;  %1576 = vmatprep.mubr.bf16.mxu0 %v2151_v16 }
  0xc5   :  { %1546 = vmatprep.subr.bf16.mxu0 %v2149_v14 }
  0xc8   :  { %1547 = vmatpush1.bf16.msra.mxu0 %v2147_v15 }
  0xcf   :  { %1808 = vmatmul.mubr.msk.bf16.vlgmr.msra.gmra.mrb[0].mxu0 %vm1282_vm0, %v2150_v17 }
 0x195   :  { %v1406_v20 = vpop.f32.mrb[0].mxu1 }
 0x196   :  { %v1408_v21 = vpop.f32.mrb[1].mxu1  ;;  %v1809_v29 = vadd.f32 %v1406_v20, %v230_v27 }
 0x197   :  { %v1410_v22 = vpop.f32.mrb[2].mxu1  ;;  %v1811_v30 = vadd.f32 %v1408_v21, %v234_v28 }
 0x198   :  { %v1412_v24 = vpop.f32.mrb[3].mxu1  ;;  %v1813_v32 = vadd.f32 %v1410_v22, %v230_v27 }
 0x199   :  { %v1815_v35 = vadd.f32 %v1412_v24, %v234_v28 }
 0x1a2   :  { %v1578_v31 = vpop.f32.mrb[0].mxu0 }
 0x1a3   :  { %v1810_v33 = vadd.f32 %v1809_v29, %v1578_v31  ;;  %v1580_v34 = vpop.f32.mrb[1].mxu0 }
 0x1a4   :  { %v1812_v36 = vadd.f32 %v1811_v30, %v1580_v34  ;;  %v1582_v37 = vpop.f32.mrb[2].mxu0 }
 0x1a5   :  { %v1587_v38 = vmax.f32 %v1810_v33, 0.0  ;;  %v1814_v39 = vadd.f32 %v1813_v32, %v1582_v37  ;;  %v1584_v40 = vpop.f32.mrb[3].mxu0 }
 0x1a6   :  { %v1588_v41 = vmax.f32 %v1812_v36, 0.0  ;;  %v1816_v42 = vadd.f32 %v1815_v35, %v1584_v40 }
 0x1a7   :  { %1591 = vst [vmem:[%s2817_s3] sm:$0xff] %v1587_v38  ;;  %v1589_v43 = vmax.f32 %v1814_v39, 0.0 }
 0x1a8   :  { %1592 = vst [vmem:[%s2817_s3 + $0x8] sm:$0xff] %v1588_v41  ;;  %v1590_v44 = vmax.f32 %v1816_v42, 0.0 }
 0x1a9   :  { %1593 = vst [vmem:[%s2817_s3 + $0x10] sm:$0xff] %v1589_v43 }
 0x1aa   :  { %1594 = vst [vmem:[%s2817_s3 + $0x18] sm:$0xff] %v1590_v44 }

// kernel: segmented_faster_rcnn_forward.15
= control target key start
LH: loop header
LB: loop body
LE: loop exit
PB: predicated region body
PF: predicated region fallthrough
CT: control target
= control target key end

     0   :  { %s352_s1 = inlined_call_operand.vmem [shape: bf16[256,128], index: 1, kind: input, shape index: {}]   ;;  %s353_s0 = inlined_call_operand.vmem [shape: bf16[16,256], index: 0, kind: input, shape index: {}]   ;;  %s354_s2 = inlined_call_operand.vmem [shape: f32[1,128], index: 2, kind: input, shape index: {}]   ;;  %s355_s3 = inlined_call_operand.vmem [shape: f32[16,128], index: 3, kind: output, shape index: {}]  }
   0x1   :  { %v250_v0 = vld [vmem:[%s352_s1 + $0x40] sm:$0xff]   ;;  %v252_v2 = vld [vmem:[%s352_s1 + $0x48] sm:$0xff]   ;;  %v254_v4 = vld [vmem:[%s352_s1 + $0x50] sm:$0xff]  }
   0x2   :  { %v251_v1 = vld [vmem:[%s352_s1] sm:$0xff]   ;;  %228 = vmatprep.subr.bf16.mxu0 %v250_v0  ;;  %v253_v3 = vld [vmem:[%s352_s1 + $0x8] sm:$0xff]   ;;  %v255_v5 = vld [vmem:[%s352_s1 + $0x10] sm:$0xff]  }
   0x3   :  { %229 = vmatpush3.bf16.msra.mxu0 %v251_v1  ;;  %v256_v6 = vld [vmem:[%s352_s1 + $0x58] sm:$0xff]   ;;  %v258_v8 = vld [vmem:[%s352_s1 + $0x60] sm:$0xff]   ;;  %v260_v10 = vld [vmem:[%s352_s1 + $0x68] sm:$0xff]  }
   0x4   :  { %230 = vmatprep.subr.bf16.mxu0 %v252_v2  ;;  %v257_v7 = vld [vmem:[%s352_s1 + $0x18] sm:$0xff]   ;;  %v259_v9 = vld [vmem:[%s352_s1 + $0x20] sm:$0xff]   ;;  %v261_v12 = vld [vmem:[%s352_s1 + $0x28] sm:$0xff]  }
   0x5   :  { %v268_v11 = vld [vmem:[%s353_s0 + $0x4] ss:$8 sps:$4 sm:$0xff]   ;;  %v262_v13 = vld [vmem:[%s352_s1 + $0x70] sm:$0xff]   ;;  %v264_v15 = vld [vmem:[%s352_s1 + $0x78] sm:$0xff]  }
   0x6   :  { %194 = vmatprep.mubr.bf16.mxu0 %v268_v11  ;;  %v263_v14 = vld [vmem:[%s352_s1 + $0x30] sm:$0xff]   ;;  %v265_v16 = vld [vmem:[%s352_s1 + $0x38] sm:$0xff]   ;;  %v266_v17 = vld [vmem:[%s353_s0] ss:$8 sps:$4 sm:$0xff]  }
   0x7   :  { %231 = vmatpush3.bf16.msra.mxu0 %v253_v3  ;;  %v209_v19 = vld [vmem:[%s354_s2] ss:$0 sm:$0xff] }
   0x8   :  { %232 = vmatprep.subr.bf16.mxu0 %v254_v4 }
   0xb   :  { %233 = vmatpush3.bf16.msra.mxu0 %v255_v5 }
   0xc   :  { %234 = vmatprep.subr.bf16.mxu0 %v256_v6 }
   0xf   :  { %235 = vmatpush3.bf16.msra.mxu0 %v257_v7 }
  0x10   :  { %236 = vmatprep.subr.bf16.mxu0 %v258_v8 }
  0x13   :  { %237 = vmatpush3.bf16.msra.mxu0 %v259_v9 }
  0x14   :  { %238 = vmatprep.subr.bf16.mxu0 %v260_v10 }
  0x17   :  { %239 = vmatpush3.bf16.msra.mxu0 %v261_v12 }
  0x18   :  { %240 = vmatprep.subr.bf16.mxu0 %v262_v13 }
  0x1b   :  { %241 = vmatpush3.bf16.msra.mxu0 %v263_v14 }
  0x1c   :  { %242 = vmatprep.subr.bf16.mxu0 %v264_v15 }
  0x1f   :  { %243 = vmatpush3.bf16.msra.mxu0 %v265_v16 }
  0x22   :  { %195 = vmatmul.mubr.bf16.vlgmr.msra.gmra.mrb[0].mxu0 %v266_v17 }
  0xf5   :  { %v244_v18 = vpop.f32.mrb[0].mxu0 }
  0xf6   :  { %v245_v20 = vpop.f32.mrb[1].mxu0 }
  0xf7   :  { %v246_v21 = vadd.f32 %v245_v20, %v244_v18  ;;  %v247_v22 = vpop.f32.mrb[2].mxu0 }
  0xf8   :  { %v248_v23 = vpop.f32.mrb[3].mxu0 }
  0xf9   :  { %v197_v24 = vadd.f32 %v246_v21, %v209_v19  ;;  %v249_v25 = vadd.f32 %v248_v23, %v247_v22 }
  0xfb   :  { %203 = vst [vmem:[%s355_s3] sm:$0xff] %v197_v24  ;;  %v200_v26 = vadd.f32 %v249_v25, %v209_v19 }
  0xfd   :  { %204 = vst [vmem:[%s355_s3 + $0x8] sm:$0xff] %v200_v26 }

</bundles_post_ra>
